<compile_context>
chip_gen: v5e
topology: v5e:2x2
jax: 0.10.0
libtpu: 0.0.40
codegen_flags: <defaults>
</compile_context>

<pallas_src>
import math
import functools

import jax
import jax.numpy as jnp
from jax.experimental import pallas as pl
from jax.experimental.pallas import tpu as pltpu  # noqa: F401  (kept for TPU-specific tuning hooks)

# ---------------- synthetic config (mirrors _init_configs) -----------------
EMBED_DIM = 32          # config['embed_dim']
IN_CHANNELS = 4         # config['in_channels']
IMG_SIZE = 16           # vision_config['img_size']
PATCH_SIZE = 4          # vision_config['patch_size']
NUM_LAYERS = 2          # config['num_layers']
NUM_HEADS = 4           # config['num_heads']
FF_DIM = 64             # config['ff_dim']
BASE_NUM_PATCHES = (IMG_SIZE // PATCH_SIZE) ** 2           # 16
PATCH_DIM = IN_CHANNELS * PATCH_SIZE ** 2                  # 64
SEQ = BASE_NUM_PATCHES + 1                                 # 17 (CLS + patches)
HEAD_DIM = EMBED_DIM // NUM_HEADS                          # 8
PROJ_PAD = ((PATCH_DIM + 127) // 128) * 128                # 128: lane-dense store


# ------------------------------- kernel -------------------------------------
def _fused_decoder_kernel(x_ref, pos_ref, bias_ref, ln_ref,
                          wq_ref, bq_ref, wk_ref, bk_ref, wv_ref, bv_ref,
                          wo_ref, bo_ref, w1_ref, b1_ref, w2_ref, b2_ref,
                          pw_ref, pb_ref, o_ref,
                          *, num_layers, num_heads, head_dim):
    """Entire VisionDecoder transformer forward for all B*S rows at once."""
    f32 = jnp.float32
    scale = 1.0 / math.sqrt(head_dim)

    # --- positional-embedding add (fused) ---
    x = x_ref[...].astype(f32) + pos_ref[...]                # (M, D), M = B*S
    attn_bias = bias_ref[...][None, :, :]                    # (1, M, M), hoisted

    def layer_norm(v, g, b):
        mu = jnp.mean(v, axis=-1, keepdims=True)
        var = jnp.mean((v - mu) ** 2, axis=-1, keepdims=True)
        return (v - mu) * jax.lax.rsqrt(var + 1e-5) * g + b

    for l in range(num_layers):                              # static unroll (L=2)
        ln = ln_ref[l]                                       # (4, D)

        # ---- multi-head self-attention (pre-LN) ----
        h = layer_norm(x, ln[0:1, :], ln[1:2, :])            # (M, D)
        # Per-head weights are pre-split in the wrapper; stack heads along a
        # leading batch axis -> (H, M, hd).  No lane-dim slicing anywhere.
        q = jnp.stack([jnp.dot(h, wq_ref[l, hh], preferred_element_type=f32)
                       for hh in range(num_heads)], axis=0) + bq_ref[l]
        k = jnp.stack([jnp.dot(h, wk_ref[l, hh], preferred_element_type=f32)
                       for hh in range(num_heads)], axis=0) + bk_ref[l]
        v = jnp.stack([jnp.dot(h, wv_ref[l, hh], preferred_element_type=f32)
                       for hh in range(num_heads)], axis=0) + bv_ref[l]

        # Head-batched scores over all B*S rows; cross-batch pairs are masked
        # out with a large negative additive bias.
        s = jnp.einsum('hmd,hnd->hmn', q, k,
                       preferred_element_type=f32) * scale + attn_bias
        s = s - jnp.max(s, axis=-1, keepdims=True)
        p = jnp.exp(s)
        p = p * pl.reciprocal(jnp.sum(p, axis=-1, keepdims=True), approx=True)
        ctx = jnp.einsum('hmn,hnd->hmd', p, v,
                         preferred_element_type=f32)         # (H, M, hd)

        # Output projection accumulated per head (no lane-axis concat).
        attn_out = bo_ref[l]                                 # (1, D), broadcasts
        for hh in range(num_heads):
            attn_out = attn_out + jnp.dot(ctx[hh], wo_ref[l, hh],
                                          preferred_element_type=f32)
        x = x + attn_out

        # ---- feed-forward (pre-LN, ReLU) ----
        h2 = layer_norm(x, ln[2:3, :], ln[3:4, :])
        ff = jnp.dot(h2, w1_ref[l], preferred_element_type=f32) + b1_ref[l]
        ff = jnp.maximum(ff, 0.0)
        x = x + jnp.dot(ff, w2_ref[l], preferred_element_type=f32) + b2_ref[l]

    # ---- final projection + sigmoid ----
    # Projection weight is zero-padded to 128 output lanes so this store is
    # lane-dense; CLS rows and the padding are dropped in the JAX wrapper.
    # Sigmoid is elementwise, so applying it before the (pure permutation)
    # patch re-assembly matches the PyTorch `output_act(assemble(proj(x)))`.
    y = jnp.dot(x, pw_ref[...], preferred_element_type=f32) + pb_ref[...]
    o_ref[...] = jax.nn.sigmoid(y).astype(o_ref.dtype)


# -------------------------- plain-JAX glue ----------------------------------
def sinusoidal_encoding(max_len, embed_dim):
    pe = jnp.zeros((1, max_len, embed_dim), jnp.float32)
    position = jnp.arange(0, max_len, dtype=jnp.float32)[:, None]
    div_term = jnp.exp(jnp.arange(0, embed_dim, 2, dtype=jnp.float32)
                       * (-math.log(10000.0) / embed_dim))
    pe = pe.at[0, :, 0::2].set(jnp.sin(position * div_term))
    pe = pe.at[0, :, 1::2].set(jnp.cos(position * div_term))
    return pe


def assemble_patches(patches, orig_shape):
    b, num_patches, _ = patches.shape
    c, p = IN_CHANNELS, PATCH_SIZE
    h, w = orig_shape
    gh = gw = int(math.sqrt(num_patches))
    x = patches.reshape(b, gh, gw, c, p, p)
    x = jnp.transpose(x, (0, 3, 1, 4, 2, 5))
    x = x.reshape(b, c, gh * p, gw * p)
    return x[:, :, :h, :w]


def _cross_batch_bias(b, s):
    """Additive attention bias: 0 within a batch element, -1e30 across."""
    ids = jnp.arange(b * s, dtype=jnp.int32) // s
    same = ids[:, None] == ids[None, :]
    return jnp.where(same, 0.0, -1e30).astype(jnp.float32)


def init_params(key):
    L, D, H, hd, F = NUM_LAYERS, EMBED_DIM, NUM_HEADS, HEAD_DIM, FF_DIM
    k = jax.random.split(key, 7)
    ln_one = jnp.stack([jnp.ones((D,)), jnp.zeros((D,)),
                        jnp.ones((D,)), jnp.zeros((D,))])   # ln1_g, ln1_b, ln2_g, ln2_b
    params = {
        "pos_embed": sinusoidal_encoding(SEQ, D),
        "ln": jnp.tile(ln_one[None], (L, 1, 1)).astype(jnp.float32),   # (L, 4, D)
        # per-head pre-split attention weights (avoid lane slicing in-kernel)
        "wq": 0.02 * jax.random.normal(k[0], (L, H, D, hd), jnp.float32),
        "wk": 0.02 * jax.random.normal(k[1], (L, H, D, hd), jnp.float32),
        "wv": 0.02 * jax.random.normal(k[2], (L, H, D, hd), jnp.float32),
        "bq": jnp.zeros((L, H, 1, hd), jnp.float32),
        "bk": jnp.zeros((L, H, 1, hd), jnp.float32),
        "bv": jnp.zeros((L, H, 1, hd), jnp.float32),
        "wo": 0.02 * jax.random.normal(k[3], (L, H, hd, D), jnp.float32),
        "bo": jnp.zeros((L, 1, D), jnp.float32),
        "w1": 0.02 * jax.random.normal(k[4], (L, D, F), jnp.float32),
        "b1": jnp.zeros((L, 1, F), jnp.float32),
        "w2": 0.02 * jax.random.normal(k[5], (L, F, D), jnp.float32),
        "b2": jnp.zeros((L, 1, D), jnp.float32),
    }
    proj_w = 0.02 * jax.random.normal(k[6], (D, PATCH_DIM), jnp.float32)
    proj_b = jnp.zeros((1, PATCH_DIM), jnp.float32)
    # Zero-pad projection output columns to 128 lanes (lane-dense HBM store);
    # the padding is sliced off in the wrapper.
    params["proj_w"] = jnp.pad(proj_w, ((0, 0), (0, PROJ_PAD - PATCH_DIM)))
    params["proj_b"] = jnp.pad(proj_b, ((0, 0), (0, PROJ_PAD - PATCH_DIM)))
    return params


def vision_decoder_forward(x, params, orig_shape=None):
    """Transformer-branch forward: x (B, seq, embed_dim) -> image (B, C, H, W)."""
    if orig_shape is None:
        orig_shape = (IMG_SIZE, IMG_SIZE)
    B, S, D = x.shape
    assert S <= params["pos_embed"].shape[1], "pos embed smaller than seq len"
    M = B * S

    # Fold batch into the matmul M dimension (pure layout, plain JAX).
    x2d = x.reshape(M, D)
    pos = jnp.broadcast_to(params["pos_embed"][:, :S, :], (B, S, D)).reshape(M, D)
    attn_bias = _cross_batch_bias(B, S)                    # (M, M)

    kernel = functools.partial(_fused_decoder_kernel, num_layers=NUM_LAYERS,
                               num_heads=NUM_HEADS, head_dim=HEAD_DIM)
    out = pl.pallas_call(                                  # single fused launch, no grid
        kernel,
        out_shape=jax.ShapeDtypeStruct((M, PROJ_PAD), x.dtype),
    )(x2d, pos, attn_bias, params["ln"],
      params["wq"], params["bq"], params["wk"], params["bk"],
      params["wv"], params["bv"], params["wo"], params["bo"],
      params["w1"], params["b1"], params["w2"], params["b2"],
      params["proj_w"], params["proj_b"])

    # Drop lane padding and the CLS row, then reassemble patches (pure
    # reshape/permute, free in XLA).
    patches = out[:, :PATCH_DIM].reshape(B, S, PATCH_DIM)[:, 1:, :]
    return assemble_patches(patches, orig_shape)


# --------------------------------- main --------------------------------------
if __name__ == "__main__":
    key = jax.random.PRNGKey(0)
    k_in, k_par = jax.random.split(key)
    B = 2
    x = jax.random.normal(k_in, (B, SEQ, EMBED_DIM), jnp.float32)
    params = init_params(k_par)

    fwd = jax.jit(vision_decoder_forward)
    img = fwd(x, params)
    jax.block_until_ready(img)

    assert img.shape == (B, IN_CHANNELS, IMG_SIZE, IMG_SIZE), img.shape
    assert bool(jnp.all(jnp.isfinite(img)))
    print("KERNEL_OK")
</pallas_src>

<mosaic_0001>
module attributes {stable_mosaic.version = 11 : i64} {
  func.func @_fused_decoder_kernel(%arg0: memref<34x32xf32, #tpu.memory_space<vmem>>, %arg1: memref<34x32xf32, #tpu.memory_space<vmem>>, %arg2: memref<34x34xf32, #tpu.memory_space<vmem>>, %arg3: memref<2x4x32xf32, #tpu.memory_space<vmem>>, %arg4: memref<2x4x32x8xf32, #tpu.memory_space<vmem>>, %arg5: memref<2x4x1x8xf32, #tpu.memory_space<vmem>>, %arg6: memref<2x4x32x8xf32, #tpu.memory_space<vmem>>, %arg7: memref<2x4x1x8xf32, #tpu.memory_space<vmem>>, %arg8: memref<2x4x32x8xf32, #tpu.memory_space<vmem>>, %arg9: memref<2x4x1x8xf32, #tpu.memory_space<vmem>>, %arg10: memref<2x4x8x32xf32, #tpu.memory_space<vmem>>, %arg11: memref<2x1x32xf32, #tpu.memory_space<vmem>>, %arg12: memref<2x32x64xf32, #tpu.memory_space<vmem>>, %arg13: memref<2x1x64xf32, #tpu.memory_space<vmem>>, %arg14: memref<2x64x32xf32, #tpu.memory_space<vmem>>, %arg15: memref<2x1x32xf32, #tpu.memory_space<vmem>>, %arg16: memref<32x128xf32, #tpu.memory_space<vmem>>, %arg17: memref<1x128xf32, #tpu.memory_space<vmem>>, %arg18: memref<34x128xf32, #tpu.memory_space<vmem>>) attributes {dimension_semantics = [], scalar_prefetch = 0 : i64, scratch_operands = 0 : i64, tpu.core_type = #tpu.core_type<tc>} {
    %c0 = arith.constant 0 : index
    %c0_0 = arith.constant 0 : index
    %0 = vector.load %arg0[%c0, %c0_0] : memref<34x32xf32, #tpu.memory_space<vmem>>, vector<34x32xf32>
    %c0_1 = arith.constant 0 : index
    %c0_2 = arith.constant 0 : index
    %1 = vector.load %arg1[%c0_1, %c0_2] : memref<34x32xf32, #tpu.memory_space<vmem>>, vector<34x32xf32>
    %2 = arith.addf %0, %1 : vector<34x32xf32>
    %c0_3 = arith.constant 0 : index
    %c0_4 = arith.constant 0 : index
    %3 = vector.load %arg2[%c0_3, %c0_4] : memref<34x34xf32, #tpu.memory_space<vmem>>, vector<34x34xf32>
    %4 = vector.shape_cast %3 : vector<34x34xf32> to vector<1x34x34xf32>
    %c0_5 = arith.constant 0 : index
    %c0_6 = arith.constant 0 : index
    %c0_7 = arith.constant 0 : index
    %5 = vector.load %arg3[%c0_5, %c0_6, %c0_7] : memref<2x4x32xf32, #tpu.memory_space<vmem>>, vector<1x4x32xf32>
    %6 = vector.shape_cast %5 : vector<1x4x32xf32> to vector<4x32xf32>
    %7 = vector.extract_strided_slice %6 {offsets = [0, 0], sizes = [1, 32], strides = [1, 1]} : vector<4x32xf32> to vector<1x32xf32>
    %8 = vector.extract_strided_slice %6 {offsets = [1, 0], sizes = [1, 32], strides = [1, 1]} : vector<4x32xf32> to vector<1x32xf32>
    %cst = arith.constant dense<0.000000e+00> : vector<34xf32>
    %9 = vector.multi_reduction <add>, %2, %cst [1] : vector<34x32xf32> to vector<34xf32>
    %10 = vector.shape_cast %9 : vector<34xf32> to vector<34x1xf32>
    %cst_8 = arith.constant 3.200000e+01 : f32
    %11 = vector.broadcast %cst_8 : f32 to vector<34x1xf32>
    %12 = arith.divf %10, %11 : vector<34x1xf32>
    %13 = vector.broadcast %12 : vector<34x1xf32> to vector<34x32xf32>
    %14 = arith.subf %2, %13 : vector<34x32xf32>
    %15 = arith.mulf %14, %14 : vector<34x32xf32>
    %cst_9 = arith.constant dense<0.000000e+00> : vector<34xf32>
    %16 = vector.multi_reduction <add>, %15, %cst_9 [1] : vector<34x32xf32> to vector<34xf32>
    %17 = vector.shape_cast %16 : vector<34xf32> to vector<34x1xf32>
    %cst_10 = arith.constant 3.200000e+01 : f32
    %18 = vector.broadcast %cst_10 : f32 to vector<34x1xf32>
    %19 = arith.divf %17, %18 : vector<34x1xf32>
    %20 = vector.broadcast %12 : vector<34x1xf32> to vector<34x32xf32>
    %21 = arith.subf %2, %20 : vector<34x32xf32>
    %cst_11 = arith.constant 9.99999974E-6 : f32
    %22 = vector.broadcast %cst_11 : f32 to vector<34x1xf32>
    %23 = arith.addf %19, %22 : vector<34x1xf32>
    %24 = math.rsqrt %23 : vector<34x1xf32>
    %25 = vector.broadcast %24 : vector<34x1xf32> to vector<34x32xf32>
    %26 = arith.mulf %21, %25 : vector<34x32xf32>
    %27 = vector.broadcast %7 : vector<1x32xf32> to vector<34x32xf32>
    %28 = arith.mulf %26, %27 : vector<34x32xf32>
    %29 = vector.broadcast %8 : vector<1x32xf32> to vector<34x32xf32>
    %30 = arith.addf %28, %29 : vector<34x32xf32>
    %c0_12 = arith.constant 0 : index
    %c0_13 = arith.constant 0 : index
    %c0_14 = arith.constant 0 : index
    %c0_15 = arith.constant 0 : index
    %31 = vector.load %arg4[%c0_12, %c0_13, %c0_14, %c0_15] : memref<2x4x32x8xf32, #tpu.memory_space<vmem>>, vector<1x1x32x8xf32>
    %32 = vector.shape_cast %31 : vector<1x1x32x8xf32> to vector<32x8xf32>
    %cst_16 = arith.constant dense<0.000000e+00> : vector<34x8xf32>
    %33 = tpu.matmul %30, %32, %cst_16 {dimension_numbers = #tpu.dot_dimension_numbers<[1], [0], [0], [1], [0, 0, 1, 1], [], []>} : vector<34x32xf32>, vector<32x8xf32>, vector<34x8xf32> -> vector<34x8xf32>
    %c0_17 = arith.constant 0 : index
    %c1 = arith.constant 1 : index
    %c0_18 = arith.constant 0 : index
    %c0_19 = arith.constant 0 : index
    %34 = vector.load %arg4[%c0_17, %c1, %c0_18, %c0_19] : memref<2x4x32x8xf32, #tpu.memory_space<vmem>>, vector<1x1x32x8xf32>
    %35 = vector.shape_cast %34 : vector<1x1x32x8xf32> to vector<32x8xf32>
    %cst_20 = arith.constant dense<0.000000e+00> : vector<34x8xf32>
    %36 = tpu.matmul %30, %35, %cst_20 {dimension_numbers = #tpu.dot_dimension_numbers<[1], [0], [0], [1], [0, 0, 1, 1], [], []>} : vector<34x32xf32>, vector<32x8xf32>, vector<34x8xf32> -> vector<34x8xf32>
    %c0_21 = arith.constant 0 : index
    %c2 = arith.constant 2 : index
    %c0_22 = arith.constant 0 : index
    %c0_23 = arith.constant 0 : index
    %37 = vector.load %arg4[%c0_21, %c2, %c0_22, %c0_23] : memref<2x4x32x8xf32, #tpu.memory_space<vmem>>, vector<1x1x32x8xf32>
    %38 = vector.shape_cast %37 : vector<1x1x32x8xf32> to vector<32x8xf32>
    %cst_24 = arith.constant dense<0.000000e+00> : vector<34x8xf32>
    %39 = tpu.matmul %30, %38, %cst_24 {dimension_numbers = #tpu.dot_dimension_numbers<[1], [0], [0], [1], [0, 0, 1, 1], [], []>} : vector<34x32xf32>, vector<32x8xf32>, vector<34x8xf32> -> vector<34x8xf32>
    %c0_25 = arith.constant 0 : index
    %c3 = arith.constant 3 : index
    %c0_26 = arith.constant 0 : index
    %c0_27 = arith.constant 0 : index
    %40 = vector.load %arg4[%c0_25, %c3, %c0_26, %c0_27] : memref<2x4x32x8xf32, #tpu.memory_space<vmem>>, vector<1x1x32x8xf32>
    %41 = vector.shape_cast %40 : vector<1x1x32x8xf32> to vector<32x8xf32>
    %cst_28 = arith.constant dense<0.000000e+00> : vector<34x8xf32>
    %42 = tpu.matmul %30, %41, %cst_28 {dimension_numbers = #tpu.dot_dimension_numbers<[1], [0], [0], [1], [0, 0, 1, 1], [], []>} : vector<34x32xf32>, vector<32x8xf32>, vector<34x8xf32> -> vector<34x8xf32>
    %43 = vector.shape_cast %33 : vector<34x8xf32> to vector<1x34x8xf32>
    %44 = vector.shape_cast %36 : vector<34x8xf32> to vector<1x34x8xf32>
    %45 = vector.shape_cast %39 : vector<34x8xf32> to vector<1x34x8xf32>
    %46 = vector.shape_cast %42 : vector<34x8xf32> to vector<1x34x8xf32>
    %47 = tpu.concatenate %43, %44, %45, %46 in 0 : vector<1x34x8xf32>, vector<1x34x8xf32>, vector<1x34x8xf32>, vector<1x34x8xf32> -> vector<4x34x8xf32>
    %c0_29 = arith.constant 0 : index
    %c0_30 = arith.constant 0 : index
    %c0_31 = arith.constant 0 : index
    %c0_32 = arith.constant 0 : index
    %48 = vector.load %arg5[%c0_29, %c0_30, %c0_31, %c0_32] : memref<2x4x1x8xf32, #tpu.memory_space<vmem>>, vector<1x4x1x8xf32>
    %49 = vector.shape_cast %48 : vector<1x4x1x8xf32> to vector<4x1x8xf32>
    %50 = vector.broadcast %49 : vector<4x1x8xf32> to vector<4x34x8xf32>
    %51 = arith.addf %47, %50 : vector<4x34x8xf32>
    %c0_33 = arith.constant 0 : index
    %c0_34 = arith.constant 0 : index
    %c0_35 = arith.constant 0 : index
    %c0_36 = arith.constant 0 : index
    %52 = vector.load %arg6[%c0_33, %c0_34, %c0_35, %c0_36] : memref<2x4x32x8xf32, #tpu.memory_space<vmem>>, vector<1x1x32x8xf32>
    %53 = vector.shape_cast %52 : vector<1x1x32x8xf32> to vector<32x8xf32>
    %cst_37 = arith.constant dense<0.000000e+00> : vector<34x8xf32>
    %54 = tpu.matmul %30, %53, %cst_37 {dimension_numbers = #tpu.dot_dimension_numbers<[1], [0], [0], [1], [0, 0, 1, 1], [], []>} : vector<34x32xf32>, vector<32x8xf32>, vector<34x8xf32> -> vector<34x8xf32>
    %c0_38 = arith.constant 0 : index
    %c1_39 = arith.constant 1 : index
    %c0_40 = arith.constant 0 : index
    %c0_41 = arith.constant 0 : index
    %55 = vector.load %arg6[%c0_38, %c1_39, %c0_40, %c0_41] : memref<2x4x32x8xf32, #tpu.memory_space<vmem>>, vector<1x1x32x8xf32>
    %56 = vector.shape_cast %55 : vector<1x1x32x8xf32> to vector<32x8xf32>
    %cst_42 = arith.constant dense<0.000000e+00> : vector<34x8xf32>
    %57 = tpu.matmul %30, %56, %cst_42 {dimension_numbers = #tpu.dot_dimension_numbers<[1], [0], [0], [1], [0, 0, 1, 1], [], []>} : vector<34x32xf32>, vector<32x8xf32>, vector<34x8xf32> -> vector<34x8xf32>
    %c0_43 = arith.constant 0 : index
    %c2_44 = arith.constant 2 : index
    %c0_45 = arith.constant 0 : index
    %c0_46 = arith.constant 0 : index
    %58 = vector.load %arg6[%c0_43, %c2_44, %c0_45, %c0_46] : memref<2x4x32x8xf32, #tpu.memory_space<vmem>>, vector<1x1x32x8xf32>
    %59 = vector.shape_cast %58 : vector<1x1x32x8xf32> to vector<32x8xf32>
    %cst_47 = arith.constant dense<0.000000e+00> : vector<34x8xf32>
    %60 = tpu.matmul %30, %59, %cst_47 {dimension_numbers = #tpu.dot_dimension_numbers<[1], [0], [0], [1], [0, 0, 1, 1], [], []>} : vector<34x32xf32>, vector<32x8xf32>, vector<34x8xf32> -> vector<34x8xf32>
    %c0_48 = arith.constant 0 : index
    %c3_49 = arith.constant 3 : index
    %c0_50 = arith.constant 0 : index
    %c0_51 = arith.constant 0 : index
    %61 = vector.load %arg6[%c0_48, %c3_49, %c0_50, %c0_51] : memref<2x4x32x8xf32, #tpu.memory_space<vmem>>, vector<1x1x32x8xf32>
    %62 = vector.shape_cast %61 : vector<1x1x32x8xf32> to vector<32x8xf32>
    %cst_52 = arith.constant dense<0.000000e+00> : vector<34x8xf32>
    %63 = tpu.matmul %30, %62, %cst_52 {dimension_numbers = #tpu.dot_dimension_numbers<[1], [0], [0], [1], [0, 0, 1, 1], [], []>} : vector<34x32xf32>, vector<32x8xf32>, vector<34x8xf32> -> vector<34x8xf32>
    %64 = vector.shape_cast %54 : vector<34x8xf32> to vector<1x34x8xf32>
    %65 = vector.shape_cast %57 : vector<34x8xf32> to vector<1x34x8xf32>
    %66 = vector.shape_cast %60 : vector<34x8xf32> to vector<1x34x8xf32>
    %67 = vector.shape_cast %63 : vector<34x8xf32> to vector<1x34x8xf32>
    %68 = tpu.concatenate %64, %65, %66, %67 in 0 : vector<1x34x8xf32>, vector<1x34x8xf32>, vector<1x34x8xf32>, vector<1x34x8xf32> -> vector<4x34x8xf32>
    %c0_53 = arith.constant 0 : index
    %c0_54 = arith.constant 0 : index
    %c0_55 = arith.constant 0 : index
    %c0_56 = arith.constant 0 : index
    %69 = vector.load %arg7[%c0_53, %c0_54, %c0_55, %c0_56] : memref<2x4x1x8xf32, #tpu.memory_space<vmem>>, vector<1x4x1x8xf32>
    %70 = vector.shape_cast %69 : vector<1x4x1x8xf32> to vector<4x1x8xf32>
    %71 = vector.broadcast %70 : vector<4x1x8xf32> to vector<4x34x8xf32>
    %72 = arith.addf %68, %71 : vector<4x34x8xf32>
    %c0_57 = arith.constant 0 : index
    %c0_58 = arith.constant 0 : index
    %c0_59 = arith.constant 0 : index
    %c0_60 = arith.constant 0 : index
    %73 = vector.load %arg8[%c0_57, %c0_58, %c0_59, %c0_60] : memref<2x4x32x8xf32, #tpu.memory_space<vmem>>, vector<1x1x32x8xf32>
    %74 = vector.shape_cast %73 : vector<1x1x32x8xf32> to vector<32x8xf32>
    %cst_61 = arith.constant dense<0.000000e+00> : vector<34x8xf32>
    %75 = tpu.matmul %30, %74, %cst_61 {dimension_numbers = #tpu.dot_dimension_numbers<[1], [0], [0], [1], [0, 0, 1, 1], [], []>} : vector<34x32xf32>, vector<32x8xf32>, vector<34x8xf32> -> vector<34x8xf32>
    %c0_62 = arith.constant 0 : index
    %c1_63 = arith.constant 1 : index
    %c0_64 = arith.constant 0 : index
    %c0_65 = arith.constant 0 : index
    %76 = vector.load %arg8[%c0_62, %c1_63, %c0_64, %c0_65] : memref<2x4x32x8xf32, #tpu.memory_space<vmem>>, vector<1x1x32x8xf32>
    %77 = vector.shape_cast %76 : vector<1x1x32x8xf32> to vector<32x8xf32>
    %cst_66 = arith.constant dense<0.000000e+00> : vector<34x8xf32>
    %78 = tpu.matmul %30, %77, %cst_66 {dimension_numbers = #tpu.dot_dimension_numbers<[1], [0], [0], [1], [0, 0, 1, 1], [], []>} : vector<34x32xf32>, vector<32x8xf32>, vector<34x8xf32> -> vector<34x8xf32>
    %c0_67 = arith.constant 0 : index
    %c2_68 = arith.constant 2 : index
    %c0_69 = arith.constant 0 : index
    %c0_70 = arith.constant 0 : index
    %79 = vector.load %arg8[%c0_67, %c2_68, %c0_69, %c0_70] : memref<2x4x32x8xf32, #tpu.memory_space<vmem>>, vector<1x1x32x8xf32>
    %80 = vector.shape_cast %79 : vector<1x1x32x8xf32> to vector<32x8xf32>
    %cst_71 = arith.constant dense<0.000000e+00> : vector<34x8xf32>
    %81 = tpu.matmul %30, %80, %cst_71 {dimension_numbers = #tpu.dot_dimension_numbers<[1], [0], [0], [1], [0, 0, 1, 1], [], []>} : vector<34x32xf32>, vector<32x8xf32>, vector<34x8xf32> -> vector<34x8xf32>
    %c0_72 = arith.constant 0 : index
    %c3_73 = arith.constant 3 : index
    %c0_74 = arith.constant 0 : index
    %c0_75 = arith.constant 0 : index
    %82 = vector.load %arg8[%c0_72, %c3_73, %c0_74, %c0_75] : memref<2x4x32x8xf32, #tpu.memory_space<vmem>>, vector<1x1x32x8xf32>
    %83 = vector.shape_cast %82 : vector<1x1x32x8xf32> to vector<32x8xf32>
    %cst_76 = arith.constant dense<0.000000e+00> : vector<34x8xf32>
    %84 = tpu.matmul %30, %83, %cst_76 {dimension_numbers = #tpu.dot_dimension_numbers<[1], [0], [0], [1], [0, 0, 1, 1], [], []>} : vector<34x32xf32>, vector<32x8xf32>, vector<34x8xf32> -> vector<34x8xf32>
    %85 = vector.shape_cast %75 : vector<34x8xf32> to vector<1x34x8xf32>
    %86 = vector.shape_cast %78 : vector<34x8xf32> to vector<1x34x8xf32>
    %87 = vector.shape_cast %81 : vector<34x8xf32> to vector<1x34x8xf32>
    %88 = vector.shape_cast %84 : vector<34x8xf32> to vector<1x34x8xf32>
    %89 = tpu.concatenate %85, %86, %87, %88 in 0 : vector<1x34x8xf32>, vector<1x34x8xf32>, vector<1x34x8xf32>, vector<1x34x8xf32> -> vector<4x34x8xf32>
    %c0_77 = arith.constant 0 : index
    %c0_78 = arith.constant 0 : index
    %c0_79 = arith.constant 0 : index
    %c0_80 = arith.constant 0 : index
    %90 = vector.load %arg9[%c0_77, %c0_78, %c0_79, %c0_80] : memref<2x4x1x8xf32, #tpu.memory_space<vmem>>, vector<1x4x1x8xf32>
    %91 = vector.shape_cast %90 : vector<1x4x1x8xf32> to vector<4x1x8xf32>
    %92 = vector.broadcast %91 : vector<4x1x8xf32> to vector<4x34x8xf32>
    %93 = arith.addf %89, %92 : vector<4x34x8xf32>
    "tpu.trace_start"() <{level = 10 : i32, message = "hmd,hnd->hmn"}> : () -> ()
    %cst_81 = arith.constant dense<0.000000e+00> : vector<4x34x34xf32>
    %94 = tpu.matmul %51, %72, %cst_81 {dimension_numbers = #tpu.dot_dimension_numbers<[2], [2], [1], [1], [0, 0, 0, 1, 1, 1], [0], [0]>} : vector<4x34x8xf32>, vector<4x34x8xf32>, vector<4x34x34xf32> -> vector<4x34x34xf32>
    "tpu.trace_stop"() : () -> ()
    %cst_82 = arith.constant 0.353553385 : f32
    %95 = vector.broadcast %cst_82 : f32 to vector<4x34x34xf32>
    %96 = arith.mulf %94, %95 : vector<4x34x34xf32>
    %97 = vector.broadcast %4 : vector<1x34x34xf32> to vector<4x34x34xf32>
    %98 = arith.addf %96, %97 : vector<4x34x34xf32>
    %cst_83 = arith.constant dense<0xFF800000> : vector<4x34xf32>
    %99 = vector.multi_reduction <maximumf>, %98, %cst_83 [2] : vector<4x34x34xf32> to vector<4x34xf32>
    %100 = vector.shape_cast %99 : vector<4x34xf32> to vector<4x34x1xf32>
    %101 = vector.broadcast %100 : vector<4x34x1xf32> to vector<4x34x34xf32>
    %102 = arith.subf %98, %101 : vector<4x34x34xf32>
    %103 = math.exp %102 : vector<4x34x34xf32>
    %cst_84 = arith.constant dense<0.000000e+00> : vector<4x34xf32>
    %104 = vector.multi_reduction <add>, %103, %cst_84 [2] : vector<4x34x34xf32> to vector<4x34xf32>
    %105 = vector.shape_cast %104 : vector<4x34xf32> to vector<4x34x1xf32>
    %106 = tpu.reciprocal %105 {approx = true} : vector<4x34x1xf32> -> vector<4x34x1xf32>
    %107 = vector.broadcast %106 : vector<4x34x1xf32> to vector<4x34x34xf32>
    %108 = arith.mulf %103, %107 : vector<4x34x34xf32>
    "tpu.trace_start"() <{level = 10 : i32, message = "hmn,hnd->hmd"}> : () -> ()
    %cst_85 = arith.constant dense<0.000000e+00> : vector<4x34x8xf32>
    %109 = tpu.matmul %108, %93, %cst_85 {dimension_numbers = #tpu.dot_dimension_numbers<[2], [1], [1], [2], [0, 0, 0, 1, 1, 2], [0], [0]>} : vector<4x34x34xf32>, vector<4x34x8xf32>, vector<4x34x8xf32> -> vector<4x34x8xf32>
    "tpu.trace_stop"() : () -> ()
    %c0_86 = arith.constant 0 : index
    %c0_87 = arith.constant 0 : index
    %c0_88 = arith.constant 0 : index
    %110 = vector.load %arg11[%c0_86, %c0_87, %c0_88] : memref<2x1x32xf32, #tpu.memory_space<vmem>>, vector<1x1x32xf32>
    %111 = vector.shape_cast %110 : vector<1x1x32xf32> to vector<1x32xf32>
    %112 = vector.extract_strided_slice %109 {offsets = [0, 0, 0], sizes = [1, 34, 8], strides = [1, 1, 1]} : vector<4x34x8xf32> to vector<1x34x8xf32>
    %113 = vector.shape_cast %112 : vector<1x34x8xf32> to vector<34x8xf32>
    %c0_89 = arith.constant 0 : index
    %c0_90 = arith.constant 0 : index
    %c0_91 = arith.constant 0 : index
    %c0_92 = arith.constant 0 : index
    %114 = vector.load %arg10[%c0_89, %c0_90, %c0_91, %c0_92] : memref<2x4x8x32xf32, #tpu.memory_space<vmem>>, vector<1x1x8x32xf32>
    %115 = vector.shape_cast %114 : vector<1x1x8x32xf32> to vector<8x32xf32>
    %cst_93 = arith.constant dense<0.000000e+00> : vector<34x32xf32>
    %116 = tpu.matmul %113, %115, %cst_93 {dimension_numbers = #tpu.dot_dimension_numbers<[1], [0], [0], [1], [0, 0, 1, 1], [], []>} : vector<34x8xf32>, vector<8x32xf32>, vector<34x32xf32> -> vector<34x32xf32>
    %117 = vector.broadcast %111 : vector<1x32xf32> to vector<34x32xf32>
    %118 = arith.addf %117, %116 : vector<34x32xf32>
    %119 = vector.extract_strided_slice %109 {offsets = [1, 0, 0], sizes = [1, 34, 8], strides = [1, 1, 1]} : vector<4x34x8xf32> to vector<1x34x8xf32>
    %120 = vector.shape_cast %119 : vector<1x34x8xf32> to vector<34x8xf32>
    %c0_94 = arith.constant 0 : index
    %c1_95 = arith.constant 1 : index
    %c0_96 = arith.constant 0 : index
    %c0_97 = arith.constant 0 : index
    %121 = vector.load %arg10[%c0_94, %c1_95, %c0_96, %c0_97] : memref<2x4x8x32xf32, #tpu.memory_space<vmem>>, vector<1x1x8x32xf32>
    %122 = vector.shape_cast %121 : vector<1x1x8x32xf32> to vector<8x32xf32>
    %cst_98 = arith.constant dense<0.000000e+00> : vector<34x32xf32>
    %123 = tpu.matmul %120, %122, %cst_98 {dimension_numbers = #tpu.dot_dimension_numbers<[1], [0], [0], [1], [0, 0, 1, 1], [], []>} : vector<34x8xf32>, vector<8x32xf32>, vector<34x32xf32> -> vector<34x32xf32>
    %124 = arith.addf %118, %123 : vector<34x32xf32>
    %125 = vector.extract_strided_slice %109 {offsets = [2, 0, 0], sizes = [1, 34, 8], strides = [1, 1, 1]} : vector<4x34x8xf32> to vector<1x34x8xf32>
    %126 = vector.shape_cast %125 : vector<1x34x8xf32> to vector<34x8xf32>
    %c0_99 = arith.constant 0 : index
    %c2_100 = arith.constant 2 : index
    %c0_101 = arith.constant 0 : index
    %c0_102 = arith.constant 0 : index
    %127 = vector.load %arg10[%c0_99, %c2_100, %c0_101, %c0_102] : memref<2x4x8x32xf32, #tpu.memory_space<vmem>>, vector<1x1x8x32xf32>
    %128 = vector.shape_cast %127 : vector<1x1x8x32xf32> to vector<8x32xf32>
    %cst_103 = arith.constant dense<0.000000e+00> : vector<34x32xf32>
    %129 = tpu.matmul %126, %128, %cst_103 {dimension_numbers = #tpu.dot_dimension_numbers<[1], [0], [0], [1], [0, 0, 1, 1], [], []>} : vector<34x8xf32>, vector<8x32xf32>, vector<34x32xf32> -> vector<34x32xf32>
    %130 = arith.addf %124, %129 : vector<34x32xf32>
    %131 = vector.extract_strided_slice %109 {offsets = [3, 0, 0], sizes = [1, 34, 8], strides = [1, 1, 1]} : vector<4x34x8xf32> to vector<1x34x8xf32>
    %132 = vector.shape_cast %131 : vector<1x34x8xf32> to vector<34x8xf32>
    %c0_104 = arith.constant 0 : index
    %c3_105 = arith.constant 3 : index
    %c0_106 = arith.constant 0 : index
    %c0_107 = arith.constant 0 : index
    %133 = vector.load %arg10[%c0_104, %c3_105, %c0_106, %c0_107] : memref<2x4x8x32xf32, #tpu.memory_space<vmem>>, vector<1x1x8x32xf32>
    %134 = vector.shape_cast %133 : vector<1x1x8x32xf32> to vector<8x32xf32>
    %cst_108 = arith.constant dense<0.000000e+00> : vector<34x32xf32>
    %135 = tpu.matmul %132, %134, %cst_108 {dimension_numbers = #tpu.dot_dimension_numbers<[1], [0], [0], [1], [0, 0, 1, 1], [], []>} : vector<34x8xf32>, vector<8x32xf32>, vector<34x32xf32> -> vector<34x32xf32>
    %136 = arith.addf %130, %135 : vector<34x32xf32>
    %137 = arith.addf %2, %136 : vector<34x32xf32>
    %138 = vector.extract_strided_slice %6 {offsets = [2, 0], sizes = [1, 32], strides = [1, 1]} : vector<4x32xf32> to vector<1x32xf32>
    %139 = vector.extract_strided_slice %6 {offsets = [3, 0], sizes = [1, 32], strides = [1, 1]} : vector<4x32xf32> to vector<1x32xf32>
    %cst_109 = arith.constant dense<0.000000e+00> : vector<34xf32>
    %140 = vector.multi_reduction <add>, %137, %cst_109 [1] : vector<34x32xf32> to vector<34xf32>
    %141 = vector.shape_cast %140 : vector<34xf32> to vector<34x1xf32>
    %cst_110 = arith.constant 3.200000e+01 : f32
    %142 = vector.broadcast %cst_110 : f32 to vector<34x1xf32>
    %143 = arith.divf %141, %142 : vector<34x1xf32>
    %144 = vector.broadcast %143 : vector<34x1xf32> to vector<34x32xf32>
    %145 = arith.subf %137, %144 : vector<34x32xf32>
    %146 = arith.mulf %145, %145 : vector<34x32xf32>
    %cst_111 = arith.constant dense<0.000000e+00> : vector<34xf32>
    %147 = vector.multi_reduction <add>, %146, %cst_111 [1] : vector<34x32xf32> to vector<34xf32>
    %148 = vector.shape_cast %147 : vector<34xf32> to vector<34x1xf32>
    %cst_112 = arith.constant 3.200000e+01 : f32
    %149 = vector.broadcast %cst_112 : f32 to vector<34x1xf32>
    %150 = arith.divf %148, %149 : vector<34x1xf32>
    %151 = vector.broadcast %143 : vector<34x1xf32> to vector<34x32xf32>
    %152 = arith.subf %137, %151 : vector<34x32xf32>
    %cst_113 = arith.constant 9.99999974E-6 : f32
    %153 = vector.broadcast %cst_113 : f32 to vector<34x1xf32>
    %154 = arith.addf %150, %153 : vector<34x1xf32>
    %155 = math.rsqrt %154 : vector<34x1xf32>
    %156 = vector.broadcast %155 : vector<34x1xf32> to vector<34x32xf32>
    %157 = arith.mulf %152, %156 : vector<34x32xf32>
    %158 = vector.broadcast %138 : vector<1x32xf32> to vector<34x32xf32>
    %159 = arith.mulf %157, %158 : vector<34x32xf32>
    %160 = vector.broadcast %139 : vector<1x32xf32> to vector<34x32xf32>
    %161 = arith.addf %159, %160 : vector<34x32xf32>
    %c0_114 = arith.constant 0 : index
    %c0_115 = arith.constant 0 : index
    %c0_116 = arith.constant 0 : index
    %162 = vector.load %arg12[%c0_114, %c0_115, %c0_116] : memref<2x32x64xf32, #tpu.memory_space<vmem>>, vector<1x32x64xf32>
    %163 = vector.shape_cast %162 : vector<1x32x64xf32> to vector<32x64xf32>
    %cst_117 = arith.constant dense<0.000000e+00> : vector<34x64xf32>
    %164 = tpu.matmul %161, %163, %cst_117 {dimension_numbers = #tpu.dot_dimension_numbers<[1], [0], [0], [1], [0, 0, 1, 1], [], []>} : vector<34x32xf32>, vector<32x64xf32>, vector<34x64xf32> -> vector<34x64xf32>
    %c0_118 = arith.constant 0 : index
    %c0_119 = arith.constant 0 : index
    %c0_120 = arith.constant 0 : index
    %165 = vector.load %arg13[%c0_118, %c0_119, %c0_120] : memref<2x1x64xf32, #tpu.memory_space<vmem>>, vector<1x1x64xf32>
    %166 = vector.shape_cast %165 : vector<1x1x64xf32> to vector<1x64xf32>
    %167 = vector.broadcast %166 : vector<1x64xf32> to vector<34x64xf32>
    %168 = arith.addf %164, %167 : vector<34x64xf32>
    %cst_121 = arith.constant 0.000000e+00 : f32
    %169 = vector.broadcast %cst_121 : f32 to vector<34x64xf32>
    %170 = arith.maximumf %168, %169 : vector<34x64xf32>
    %c0_122 = arith.constant 0 : index
    %c0_123 = arith.constant 0 : index
    %c0_124 = arith.constant 0 : index
    %171 = vector.load %arg14[%c0_122, %c0_123, %c0_124] : memref<2x64x32xf32, #tpu.memory_space<vmem>>, vector<1x64x32xf32>
    %172 = vector.shape_cast %171 : vector<1x64x32xf32> to vector<64x32xf32>
    %cst_125 = arith.constant dense<0.000000e+00> : vector<34x32xf32>
    %173 = tpu.matmul %170, %172, %cst_125 {dimension_numbers = #tpu.dot_dimension_numbers<[1], [0], [0], [1], [0, 0, 1, 1], [], []>} : vector<34x64xf32>, vector<64x32xf32>, vector<34x32xf32> -> vector<34x32xf32>
    %174 = arith.addf %137, %173 : vector<34x32xf32>
    %c0_126 = arith.constant 0 : index
    %c0_127 = arith.constant 0 : index
    %c0_128 = arith.constant 0 : index
    %175 = vector.load %arg15[%c0_126, %c0_127, %c0_128] : memref<2x1x32xf32, #tpu.memory_space<vmem>>, vector<1x1x32xf32>
    %176 = vector.shape_cast %175 : vector<1x1x32xf32> to vector<1x32xf32>
    %177 = vector.broadcast %176 : vector<1x32xf32> to vector<34x32xf32>
    %178 = arith.addf %174, %177 : vector<34x32xf32>
    %c1_129 = arith.constant 1 : index
    %c0_130 = arith.constant 0 : index
    %c0_131 = arith.constant 0 : index
    %179 = vector.load %arg3[%c1_129, %c0_130, %c0_131] : memref<2x4x32xf32, #tpu.memory_space<vmem>>, vector<1x4x32xf32>
    %180 = vector.shape_cast %179 : vector<1x4x32xf32> to vector<4x32xf32>
    %181 = vector.extract_strided_slice %180 {offsets = [0, 0], sizes = [1, 32], strides = [1, 1]} : vector<4x32xf32> to vector<1x32xf32>
    %182 = vector.extract_strided_slice %180 {offsets = [1, 0], sizes = [1, 32], strides = [1, 1]} : vector<4x32xf32> to vector<1x32xf32>
    %cst_132 = arith.constant dense<0.000000e+00> : vector<34xf32>
    %183 = vector.multi_reduction <add>, %178, %cst_132 [1] : vector<34x32xf32> to vector<34xf32>
    %184 = vector.shape_cast %183 : vector<34xf32> to vector<34x1xf32>
    %cst_133 = arith.constant 3.200000e+01 : f32
    %185 = vector.broadcast %cst_133 : f32 to vector<34x1xf32>
    %186 = arith.divf %184, %185 : vector<34x1xf32>
    %187 = vector.broadcast %186 : vector<34x1xf32> to vector<34x32xf32>
    %188 = arith.subf %178, %187 : vector<34x32xf32>
    %189 = arith.mulf %188, %188 : vector<34x32xf32>
    %cst_134 = arith.constant dense<0.000000e+00> : vector<34xf32>
    %190 = vector.multi_reduction <add>, %189, %cst_134 [1] : vector<34x32xf32> to vector<34xf32>
    %191 = vector.shape_cast %190 : vector<34xf32> to vector<34x1xf32>
    %cst_135 = arith.constant 3.200000e+01 : f32
    %192 = vector.broadcast %cst_135 : f32 to vector<34x1xf32>
    %193 = arith.divf %191, %192 : vector<34x1xf32>
    %194 = vector.broadcast %186 : vector<34x1xf32> to vector<34x32xf32>
    %195 = arith.subf %178, %194 : vector<34x32xf32>
    %cst_136 = arith.constant 9.99999974E-6 : f32
    %196 = vector.broadcast %cst_136 : f32 to vector<34x1xf32>
    %197 = arith.addf %193, %196 : vector<34x1xf32>
    %198 = math.rsqrt %197 : vector<34x1xf32>
    %199 = vector.broadcast %198 : vector<34x1xf32> to vector<34x32xf32>
    %200 = arith.mulf %195, %199 : vector<34x32xf32>
    %201 = vector.broadcast %181 : vector<1x32xf32> to vector<34x32xf32>
    %202 = arith.mulf %200, %201 : vector<34x32xf32>
    %203 = vector.broadcast %182 : vector<1x32xf32> to vector<34x32xf32>
    %204 = arith.addf %202, %203 : vector<34x32xf32>
    %c1_137 = arith.constant 1 : index
    %c0_138 = arith.constant 0 : index
    %c0_139 = arith.constant 0 : index
    %c0_140 = arith.constant 0 : index
    %205 = vector.load %arg4[%c1_137, %c0_138, %c0_139, %c0_140] : memref<2x4x32x8xf32, #tpu.memory_space<vmem>>, vector<1x1x32x8xf32>
    %206 = vector.shape_cast %205 : vector<1x1x32x8xf32> to vector<32x8xf32>
    %cst_141 = arith.constant dense<0.000000e+00> : vector<34x8xf32>
    %207 = tpu.matmul %204, %206, %cst_141 {dimension_numbers = #tpu.dot_dimension_numbers<[1], [0], [0], [1], [0, 0, 1, 1], [], []>} : vector<34x32xf32>, vector<32x8xf32>, vector<34x8xf32> -> vector<34x8xf32>
    %c1_142 = arith.constant 1 : index
    %c1_143 = arith.constant 1 : index
    %c0_144 = arith.constant 0 : index
    %c0_145 = arith.constant 0 : index
    %208 = vector.load %arg4[%c1_142, %c1_143, %c0_144, %c0_145] : memref<2x4x32x8xf32, #tpu.memory_space<vmem>>, vector<1x1x32x8xf32>
    %209 = vector.shape_cast %208 : vector<1x1x32x8xf32> to vector<32x8xf32>
    %cst_146 = arith.constant dense<0.000000e+00> : vector<34x8xf32>
    %210 = tpu.matmul %204, %209, %cst_146 {dimension_numbers = #tpu.dot_dimension_numbers<[1], [0], [0], [1], [0, 0, 1, 1], [], []>} : vector<34x32xf32>, vector<32x8xf32>, vector<34x8xf32> -> vector<34x8xf32>
    %c1_147 = arith.constant 1 : index
    %c2_148 = arith.constant 2 : index
    %c0_149 = arith.constant 0 : index
    %c0_150 = arith.constant 0 : index
    %211 = vector.load %arg4[%c1_147, %c2_148, %c0_149, %c0_150] : memref<2x4x32x8xf32, #tpu.memory_space<vmem>>, vector<1x1x32x8xf32>
    %212 = vector.shape_cast %211 : vector<1x1x32x8xf32> to vector<32x8xf32>
    %cst_151 = arith.constant dense<0.000000e+00> : vector<34x8xf32>
    %213 = tpu.matmul %204, %212, %cst_151 {dimension_numbers = #tpu.dot_dimension_numbers<[1], [0], [0], [1], [0, 0, 1, 1], [], []>} : vector<34x32xf32>, vector<32x8xf32>, vector<34x8xf32> -> vector<34x8xf32>
    %c1_152 = arith.constant 1 : index
    %c3_153 = arith.constant 3 : index
    %c0_154 = arith.constant 0 : index
    %c0_155 = arith.constant 0 : index
    %214 = vector.load %arg4[%c1_152, %c3_153, %c0_154, %c0_155] : memref<2x4x32x8xf32, #tpu.memory_space<vmem>>, vector<1x1x32x8xf32>
    %215 = vector.shape_cast %214 : vector<1x1x32x8xf32> to vector<32x8xf32>
    %cst_156 = arith.constant dense<0.000000e+00> : vector<34x8xf32>
    %216 = tpu.matmul %204, %215, %cst_156 {dimension_numbers = #tpu.dot_dimension_numbers<[1], [0], [0], [1], [0, 0, 1, 1], [], []>} : vector<34x32xf32>, vector<32x8xf32>, vector<34x8xf32> -> vector<34x8xf32>
    %217 = vector.shape_cast %207 : vector<34x8xf32> to vector<1x34x8xf32>
    %218 = vector.shape_cast %210 : vector<34x8xf32> to vector<1x34x8xf32>
    %219 = vector.shape_cast %213 : vector<34x8xf32> to vector<1x34x8xf32>
    %220 = vector.shape_cast %216 : vector<34x8xf32> to vector<1x34x8xf32>
    %221 = tpu.concatenate %217, %218, %219, %220 in 0 : vector<1x34x8xf32>, vector<1x34x8xf32>, vector<1x34x8xf32>, vector<1x34x8xf32> -> vector<4x34x8xf32>
    %c1_157 = arith.constant 1 : index
    %c0_158 = arith.constant 0 : index
    %c0_159 = arith.constant 0 : index
    %c0_160 = arith.constant 0 : index
    %222 = vector.load %arg5[%c1_157, %c0_158, %c0_159, %c0_160] : memref<2x4x1x8xf32, #tpu.memory_space<vmem>>, vector<1x4x1x8xf32>
    %223 = vector.shape_cast %222 : vector<1x4x1x8xf32> to vector<4x1x8xf32>
    %224 = vector.broadcast %223 : vector<4x1x8xf32> to vector<4x34x8xf32>
    %225 = arith.addf %221, %224 : vector<4x34x8xf32>
    %c1_161 = arith.constant 1 : index
    %c0_162 = arith.constant 0 : index
    %c0_163 = arith.constant 0 : index
    %c0_164 = arith.constant 0 : index
    %226 = vector.load %arg6[%c1_161, %c0_162, %c0_163, %c0_164] : memref<2x4x32x8xf32, #tpu.memory_space<vmem>>, vector<1x1x32x8xf32>
    %227 = vector.shape_cast %226 : vector<1x1x32x8xf32> to vector<32x8xf32>
    %cst_165 = arith.constant dense<0.000000e+00> : vector<34x8xf32>
    %228 = tpu.matmul %204, %227, %cst_165 {dimension_numbers = #tpu.dot_dimension_numbers<[1], [0], [0], [1], [0, 0, 1, 1], [], []>} : vector<34x32xf32>, vector<32x8xf32>, vector<34x8xf32> -> vector<34x8xf32>
    %c1_166 = arith.constant 1 : index
    %c1_167 = arith.constant 1 : index
    %c0_168 = arith.constant 0 : index
    %c0_169 = arith.constant 0 : index
    %229 = vector.load %arg6[%c1_166, %c1_167, %c0_168, %c0_169] : memref<2x4x32x8xf32, #tpu.memory_space<vmem>>, vector<1x1x32x8xf32>
    %230 = vector.shape_cast %229 : vector<1x1x32x8xf32> to vector<32x8xf32>
    %cst_170 = arith.constant dense<0.000000e+00> : vector<34x8xf32>
    %231 = tpu.matmul %204, %230, %cst_170 {dimension_numbers = #tpu.dot_dimension_numbers<[1], [0], [0], [1], [0, 0, 1, 1], [], []>} : vector<34x32xf32>, vector<32x8xf32>, vector<34x8xf32> -> vector<34x8xf32>
    %c1_171 = arith.constant 1 : index
    %c2_172 = arith.constant 2 : index
    %c0_173 = arith.constant 0 : index
    %c0_174 = arith.constant 0 : index
    %232 = vector.load %arg6[%c1_171, %c2_172, %c0_173, %c0_174] : memref<2x4x32x8xf32, #tpu.memory_space<vmem>>, vector<1x1x32x8xf32>
    %233 = vector.shape_cast %232 : vector<1x1x32x8xf32> to vector<32x8xf32>
    %cst_175 = arith.constant dense<0.000000e+00> : vector<34x8xf32>
    %234 = tpu.matmul %204, %233, %cst_175 {dimension_numbers = #tpu.dot_dimension_numbers<[1], [0], [0], [1], [0, 0, 1, 1], [], []>} : vector<34x32xf32>, vector<32x8xf32>, vector<34x8xf32> -> vector<34x8xf32>
    %c1_176 = arith.constant 1 : index
    %c3_177 = arith.constant 3 : index
    %c0_178 = arith.constant 0 : index
    %c0_179 = arith.constant 0 : index
    %235 = vector.load %arg6[%c1_176, %c3_177, %c0_178, %c0_179] : memref<2x4x32x8xf32, #tpu.memory_space<vmem>>, vector<1x1x32x8xf32>
    %236 = vector.shape_cast %235 : vector<1x1x32x8xf32> to vector<32x8xf32>
    %cst_180 = arith.constant dense<0.000000e+00> : vector<34x8xf32>
    %237 = tpu.matmul %204, %236, %cst_180 {dimension_numbers = #tpu.dot_dimension_numbers<[1], [0], [0], [1], [0, 0, 1, 1], [], []>} : vector<34x32xf32>, vector<32x8xf32>, vector<34x8xf32> -> vector<34x8xf32>
    %238 = vector.shape_cast %228 : vector<34x8xf32> to vector<1x34x8xf32>
    %239 = vector.shape_cast %231 : vector<34x8xf32> to vector<1x34x8xf32>
    %240 = vector.shape_cast %234 : vector<34x8xf32> to vector<1x34x8xf32>
    %241 = vector.shape_cast %237 : vector<34x8xf32> to vector<1x34x8xf32>
    %242 = tpu.concatenate %238, %239, %240, %241 in 0 : vector<1x34x8xf32>, vector<1x34x8xf32>, vector<1x34x8xf32>, vector<1x34x8xf32> -> vector<4x34x8xf32>
    %c1_181 = arith.constant 1 : index
    %c0_182 = arith.constant 0 : index
    %c0_183 = arith.constant 0 : index
    %c0_184 = arith.constant 0 : index
    %243 = vector.load %arg7[%c1_181, %c0_182, %c0_183, %c0_184] : memref<2x4x1x8xf32, #tpu.memory_space<vmem>>, vector<1x4x1x8xf32>
    %244 = vector.shape_cast %243 : vector<1x4x1x8xf32> to vector<4x1x8xf32>
    %245 = vector.broadcast %244 : vector<4x1x8xf32> to vector<4x34x8xf32>
    %246 = arith.addf %242, %245 : vector<4x34x8xf32>
    %c1_185 = arith.constant 1 : index
    %c0_186 = arith.constant 0 : index
    %c0_187 = arith.constant 0 : index
    %c0_188 = arith.constant 0 : index
    %247 = vector.load %arg8[%c1_185, %c0_186, %c0_187, %c0_188] : memref<2x4x32x8xf32, #tpu.memory_space<vmem>>, vector<1x1x32x8xf32>
    %248 = vector.shape_cast %247 : vector<1x1x32x8xf32> to vector<32x8xf32>
    %cst_189 = arith.constant dense<0.000000e+00> : vector<34x8xf32>
    %249 = tpu.matmul %204, %248, %cst_189 {dimension_numbers = #tpu.dot_dimension_numbers<[1], [0], [0], [1], [0, 0, 1, 1], [], []>} : vector<34x32xf32>, vector<32x8xf32>, vector<34x8xf32> -> vector<34x8xf32>
    %c1_190 = arith.constant 1 : index
    %c1_191 = arith.constant 1 : index
    %c0_192 = arith.constant 0 : index
    %c0_193 = arith.constant 0 : index
    %250 = vector.load %arg8[%c1_190, %c1_191, %c0_192, %c0_193] : memref<2x4x32x8xf32, #tpu.memory_space<vmem>>, vector<1x1x32x8xf32>
    %251 = vector.shape_cast %250 : vector<1x1x32x8xf32> to vector<32x8xf32>
    %cst_194 = arith.constant dense<0.000000e+00> : vector<34x8xf32>
    %252 = tpu.matmul %204, %251, %cst_194 {dimension_numbers = #tpu.dot_dimension_numbers<[1], [0], [0], [1], [0, 0, 1, 1], [], []>} : vector<34x32xf32>, vector<32x8xf32>, vector<34x8xf32> -> vector<34x8xf32>
    %c1_195 = arith.constant 1 : index
    %c2_196 = arith.constant 2 : index
    %c0_197 = arith.constant 0 : index
    %c0_198 = arith.constant 0 : index
    %253 = vector.load %arg8[%c1_195, %c2_196, %c0_197, %c0_198] : memref<2x4x32x8xf32, #tpu.memory_space<vmem>>, vector<1x1x32x8xf32>
    %254 = vector.shape_cast %253 : vector<1x1x32x8xf32> to vector<32x8xf32>
    %cst_199 = arith.constant dense<0.000000e+00> : vector<34x8xf32>
    %255 = tpu.matmul %204, %254, %cst_199 {dimension_numbers = #tpu.dot_dimension_numbers<[1], [0], [0], [1], [0, 0, 1, 1], [], []>} : vector<34x32xf32>, vector<32x8xf32>, vector<34x8xf32> -> vector<34x8xf32>
    %c1_200 = arith.constant 1 : index
    %c3_201 = arith.constant 3 : index
    %c0_202 = arith.constant 0 : index
    %c0_203 = arith.constant 0 : index
    %256 = vector.load %arg8[%c1_200, %c3_201, %c0_202, %c0_203] : memref<2x4x32x8xf32, #tpu.memory_space<vmem>>, vector<1x1x32x8xf32>
    %257 = vector.shape_cast %256 : vector<1x1x32x8xf32> to vector<32x8xf32>
    %cst_204 = arith.constant dense<0.000000e+00> : vector<34x8xf32>
    %258 = tpu.matmul %204, %257, %cst_204 {dimension_numbers = #tpu.dot_dimension_numbers<[1], [0], [0], [1], [0, 0, 1, 1], [], []>} : vector<34x32xf32>, vector<32x8xf32>, vector<34x8xf32> -> vector<34x8xf32>
    %259 = vector.shape_cast %249 : vector<34x8xf32> to vector<1x34x8xf32>
    %260 = vector.shape_cast %252 : vector<34x8xf32> to vector<1x34x8xf32>
    %261 = vector.shape_cast %255 : vector<34x8xf32> to vector<1x34x8xf32>
    %262 = vector.shape_cast %258 : vector<34x8xf32> to vector<1x34x8xf32>
    %263 = tpu.concatenate %259, %260, %261, %262 in 0 : vector<1x34x8xf32>, vector<1x34x8xf32>, vector<1x34x8xf32>, vector<1x34x8xf32> -> vector<4x34x8xf32>
    %c1_205 = arith.constant 1 : index
    %c0_206 = arith.constant 0 : index
    %c0_207 = arith.constant 0 : index
    %c0_208 = arith.constant 0 : index
    %264 = vector.load %arg9[%c1_205, %c0_206, %c0_207, %c0_208] : memref<2x4x1x8xf32, #tpu.memory_space<vmem>>, vector<1x4x1x8xf32>
    %265 = vector.shape_cast %264 : vector<1x4x1x8xf32> to vector<4x1x8xf32>
    %266 = vector.broadcast %265 : vector<4x1x8xf32> to vector<4x34x8xf32>
    %267 = arith.addf %263, %266 : vector<4x34x8xf32>
    "tpu.trace_start"() <{level = 10 : i32, message = "hmd,hnd->hmn"}> : () -> ()
    %cst_209 = arith.constant dense<0.000000e+00> : vector<4x34x34xf32>
    %268 = tpu.matmul %225, %246, %cst_209 {dimension_numbers = #tpu.dot_dimension_numbers<[2], [2], [1], [1], [0, 0, 0, 1, 1, 1], [0], [0]>} : vector<4x34x8xf32>, vector<4x34x8xf32>, vector<4x34x34xf32> -> vector<4x34x34xf32>
    "tpu.trace_stop"() : () -> ()
    %cst_210 = arith.constant 0.353553385 : f32
    %269 = vector.broadcast %cst_210 : f32 to vector<4x34x34xf32>
    %270 = arith.mulf %268, %269 : vector<4x34x34xf32>
    %271 = vector.broadcast %4 : vector<1x34x34xf32> to vector<4x34x34xf32>
    %272 = arith.addf %270, %271 : vector<4x34x34xf32>
    %cst_211 = arith.constant dense<0xFF800000> : vector<4x34xf32>
    %273 = vector.multi_reduction <maximumf>, %272, %cst_211 [2] : vector<4x34x34xf32> to vector<4x34xf32>
    %274 = vector.shape_cast %273 : vector<4x34xf32> to vector<4x34x1xf32>
    %275 = vector.broadcast %274 : vector<4x34x1xf32> to vector<4x34x34xf32>
    %276 = arith.subf %272, %275 : vector<4x34x34xf32>
    %277 = math.exp %276 : vector<4x34x34xf32>
    %cst_212 = arith.constant dense<0.000000e+00> : vector<4x34xf32>
    %278 = vector.multi_reduction <add>, %277, %cst_212 [2] : vector<4x34x34xf32> to vector<4x34xf32>
    %279 = vector.shape_cast %278 : vector<4x34xf32> to vector<4x34x1xf32>
    %280 = tpu.reciprocal %279 {approx = true} : vector<4x34x1xf32> -> vector<4x34x1xf32>
    %281 = vector.broadcast %280 : vector<4x34x1xf32> to vector<4x34x34xf32>
    %282 = arith.mulf %277, %281 : vector<4x34x34xf32>
    "tpu.trace_start"() <{level = 10 : i32, message = "hmn,hnd->hmd"}> : () -> ()
    %cst_213 = arith.constant dense<0.000000e+00> : vector<4x34x8xf32>
    %283 = tpu.matmul %282, %267, %cst_213 {dimension_numbers = #tpu.dot_dimension_numbers<[2], [1], [1], [2], [0, 0, 0, 1, 1, 2], [0], [0]>} : vector<4x34x34xf32>, vector<4x34x8xf32>, vector<4x34x8xf32> -> vector<4x34x8xf32>
    "tpu.trace_stop"() : () -> ()
    %c1_214 = arith.constant 1 : index
    %c0_215 = arith.constant 0 : index
    %c0_216 = arith.constant 0 : index
    %284 = vector.load %arg11[%c1_214, %c0_215, %c0_216] : memref<2x1x32xf32, #tpu.memory_space<vmem>>, vector<1x1x32xf32>
    %285 = vector.shape_cast %284 : vector<1x1x32xf32> to vector<1x32xf32>
    %286 = vector.extract_strided_slice %283 {offsets = [0, 0, 0], sizes = [1, 34, 8], strides = [1, 1, 1]} : vector<4x34x8xf32> to vector<1x34x8xf32>
    %287 = vector.shape_cast %286 : vector<1x34x8xf32> to vector<34x8xf32>
    %c1_217 = arith.constant 1 : index
    %c0_218 = arith.constant 0 : index
    %c0_219 = arith.constant 0 : index
    %c0_220 = arith.constant 0 : index
    %288 = vector.load %arg10[%c1_217, %c0_218, %c0_219, %c0_220] : memref<2x4x8x32xf32, #tpu.memory_space<vmem>>, vector<1x1x8x32xf32>
    %289 = vector.shape_cast %288 : vector<1x1x8x32xf32> to vector<8x32xf32>
    %cst_221 = arith.constant dense<0.000000e+00> : vector<34x32xf32>
    %290 = tpu.matmul %287, %289, %cst_221 {dimension_numbers = #tpu.dot_dimension_numbers<[1], [0], [0], [1], [0, 0, 1, 1], [], []>} : vector<34x8xf32>, vector<8x32xf32>, vector<34x32xf32> -> vector<34x32xf32>
    %291 = vector.broadcast %285 : vector<1x32xf32> to vector<34x32xf32>
    %292 = arith.addf %291, %290 : vector<34x32xf32>
    %293 = vector.extract_strided_slice %283 {offsets = [1, 0, 0], sizes = [1, 34, 8], strides = [1, 1, 1]} : vector<4x34x8xf32> to vector<1x34x8xf32>
    %294 = vector.shape_cast %293 : vector<1x34x8xf32> to vector<34x8xf32>
    %c1_222 = arith.constant 1 : index
    %c1_223 = arith.constant 1 : index
    %c0_224 = arith.constant 0 : index
    %c0_225 = arith.constant 0 : index
    %295 = vector.load %arg10[%c1_222, %c1_223, %c0_224, %c0_225] : memref<2x4x8x32xf32, #tpu.memory_space<vmem>>, vector<1x1x8x32xf32>
    %296 = vector.shape_cast %295 : vector<1x1x8x32xf32> to vector<8x32xf32>
    %cst_226 = arith.constant dense<0.000000e+00> : vector<34x32xf32>
    %297 = tpu.matmul %294, %296, %cst_226 {dimension_numbers = #tpu.dot_dimension_numbers<[1], [0], [0], [1], [0, 0, 1, 1], [], []>} : vector<34x8xf32>, vector<8x32xf32>, vector<34x32xf32> -> vector<34x32xf32>
    %298 = arith.addf %292, %297 : vector<34x32xf32>
    %299 = vector.extract_strided_slice %283 {offsets = [2, 0, 0], sizes = [1, 34, 8], strides = [1, 1, 1]} : vector<4x34x8xf32> to vector<1x34x8xf32>
    %300 = vector.shape_cast %299 : vector<1x34x8xf32> to vector<34x8xf32>
    %c1_227 = arith.constant 1 : index
    %c2_228 = arith.constant 2 : index
    %c0_229 = arith.constant 0 : index
    %c0_230 = arith.constant 0 : index
    %301 = vector.load %arg10[%c1_227, %c2_228, %c0_229, %c0_230] : memref<2x4x8x32xf32, #tpu.memory_space<vmem>>, vector<1x1x8x32xf32>
    %302 = vector.shape_cast %301 : vector<1x1x8x32xf32> to vector<8x32xf32>
    %cst_231 = arith.constant dense<0.000000e+00> : vector<34x32xf32>
    %303 = tpu.matmul %300, %302, %cst_231 {dimension_numbers = #tpu.dot_dimension_numbers<[1], [0], [0], [1], [0, 0, 1, 1], [], []>} : vector<34x8xf32>, vector<8x32xf32>, vector<34x32xf32> -> vector<34x32xf32>
    %304 = arith.addf %298, %303 : vector<34x32xf32>
    %305 = vector.extract_strided_slice %283 {offsets = [3, 0, 0], sizes = [1, 34, 8], strides = [1, 1, 1]} : vector<4x34x8xf32> to vector<1x34x8xf32>
    %306 = vector.shape_cast %305 : vector<1x34x8xf32> to vector<34x8xf32>
    %c1_232 = arith.constant 1 : index
    %c3_233 = arith.constant 3 : index
    %c0_234 = arith.constant 0 : index
    %c0_235 = arith.constant 0 : index
    %307 = vector.load %arg10[%c1_232, %c3_233, %c0_234, %c0_235] : memref<2x4x8x32xf32, #tpu.memory_space<vmem>>, vector<1x1x8x32xf32>
    %308 = vector.shape_cast %307 : vector<1x1x8x32xf32> to vector<8x32xf32>
    %cst_236 = arith.constant dense<0.000000e+00> : vector<34x32xf32>
    %309 = tpu.matmul %306, %308, %cst_236 {dimension_numbers = #tpu.dot_dimension_numbers<[1], [0], [0], [1], [0, 0, 1, 1], [], []>} : vector<34x8xf32>, vector<8x32xf32>, vector<34x32xf32> -> vector<34x32xf32>
    %310 = arith.addf %304, %309 : vector<34x32xf32>
    %311 = arith.addf %178, %310 : vector<34x32xf32>
    %312 = vector.extract_strided_slice %180 {offsets = [2, 0], sizes = [1, 32], strides = [1, 1]} : vector<4x32xf32> to vector<1x32xf32>
    %313 = vector.extract_strided_slice %180 {offsets = [3, 0], sizes = [1, 32], strides = [1, 1]} : vector<4x32xf32> to vector<1x32xf32>
    %cst_237 = arith.constant dense<0.000000e+00> : vector<34xf32>
    %314 = vector.multi_reduction <add>, %311, %cst_237 [1] : vector<34x32xf32> to vector<34xf32>
    %315 = vector.shape_cast %314 : vector<34xf32> to vector<34x1xf32>
    %cst_238 = arith.constant 3.200000e+01 : f32
    %316 = vector.broadcast %cst_238 : f32 to vector<34x1xf32>
    %317 = arith.divf %315, %316 : vector<34x1xf32>
    %318 = vector.broadcast %317 : vector<34x1xf32> to vector<34x32xf32>
    %319 = arith.subf %311, %318 : vector<34x32xf32>
    %320 = arith.mulf %319, %319 : vector<34x32xf32>
    %cst_239 = arith.constant dense<0.000000e+00> : vector<34xf32>
    %321 = vector.multi_reduction <add>, %320, %cst_239 [1] : vector<34x32xf32> to vector<34xf32>
    %322 = vector.shape_cast %321 : vector<34xf32> to vector<34x1xf32>
    %cst_240 = arith.constant 3.200000e+01 : f32
    %323 = vector.broadcast %cst_240 : f32 to vector<34x1xf32>
    %324 = arith.divf %322, %323 : vector<34x1xf32>
    %325 = vector.broadcast %317 : vector<34x1xf32> to vector<34x32xf32>
    %326 = arith.subf %311, %325 : vector<34x32xf32>
    %cst_241 = arith.constant 9.99999974E-6 : f32
    %327 = vector.broadcast %cst_241 : f32 to vector<34x1xf32>
    %328 = arith.addf %324, %327 : vector<34x1xf32>
    %329 = math.rsqrt %328 : vector<34x1xf32>
    %330 = vector.broadcast %329 : vector<34x1xf32> to vector<34x32xf32>
    %331 = arith.mulf %326, %330 : vector<34x32xf32>
    %332 = vector.broadcast %312 : vector<1x32xf32> to vector<34x32xf32>
    %333 = arith.mulf %331, %332 : vector<34x32xf32>
    %334 = vector.broadcast %313 : vector<1x32xf32> to vector<34x32xf32>
    %335 = arith.addf %333, %334 : vector<34x32xf32>
    %c1_242 = arith.constant 1 : index
    %c0_243 = arith.constant 0 : index
    %c0_244 = arith.constant 0 : index
    %336 = vector.load %arg12[%c1_242, %c0_243, %c0_244] : memref<2x32x64xf32, #tpu.memory_space<vmem>>, vector<1x32x64xf32>
    %337 = vector.shape_cast %336 : vector<1x32x64xf32> to vector<32x64xf32>
    %cst_245 = arith.constant dense<0.000000e+00> : vector<34x64xf32>
    %338 = tpu.matmul %335, %337, %cst_245 {dimension_numbers = #tpu.dot_dimension_numbers<[1], [0], [0], [1], [0, 0, 1, 1], [], []>} : vector<34x32xf32>, vector<32x64xf32>, vector<34x64xf32> -> vector<34x64xf32>
    %c1_246 = arith.constant 1 : index
    %c0_247 = arith.constant 0 : index
    %c0_248 = arith.constant 0 : index
    %339 = vector.load %arg13[%c1_246, %c0_247, %c0_248] : memref<2x1x64xf32, #tpu.memory_space<vmem>>, vector<1x1x64xf32>
    %340 = vector.shape_cast %339 : vector<1x1x64xf32> to vector<1x64xf32>
    %341 = vector.broadcast %340 : vector<1x64xf32> to vector<34x64xf32>
    %342 = arith.addf %338, %341 : vector<34x64xf32>
    %cst_249 = arith.constant 0.000000e+00 : f32
    %343 = vector.broadcast %cst_249 : f32 to vector<34x64xf32>
    %344 = arith.maximumf %342, %343 : vector<34x64xf32>
    %c1_250 = arith.constant 1 : index
    %c0_251 = arith.constant 0 : index
    %c0_252 = arith.constant 0 : index
    %345 = vector.load %arg14[%c1_250, %c0_251, %c0_252] : memref<2x64x32xf32, #tpu.memory_space<vmem>>, vector<1x64x32xf32>
    %346 = vector.shape_cast %345 : vector<1x64x32xf32> to vector<64x32xf32>
    %cst_253 = arith.constant dense<0.000000e+00> : vector<34x32xf32>
    %347 = tpu.matmul %344, %346, %cst_253 {dimension_numbers = #tpu.dot_dimension_numbers<[1], [0], [0], [1], [0, 0, 1, 1], [], []>} : vector<34x64xf32>, vector<64x32xf32>, vector<34x32xf32> -> vector<34x32xf32>
    %348 = arith.addf %311, %347 : vector<34x32xf32>
    %c1_254 = arith.constant 1 : index
    %c0_255 = arith.constant 0 : index
    %c0_256 = arith.constant 0 : index
    %349 = vector.load %arg15[%c1_254, %c0_255, %c0_256] : memref<2x1x32xf32, #tpu.memory_space<vmem>>, vector<1x1x32xf32>
    %350 = vector.shape_cast %349 : vector<1x1x32xf32> to vector<1x32xf32>
    %351 = vector.broadcast %350 : vector<1x32xf32> to vector<34x32xf32>
    %352 = arith.addf %348, %351 : vector<34x32xf32>
    %c0_257 = arith.constant 0 : index
    %c0_258 = arith.constant 0 : index
    %353 = vector.load %arg16[%c0_257, %c0_258] : memref<32x128xf32, #tpu.memory_space<vmem>>, vector<32x128xf32>
    %cst_259 = arith.constant dense<0.000000e+00> : vector<34x128xf32>
    %354 = tpu.matmul %352, %353, %cst_259 {dimension_numbers = #tpu.dot_dimension_numbers<[1], [0], [0], [1], [0, 0, 1, 1], [], []>} : vector<34x32xf32>, vector<32x128xf32>, vector<34x128xf32> -> vector<34x128xf32>
    %c0_260 = arith.constant 0 : index
    %c0_261 = arith.constant 0 : index
    %355 = vector.load %arg17[%c0_260, %c0_261] : memref<1x128xf32, #tpu.memory_space<vmem>>, vector<1x128xf32>
    %356 = vector.broadcast %355 : vector<1x128xf32> to vector<34x128xf32>
    %357 = arith.addf %354, %356 : vector<34x128xf32>
    %358 = arith.negf %357 : vector<34x128xf32>
    %359 = math.exp %358 : vector<34x128xf32>
    %cst_262 = arith.constant 1.000000e+00 : f32
    %360 = vector.broadcast %cst_262 : f32 to vector<34x128xf32>
    %361 = arith.addf %360, %359 : vector<34x128xf32>
    %362 = arith.divf %360, %361 : vector<34x128xf32>
    %c0_263 = arith.constant 0 : index
    %c0_264 = arith.constant 0 : index
    %363 = vector.load %arg18[%c0_263, %c0_264] : memref<34x128xf32, #tpu.memory_space<vmem>>, vector<34x128xf32>
    tpu.vector_store %arg18[%c0_263, %c0_264], %362 {strides = array<i32>} : memref<34x128xf32, #tpu.memory_space<vmem>>, vector<34x128xf32>,
    return
  }
}

</mosaic_0001>

<bundles_post_ra>
// kernel: vision_decoder_forward.1
= control target key start
LH: loop header
LB: loop body
LE: loop exit
PB: predicated region body
PF: predicated region fallthrough
CT: control target
= control target key end

     0   :  { %vm93_vm0 = vcmask 254976   ;;  %vm80_vm1 = vcmask 261120   ;;  %v4715_v20 = vmov 32.0   ;;  %s6810_s0 = inlined_call_operand.vmem [shape: f32[34,32], index: 0, kind: input, shape index: {}]   ;;  %s6811_s1 = inlined_call_operand.vmem [shape: f32[34,32], index: 1, kind: input, shape index: {}]   ;;  %s6812_s4 = inlined_call_operand.vmem [shape: f32[2,4,32,8], index: 4, kind: input, shape index: {}]   ;;  %s6813_s6 = inlined_call_operand.vmem [shape: f32[2,4,32,8], index: 6, kind: input, shape index: {}]   ;;  %s6814_s3 = inlined_call_operand.vmem [shape: f32[2,4,32], index: 3, kind: input, shape index: {}]   ;;  %s6815_s5 = inlined_call_operand.vmem [shape: f32[2,4,1,8], index: 5, kind: input, shape index: {}]   ;;  %s6816_s7 = inlined_call_operand.vmem [shape: f32[2,4,1,8], index: 7, kind: input, shape index: {}]   ;;  %s6817_s8 = inlined_call_operand.vmem [shape: f32[2,4,32,8], index: 8, kind: input, shape index: {}]   ;;  %s6818_s9 = inlined_call_operand.vmem [shape: f32[2,4,1,8], index: 9, kind: input, shape index: {}]   ;;  %s6819_s2 = inlined_call_operand.vmem [shape: f32[34,34], index: 2, kind: input, shape index: {}]   ;;  %s6820_s10 = inlined_call_operand.vmem [shape: f32[2,4,8,32], index: 10, kind: input, shape index: {}]   ;;  %s6821_s11 = inlined_call_operand.vmem [shape: f32[2,1,32], index: 11, kind: input, shape index: {}]   ;;  %s6822_s13 = inlined_call_operand.vmem [shape: f32[2,1,64], index: 13, kind: input, shape index: {}]   ;;  %s6823_s12 = inlined_call_operand.vmem [shape: f32[2,32,64], index: 12, kind: input, shape index: {}]   ;;  %s6824_s14 = inlined_call_operand.vmem [shape: f32[2,64,32], index: 14, kind: input, shape index: {}]   ;;  %s6825_s15 = inlined_call_operand.vmem [shape: f32[2,1,32], index: 15, kind: input, shape index: {}]   ;;  %s6826_s16 = inlined_call_operand.vmem [shape: f32[32,128], index: 16, kind: input, shape index: {}]   ;;  %s6827_s17 = inlined_call_operand.vmem [shape: f32[1,128], index: 17, kind: input, shape index: {}]   ;;  %s6828_s18 = inlined_call_operand.vmem [shape: f32[34,128], index: 18, kind: output, shape index: {}]  }
   0x1   :  { %6833 = sst [smem:[#allocation2_spill]] %s6810_s0  ;;  %4486 = vrcp.f32 %v4715_v20 }
   0x2   :  { %6834 = sst [smem:[#allocation3_spill]] %s6811_s1 }
   0x3   :  { %6835 = sst [smem:[#allocation4_spill]] %s6812_s4 }
   0x4   :  { %6836 = sst [smem:[#allocation5_spill]] %s6822_s13 }
   0x5   :  { %s6837_s29 = sld [smem:[#allocation2_spill]] }
   0x6   :  { %s6838_s13 = sld [smem:[#allocation3_spill]] }
   0x7   :  { %v4487_v21 = vpop.eup %4486  ;;  %s6839_s20 = sld [smem:[#allocation4_spill]] }
   0x8   :  { %v98_v22 = vmul.f32 32.0, %v4487_v21  ;;  %vm102_vm2 = vweird.f32 %v4487_v21  ;;  %s6840_s23 = sld [smem:[#allocation5_spill]] }
   0xa   :  { %v99_v23 = vsub.f32 1.0, %v98_v22 }
   0xb   :  { %v63_v0 = vld [vmem:[%s6837_s29 + $0x20] sm:$0x3]  ;;  %v61_v2 = vld [vmem:[%s6837_s29 + $0x10] sm:$0xff]  ;;  %v60_v8 = vld [vmem:[%s6837_s29 + $0x8] sm:$0xff] }
   0xc   :  { %v68_v1 = vld [vmem:[%s6838_s13 + $0x20] sm:$0x3]  ;;  %v66_v4 = vld [vmem:[%s6838_s13 + $0x10] sm:$0xff]  ;;  %v62_v10 = vld [vmem:[%s6837_s29 + $0x18] sm:$0xff]  ;;  %v100_v24 = vmul.f32 %v4487_v21, %v99_v23 }
   0xd   :  { %v4820_v3 = vadd.f32 %v68_v1, %v63_v0  ;;  %v4825_v5 = vadd.f32 %v66_v4, %v61_v2  ;;  %v59_v6 = vld [vmem:[%s6837_s29] sm:$0xff]  ;;  %v67_v11 = vld [vmem:[%s6838_s13 + $0x18] sm:$0xff]  ;;  %v65_v12 = vld [vmem:[%s6838_s13 + $0x8] sm:$0xff] }
   0xe   :  { %v64_v7 = vld [vmem:[%s6838_s13] sm:$0xff]  ;;  %v4849_v14 = vadd.f32 %v65_v12, %v60_v8  ;;  %v4853_v16 = vadd.f32 %v67_v11, %v62_v10  ;;  %v101_v25 = vadd.f32 %v4487_v21, %v100_v24  ;;  %v214_v52 = vld [vmem:[%s6839_s20 + $0x18] sm:$0xff]  ;;  %v213_v53 = vld [vmem:[%s6839_s20 + $0x10] sm:$0xff] }
   0xf   :  { %v94_v9 = vsel %vm93_vm0, %v4820_v3, 0.0  ;;  %v87_v13 = vsel %vm80_vm1, %v4825_v5, 0.0  ;;  %v4851_v15 = vadd.f32 %v64_v7, %v59_v6  ;;  %4443 = vmatpush.msra.mxu2 %v214_v52  ;;  %4444 = vmatpush.msra.mxu3 %v214_v52  ;;  %v212_v54 = vld [vmem:[%s6839_s20 + $0x8] sm:$0xff]  ;;  %v211_v55 = vld [vmem:[%s6839_s20] sm:$0xff]  ;;  %v4031_v56 = vld [vmem:[%s6839_s20 + $0x78] sm:$0xff] }
  0x10   :  { %95 = vadd.xlane.f32.xlu1 %v94_v9  ;;  %88 = vadd.xlane.f32.xlu0 %v87_v13  ;;  %v84_v17 = vsel %vm80_vm1, %v4849_v14, 0.0  ;;  %v90_v19 = vsel %vm80_vm1, %v4853_v16, 0.0  ;;  %v4861_v26 = vsel %vm102_vm2, %v4487_v21, %v101_v25  ;;  %v4030_v60 = vld [vmem:[%s6839_s20 + $0x70] sm:$0xff]  ;;  %v4029_v63 = vld [vmem:[%s6839_s20 + $0x68] sm:$0xff]  ;;  %v4028_v1 = vld [vmem:[%s6839_s20 + $0x60] sm:$0xff] }
  0x11   :  { %85 = vadd.xlane.f32.xlu2 %v84_v17  ;;  %v81_v18 = vsel %vm80_vm1, %v4851_v15, 0.0  ;;  %242 = vmatpush.msra.mxu0 %v214_v52  ;;  %v4022_v2 = vld [vmem:[%s6839_s20 + $0x58] sm:$0xff]  ;;  %v4021_v8 = vld [vmem:[%s6839_s20 + $0x50] sm:$0xff]  ;;  %v4020_v13 = vld [vmem:[%s6839_s20 + $0x48] sm:$0xff] }
  0x12   :  { %4442 = vmatpush.msra.mxu1 %v214_v52  ;;  %4446 = vmatpush.msra.mxu2 %v213_v53  ;;  %v412_v4 = vld [vmem:[%s6813_s6 + $0x18] sm:$0xff]  ;;  %v411_v9 = vld [vmem:[%s6813_s6 + $0x10] sm:$0xff]  ;;  %v410_v17 = vld [vmem:[%s6813_s6 + $0x8] sm:$0xff] }
  0x13   :  { %4447 = vmatpush.msra.mxu3 %v213_v53  ;;  %243 = vmatpush.msra.mxu0 %v213_v53  ;;  %v4019_v22 = vld [vmem:[%s6839_s20 + $0x40] sm:$0xff] }
  0x14   :  { %4445 = vmatpush.msra.mxu1 %v213_v53  ;;  %4449 = vmatpush.msra.mxu2 %v212_v54  ;;  %v409_v23 = vld [vmem:[%s6813_s6] sm:$0xff] }
  0x15   :  { %4450 = vmatpush.msra.mxu3 %v212_v54  ;;  %244 = vmatpush.msra.mxu0 %v212_v54 }
  0x16   :  { %4448 = vmatpush.msra.mxu1 %v212_v54  ;;  %4452 = vmatpush.msra.mxu2 %v211_v55 }
  0x17   :  { %4453 = vmatpush.msra.mxu3 %v211_v55  ;;  %245 = vmatpush.msra.mxu0 %v211_v55 }
  0x18   :  { %82 = vadd.xlane.f32.xlu1 %v81_v18  ;;  %91 = vadd.xlane.f32.xlu0 %v90_v19 }
  0x19   :  { %4451 = vmatpush.msra.mxu1 %v211_v55  ;;  %353 = vmatpush.msrb.mxu3 %v4031_v56 }
  0x1a   :  { %316 = vmatpush.msrb.mxu2 %v4022_v2  ;;  %425 = vmatpush.msrb.mxu0 %v412_v4 }
  0x1b   :  { %354 = vmatpush.msrb.mxu3 %v4030_v60 }
  0x1c   :  { %317 = vmatpush.msrb.mxu2 %v4021_v8  ;;  %426 = vmatpush.msrb.mxu0 %v411_v9 }
  0x1d   :  { %355 = vmatpush.msrb.mxu3 %v4029_v63 }
  0x1e   :  { %318 = vmatpush.msrb.mxu2 %v4020_v13  ;;  %427 = vmatpush.msrb.mxu0 %v410_v17 }
  0x1f   :  { %356 = vmatpush.msrb.mxu3 %v4028_v1 }
  0x20   :  { %319 = vmatpush.msrb.mxu2 %v4019_v22  ;;  %428 = vmatpush.msrb.mxu0 %v409_v23  ;;  %v4063_v22 = vld [vmem:[%s6813_s6 + $0x78] sm:$0xff]  ;;  %v4062_v23 = vld [vmem:[%s6813_s6 + $0x70] sm:$0xff] }
  0x83   :  { %v96_v27 = vpop.xlane.xlu1 %95  ;;  %v89_v29 = vpop.xlane.xlu0 %88 }
  0x84   :  { %v108_v28 = vmul.f32 %v4861_v26, %v96_v27  ;;  %v106_v30 = vmul.f32 %v4861_v26, %v89_v29  ;;  %v86_v36 = vpop.xlane.xlu2 %85  ;;  %v4012_v29 = vld [vmem:[%s6839_s20 + $0x30] sm:$0xff] }
  0x85   :  { %v105_v42 = vmul.f32 %v4861_v26, %v86_v36  ;;  %v79_v36 = vld [vmem:[%s6814_s3] sm:$0xf] }
  0x86   :  { %v4866_v31 = vsub.f32 %v4820_v3, %v108_v28  ;;  %v4869_v32 = vsub.f32 %v4825_v5, %v106_v30  ;;  %v4013_v28 = vld [vmem:[%s6839_s20 + $0x38] sm:$0xff]  ;;  %v205_v53 = vperm.slane %v79_v36, 1 }
  0x87   :  { %v4891_v47 = vsub.f32 %v4849_v14, %v105_v42  ;;  %279 = vmatpush.msrb.mxu1 %v4013_v28  ;;  %v4045_v28 = vld [vmem:[%s6813_s6 + $0x38] sm:$0xff] }
  0x88   :  { %v118_v33 = vmul.f32 %v4866_v31, %v4866_v31  ;;  %v116_v34 = vmul.f32 %v4869_v32, %v4869_v32 }
  0x89   :  { %v115_v50 = vmul.f32 %v4891_v47, %v4891_v47  ;;  %280 = vmatpush.msrb.mxu1 %v4012_v29 }
  0x8a   :  { %v131_v35 = vsel %vm93_vm0, %v118_v33, 0.0  ;;  %v125_v37 = vsel %vm80_vm1, %v116_v34, 0.0 }
  0x8b   :  { %132 = vadd.xlane.f32.xlu1 %v131_v35  ;;  %v83_v38 = vpop.xlane.xlu1 %82  ;;  %v92_v39 = vpop.xlane.xlu0 %91  ;;  %126 = vadd.xlane.f32.xlu2 %v125_v37  ;;  %v122_v51 = vsel %vm80_vm1, %v115_v50, 0.0  ;;  %v4011_v35 = vld [vmem:[%s6839_s20 + $0x28] sm:$0xff] }
  0x8c   :  { %v104_v40 = vmul.f32 %v4861_v26, %v83_v38  ;;  %v107_v41 = vmul.f32 %v4861_v26, %v92_v39  ;;  %281 = vmatpush.msrb.mxu1 %v4011_v35  ;;  %v4052_v35 = vld [vmem:[%s6813_s6 + $0x48] sm:$0xff] }
  0x8e   :  { %v4881_v43 = vsub.f32 %v4851_v15, %v104_v40  ;;  %v4884_v44 = vsub.f32 %v4853_v16, %v107_v41  ;;  %v4010_v40 = vld [vmem:[%s6839_s20 + $0x20] sm:$0xff] }
  0x8f   :  { %282 = vmatpush.msrb.mxu1 %v4010_v40  ;;  %v4043_v40 = vld [vmem:[%s6813_s6 + $0x28] sm:$0xff] }
  0x90   :  { %v114_v45 = vmul.f32 %v4881_v43, %v4881_v43  ;;  %v117_v46 = vmul.f32 %v4884_v44, %v4884_v44 }
  0x92   :  { %v119_v48 = vsel %vm80_vm1, %v114_v45, 0.0  ;;  %v128_v49 = vsel %vm80_vm1, %v117_v46, 0.0 }
  0x93   :  { %129 = vadd.xlane.f32.xlu0 %v128_v49  ;;  %120 = vadd.xlane.f32.xlu2 %v119_v48  ;;  %v4981_v48 = vperm.slane %v79_v36, 0  ;;  %v4044_v36 = vld [vmem:[%s6813_s6 + $0x30] sm:$0xff] }
  0x9b   :  { %123 = vadd.xlane.f32.xlu0 %v122_v51 }
  0xfe   :  { %v133_v57 = vpop.xlane.xlu1 %132  ;;  %v127_v58 = vpop.xlane.xlu2 %126 }
  0xff   :  { %v138_v59 = vmul.f32 %v133_v57, %v4861_v26  ;;  %v136_v61 = vmul.f32 %v127_v58, %v4861_v26 }
 0x101   :  { %v4918_v62 = vadd.f32 1e-05, %v138_v59  ;;  %v4923_v0 = vadd.f32 1e-05, %v136_v61 }
 0x103   :  { %4488 = vrsqrt.f32 %v4918_v62  ;;  %vm190_vm3 = vweird.f32 %v4918_v62  ;;  %vm170_vm6 = vweird.f32 %v4923_v0 }
 0x104   :  { %4490 = vrsqrt.f32 %v4923_v0 }
 0x106   :  { %v130_v6 = vpop.xlane.xlu0 %129  ;;  %v121_v7 = vpop.xlane.xlu2 %120 }
 0x107   :  { %v137_v10 = vmul.f32 %v130_v6, %v4861_v26  ;;  %v134_v11 = vmul.f32 %v121_v7, %v4861_v26 }
 0x109   :  { %v4489_v12 = vpop.eup %4488  ;;  %v4951_v20 = vadd.f32 1e-05, %v137_v10  ;;  %v4953_v21 = vadd.f32 1e-05, %v134_v11 }
 0x10a   :  { %v4491_v18 = vpop.eup %4490  ;;  %v185_v19 = vmul.f32 %v4489_v12, %v4918_v62  ;;  %vm191_vm4 = vweird.f32 %v4489_v12 }
 0x10b   :  { %v165_v24 = vmul.f32 %v4491_v18, %v4923_v0  ;;  %4492 = vrsqrt.f32 %v4951_v20  ;;  %vm171_vm5 = vweird.f32 %v4491_v18  ;;  %vm192_vm7 = vmor %vm190_vm3, %vm191_vm4  ;;  %vm150_vm10 = vweird.f32 %v4953_v21 }
 0x10c   :  { %v186_v25 = vmul.f32 %v4489_v12, %v185_v19  ;;  %4494 = vrsqrt.f32 %v4953_v21  ;;  %vm172_vm8 = vmor %vm170_vm6, %vm171_vm5  ;;  %vm180_vm12 = vweird.f32 %v4951_v20  ;;  %vm775_vm4 = vcmask 64512  }
 0x10d   :  { %v166_v27 = vmul.f32 %v4491_v18, %v165_v24  ;;  %vm1301_vm5 = vcmask 1041408   ;;  %vm1064_vm6 = vcmask 277504  }
 0x10e   :  { %v187_v30 = vmul.f32 0.5, %v186_v25  ;;  %v124_v34 = vpop.xlane.xlu0 %123  ;;  %v4061_v25 = vld [vmem:[%s6813_s6 + $0x68] sm:$0xff] }
 0x10f   :  { %v167_v33 = vmul.f32 0.5, %v166_v27  ;;  %v135_v38 = vmul.f32 %v124_v34, %v4861_v26  ;;  %v594_v34 = vld [vmem:[%s6817_s8 + $0x10] sm:$0xff] }
 0x110   :  { %v188_v37 = vsub.f32 1.5, %v187_v30  ;;  %v595_v30 = vld [vmem:[%s6817_s8 + $0x18] sm:$0xff] }
 0x111   :  { %v168_v39 = vsub.f32 1.5, %v167_v33  ;;  %v4493_v41 = vpop.eup %4492  ;;  %v140_v45 = vadd.f32 1e-05, %v135_v38  ;;  %v4053_v33 = vld [vmem:[%s6813_s6 + $0x50] sm:$0xff]  ;;  %v4051_v38 = vld [vmem:[%s6813_s6 + $0x40] sm:$0xff] }
 0x112   :  { %v189_v42 = vmul.f32 %v4489_v12, %v188_v37  ;;  %v4495_v46 = vpop.eup %4494  ;;  %v175_v50 = vmul.f32 %v4493_v41, %v4951_v20  ;;  %vm181_vm9 = vweird.f32 %v4493_v41  ;;  %v593_v37 = vld [vmem:[%s6817_s8 + $0x8] sm:$0xff] }
 0x113   :  { %v169_v49 = vmul.f32 %v4491_v18, %v168_v39  ;;  %v145_v52 = vmul.f32 %v4495_v46, %v4953_v21  ;;  %4496 = vrsqrt.f32 %v140_v45  ;;  %vm151_vm11 = vweird.f32 %v4495_v46  ;;  %vm182_vm13 = vmor %vm180_vm12, %vm181_vm9  ;;  %v592_v39 = vld [vmem:[%s6817_s8] sm:$0xff] }
 0x114   :  { %v193_v51 = vsel %vm192_vm7, %v4489_v12, %v189_v42  ;;  %v176_v56 = vmul.f32 %v4493_v41, %v175_v50  ;;  %vm152_vm14 = vmor %vm150_vm10, %vm151_vm11  ;;  %vm160_vm2 = vweird.f32 %v140_v45  ;;  %v4095_v42 = vld [vmem:[%s6817_s8 + $0x78] sm:$0xff]  ;;  %v4085_v50 = vld [vmem:[%s6817_s8 + $0x50] sm:$0xff]  ;;  %vm1077_vm7 = vcmask 271360  }
 0x115   :  { %v173_v54 = vsel %vm172_vm8, %v4491_v18, %v169_v49  ;;  %v198_v55 = vmul.f32 %v193_v51, %v4866_v31  ;;  %v146_v58 = vmul.f32 %v4495_v46, %v145_v52  ;;  %v4086_v49 = vld [vmem:[%s6817_s8 + $0x58] sm:$0xff]  ;;  %v4084_v51 = vld [vmem:[%s6817_s8 + $0x48] sm:$0xff]  ;;  %v4083_v52 = vld [vmem:[%s6817_s8 + $0x40] sm:$0xff] }
 0x116   :  { %v196_v57 = vmul.f32 %v173_v54, %v4869_v32  ;;  %v177_v60 = vmul.f32 0.5, %v176_v56  ;;  %v4076_v54 = vld [vmem:[%s6817_s8 + $0x30] sm:$0xff]  ;;  %v4074_v56 = vld [vmem:[%s6817_s8 + $0x20] sm:$0xff] }
 0x117   :  { %v204_v59 = vmul.f32 %v4981_v48, %v198_v55  ;;  %v147_v62 = vmul.f32 0.5, %v146_v58  ;;  %v4075_v55 = vld [vmem:[%s6817_s8 + $0x28] sm:$0xff] }
 0x118   :  { %v202_v61 = vmul.f32 %v4981_v48, %v196_v57  ;;  %v178_v0 = vsub.f32 1.5, %v177_v60 }
 0x119   :  { %v4992_v63 = vadd.f32 %v205_v53, %v204_v59  ;;  %v4497_v1 = vpop.eup %4496  ;;  %v148_v31 = vsub.f32 1.5, %v147_v62 }
 0x11a   :  { %v4995_v2 = vadd.f32 %v205_v53, %v202_v61  ;;  %v179_v32 = vmul.f32 %v4493_v41, %v178_v0  ;;  %v155_v4 = vmul.f32 %v4497_v1, %v140_v45  ;;  %vm161_vm15 = vweird.f32 %v4497_v1  ;;  %v4094_v45 = vld [vmem:[%s6817_s8 + $0x70] sm:$0xff] }
 0x11b   :  { %4009 = vmatmul.msk.f32.vlgmr.msra.gmra.mxu3 %vm80_vm1, %v4992_v63  ;;  %v149_v6 = vmul.f32 %v4495_v46, %v148_v31  ;;  %vm162_vm3 = vmor %vm160_vm2, %vm161_vm15 }
 0x11c   :  { %4007 = vmatmul.msk.f32.vlgmr.msra.gmra.mxu2 %vm80_vm1, %v4995_v2  ;;  %v183_v7 = vsel %vm182_vm13, %v4493_v41, %v179_v32  ;;  %v156_v8 = vmul.f32 %v4497_v1, %v155_v4  ;;  %536 = vmatpush.msra.mxu3 %v4063_v22  ;;  %v4042_v41 = vld [vmem:[%s6813_s6 + $0x20] sm:$0xff] }
 0x11d   :  { %v197_v9 = vmul.f32 %v183_v7, %v4884_v44  ;;  %v153_v10 = vsel %vm152_vm14, %v4495_v46, %v149_v6  ;;  %v4093_v46 = vld [vmem:[%s6817_s8 + $0x68] sm:$0xff] }
 0x11e   :  { %v194_v11 = vmul.f32 %v153_v10, %v4881_v43  ;;  %v157_v12 = vmul.f32 0.5, %v156_v8  ;;  %v4054_v43 = vld [vmem:[%s6813_s6 + $0x58] sm:$0xff]  ;;  %537 = vmatpush.msra.mxu3 %v4062_v23 }
 0x11f   :  { %v203_v13 = vmul.f32 %v4981_v48, %v197_v9  ;;  %499 = vmatpush.msra.mxu2 %v4054_v43 }
 0x120   :  { %v200_v17 = vmul.f32 %v4981_v48, %v194_v11  ;;  %v158_v18 = vsub.f32 1.5, %v157_v12  ;;  %538 = vmatpush.msra.mxu3 %v4061_v25 }
 0x121   :  { %v5006_v19 = vadd.f32 %v205_v53, %v203_v13  ;;  %500 = vmatpush.msra.mxu2 %v4053_v33  ;;  %v4455_v33 = vld [vmem:[%s6815_s5] ss:$0 sm:$0xff] }
 0x122   :  { %v5008_v20 = vadd.f32 %v205_v53, %v200_v17  ;;  %v159_v21 = vmul.f32 %v4497_v1, %v158_v18  ;;  %v4457_v17 = vld [vmem:[%s6816_s7] ss:$0 sm:$0xff] }
 0x123   :  { %501 = vmatpush.msra.mxu2 %v4052_v35 }
 0x124   :  { %4008 = vmatmul.msk.f32.gmra.mxu2 %vm80_vm1, %v5006_v19  ;;  %v163_v44 = vsel %vm162_vm3, %v4497_v1, %v159_v21  ;;  %4005 = vmatmul.msk.f32.vlgmr.msra.gmra.mxu0 %vm80_vm1, %v5008_v20 }
 0x125   :  { %4032 = vmatmul.msk.f32.vlgmr.msrb.gmra.mxu3 %vm80_vm1, %v5008_v20  ;;  %v195_v24 = vmul.f32 %v163_v44, %v4891_v47  ;;  %v4060_v47 = vld [vmem:[%s6813_s6 + $0x60] sm:$0xff]  ;;  %608 = vmatpush.msra.mxu0 %v595_v30 }
 0x126   :  { %539 = vmatpush.msra.mxu3 %v4060_v47  ;;  %502 = vmatpush.msra.mxu2 %v4051_v38 }
 0x127   :  { %v201_v27 = vmul.f32 %v4981_v48, %v195_v24  ;;  %609 = vmatpush.msra.mxu0 %v594_v34  ;;  %v4092_v48 = vld [vmem:[%s6817_s8 + $0x60] sm:$0xff] }
 0x128   :  { %719 = vmatpush.msrb.mxu3 %v4095_v42 }
 0x129   :  { %v5033_v29 = vadd.f32 %v205_v53, %v201_v27  ;;  %610 = vmatpush.msra.mxu0 %v593_v37  ;;  %v4077_v53 = vld [vmem:[%s6817_s8 + $0x38] sm:$0xff] }
 0x12a   :  { %720 = vmatpush.msrb.mxu3 %v4094_v45 }
 0x12b   :  { %4006 = vmatmul.msk.f32.vlgmr.msra.gmra.mxu1 %vm80_vm1, %v5033_v29  ;;  %611 = vmatpush.msra.mxu0 %v592_v39 }
 0x12c   :  { %4023 = vmatmul.msk.f32.vlgmr.msrb.gmra.mxu2 %vm80_vm1, %v5008_v20  ;;  %4037 = vmatmul.msk.f32.vlgmr.msrb.gmra.mxu0 %vm80_vm1, %v5008_v20 }
 0x12d   :  { %4033 = vmatmul.msk.f32.gmra.mxu3 %vm80_vm1, %v5033_v29  ;;  %462 = vmatpush.msra.mxu1 %v4045_v28 }
 0x12e   :  { %721 = vmatpush.msrb.mxu3 %v4093_v46  ;;  %682 = vmatpush.msrb.mxu2 %v4086_v49 }
 0x12f   :  { %463 = vmatpush.msra.mxu1 %v4044_v36 }
 0x130   :  { %722 = vmatpush.msrb.mxu3 %v4092_v48  ;;  %683 = vmatpush.msrb.mxu2 %v4085_v50  ;;  %v4460_v48 = vld [vmem:[%s6816_s7 + $0x3] ss:$0 sm:$0xff] }
 0x131   :  { %464 = vmatpush.msra.mxu1 %v4043_v40 }
 0x132   :  { %684 = vmatpush.msrb.mxu2 %v4084_v51  ;;  %v4461_v51 = vld [vmem:[%s6818_s9] ss:$0 sm:$0xff] }
 0x133   :  { %4014 = vmatmul.msk.f32.vlgmr.msrb.gmra.mxu1 %vm80_vm1, %v5008_v20 }
 0x134   :  { %4024 = vmatmul.msk.f32.gmra.mxu2 %vm80_vm1, %v5033_v29  ;;  %4038 = vmatmul.msk.f32.gmra.mxu0 %vm80_vm1, %v5033_v29 }
 0x135   :  { %4034 = vmatmul.msk.f32.gmra.mxu3 %vm80_vm1, %v4995_v2  ;;  %465 = vmatpush.msra.mxu1 %v4042_v41 }
 0x136   :  { %685 = vmatpush.msrb.mxu2 %v4083_v52 }
 0x137   :  { %645 = vmatpush.msrb.mxu1 %v4077_v53 }
 0x139   :  { %646 = vmatpush.msrb.mxu1 %v4076_v54 }
 0x13b   :  { %4015 = vmatmul.msk.f32.gmra.mxu1 %vm80_vm1, %v5033_v29 }
 0x13c   :  { %4025 = vmatmul.msk.f32.gmra.mxu2 %vm80_vm1, %v4995_v2  ;;  %4039 = vmatmul.msk.f32.gmra.mxu0 %vm80_vm1, %v4995_v2 }
 0x13d   :  { %4035 = vmatmul.msk.f32.gmra.mxu3 %vm80_vm1, %v5006_v19  ;;  %647 = vmatpush.msrb.mxu1 %v4075_v55 }
 0x13f   :  { %648 = vmatpush.msrb.mxu1 %v4074_v56 }
 0x143   :  { %4016 = vmatmul.msk.f32.gmra.mxu1 %vm80_vm1, %v4995_v2 }
 0x144   :  { %4026 = vmatmul.msk.f32.gmra.mxu2 %vm80_vm1, %v5006_v19  ;;  %4040 = vmatmul.msk.f32.gmra.mxu0 %vm80_vm1, %v5006_v19 }
 0x145   :  { %4036 = vmatmul.msk.f32.gmra.mxu3 %vm80_vm1, %v4992_v63 }
 0x14b   :  { %4017 = vmatmul.msk.f32.gmra.mxu1 %vm80_vm1, %v5006_v19 }
 0x14c   :  { %4027 = vmatmul.msk.f32.gmra.mxu2 %vm80_vm1, %v4992_v63  ;;  %4041 = vmatmul.msk.f32.gmra.mxu0 %vm80_vm1, %v4992_v63 }
 0x14d   :  { %4064 = vmatmul.msk.f32.vlgmr.msra.gmra.mxu3 %vm80_vm1, %v5008_v20 }
 0x153   :  { %4018 = vmatmul.msk.f32.gmra.mxu1 %vm80_vm1, %v4992_v63 }
 0x154   :  { %4055 = vmatmul.msk.f32.vlgmr.msra.gmra.mxu2 %vm80_vm1, %v5008_v20  ;;  %4069 = vmatmul.msk.f32.vlgmr.msra.gmra.mxu0 %vm80_vm1, %v5008_v20 }
 0x155   :  { %4065 = vmatmul.msk.f32.gmra.mxu3 %vm80_vm1, %v5033_v29 }
 0x15b   :  { %4046 = vmatmul.msk.f32.vlgmr.msra.gmra.mxu1 %vm80_vm1, %v5008_v20 }
 0x15c   :  { %4056 = vmatmul.msk.f32.gmra.mxu2 %vm80_vm1, %v5033_v29  ;;  %4070 = vmatmul.msk.f32.gmra.mxu0 %vm80_vm1, %v5033_v29 }
 0x15d   :  { %4066 = vmatmul.msk.f32.gmra.mxu3 %vm80_vm1, %v4995_v2 }
 0x163   :  { %4047 = vmatmul.msk.f32.gmra.mxu1 %vm80_vm1, %v5033_v29 }
 0x164   :  { %4057 = vmatmul.msk.f32.gmra.mxu2 %vm80_vm1, %v4995_v2  ;;  %4071 = vmatmul.msk.f32.gmra.mxu0 %vm80_vm1, %v4995_v2 }
 0x165   :  { %4067 = vmatmul.msk.f32.gmra.mxu3 %vm80_vm1, %v5006_v19 }
 0x16b   :  { %4048 = vmatmul.msk.f32.gmra.mxu1 %vm80_vm1, %v4995_v2 }
 0x16c   :  { %4058 = vmatmul.msk.f32.gmra.mxu2 %vm80_vm1, %v5006_v19  ;;  %4072 = vmatmul.msk.f32.gmra.mxu0 %vm80_vm1, %v5006_v19 }
 0x16d   :  { %4068 = vmatmul.msk.f32.gmra.mxu3 %vm80_vm1, %v4992_v63 }
 0x173   :  { %4049 = vmatmul.msk.f32.gmra.mxu1 %vm80_vm1, %v5006_v19 }
 0x174   :  { %4059 = vmatmul.msk.f32.gmra.mxu2 %vm80_vm1, %v4992_v63  ;;  %4073 = vmatmul.msk.f32.gmra.mxu0 %vm80_vm1, %v4992_v63 }
 0x175   :  { %4096 = vmatmul.msk.f32.vlgmr.msrb.gmra.mxu3 %vm80_vm1, %v5008_v20 }
 0x17b   :  { %4050 = vmatmul.msk.f32.gmra.mxu1 %vm80_vm1, %v4992_v63 }
 0x17c   :  { %4087 = vmatmul.msk.f32.vlgmr.msrb.gmra.mxu2 %vm80_vm1, %v5008_v20 }
 0x17d   :  { %4097 = vmatmul.msk.f32.gmra.mxu3 %vm80_vm1, %v5033_v29 }
 0x183   :  { %4078 = vmatmul.msk.f32.vlgmr.msrb.gmra.mxu1 %vm80_vm1, %v5008_v20 }
 0x184   :  { %4088 = vmatmul.msk.f32.gmra.mxu2 %vm80_vm1, %v5033_v29 }
 0x185   :  { %4098 = vmatmul.msk.f32.gmra.mxu3 %vm80_vm1, %v4995_v2 }
 0x18b   :  { %4079 = vmatmul.msk.f32.gmra.mxu1 %vm80_vm1, %v5033_v29 }
 0x18c   :  { %4089 = vmatmul.msk.f32.gmra.mxu2 %vm80_vm1, %v4995_v2 }
 0x18d   :  { %4099 = vmatmul.msk.f32.gmra.mxu3 %vm80_vm1, %v5006_v19 }
 0x193   :  { %4080 = vmatmul.msk.f32.gmra.mxu1 %vm80_vm1, %v4995_v2 }
 0x194   :  { %4090 = vmatmul.msk.f32.gmra.mxu2 %vm80_vm1, %v5006_v19 }
 0x195   :  { %4100 = vmatmul.msk.f32.gmra.mxu3 %vm80_vm1, %v4992_v63 }
 0x19b   :  { %4081 = vmatmul.msk.f32.gmra.mxu1 %vm80_vm1, %v5006_v19 }
 0x19c   :  { %4091 = vmatmul.msk.f32.gmra.mxu2 %vm80_vm1, %v4992_v63 }
 0x19e   :  { %v5212_v57 = vpop.f32.mrf.mxu3 }
 0x19f   :  { %v253_v58 = vpop.f32.mrf.mxu2 }
 0x1a0   :  { %v391_v46 = vadd.f32 %v4455_v33, %v253_v58 }
 0x1a1   :  { %v247_v59 = vpop.f32.mrf.mxu0 }
 0x1a2   :  { %v389_v34 = vadd.f32 %v4455_v33, %v247_v59 }
 0x1a3   :  { %4082 = vmatmul.msk.f32.gmra.mxu1 %vm80_vm1, %v4992_v63 }
 0x1a7   :  { %v5216_v60 = vpop.f32.mrf.mxu2 }
 0x1a8   :  { %v5218_v61 = vpop.f32.mrf.mxu3  ;;  %v250_v62 = vpop.f32.mrf.mxu1  ;;  %v392_v59 = vadd.f32 %v4455_v33, %v5216_v60 }
 0x1a9   :  { %v430_v0 = vpop.f32.mrf.mxu0  ;;  %v390_v39 = vadd.f32 %v4455_v33, %v250_v62  ;;  %v4462_v62 = vld [vmem:[%s6816_s7 + $0x2] ss:$0 sm:$0xff] }
 0x1aa   :  { %v572_v30 = vadd.f32 %v4457_v17, %v430_v0 }
 0x1af   :  { %v5220_v1 = vpop.f32.mrf.mxu2 }
 0x1b0   :  { %v5222_v2 = vpop.f32.mrf.mxu3  ;;  %v5224_v31 = vpop.f32.mrf.mxu1 }
 0x1b1   :  { %v433_v32 = vpop.f32.mrf.mxu0 }
 0x1b2   :  { %v573_v25 = vadd.f32 %v4457_v17, %v433_v32 }
 0x1b7   :  { %v5226_v4 = vpop.f32.mrf.mxu2 }
 0x1b8   :  { %v5228_v6 = vpop.f32.mrf.mxu3  ;;  %v5230_v7 = vpop.f32.mrf.mxu1 }
 0x1b9   :  { %v436_v63 = vpop.f32.mrf.mxu0 }
 0x1ba   :  { %v574_v24 = vadd.f32 %v4457_v17, %v436_v63  ;;  %v4463_v63 = vld [vmem:[%s6816_s7 + $0x1] ss:$0 sm:$0xff] }
 0x1bf   :  { %v5232_v8 = vpop.f32.mrf.mxu2 }
 0x1c0   :  { %v5234_v9 = vpop.f32.mrf.mxu3  ;;  %v5236_v10 = vpop.f32.mrf.mxu1 }
 0x1c1   :  { %v439_v11 = vpop.f32.mrf.mxu0 }
 0x1c2   :  { %v575_v21 = vadd.f32 %v4457_v17, %v439_v11 }
 0x1c7   :  { %v5238_v12 = vpop.f32.mrf.mxu2 }
 0x1c8   :  { %v5240_v13 = vpop.f32.mrf.mxu3  ;;  %v5245_v18 = vpop.f32.mrf.mxu1 }
 0x1c9   :  { %v442_v19 = vpop.f32.mrf.mxu0 }
 0x1ca   :  { %v576_v20 = vadd.f32 %v4457_v17, %v442_v19 }
 0x1cc   :  { %4101 = vmatpush.xpose.msk.msrb.mxu0 %vm775_vm4, %v576_v20 }
 0x1cf   :  { %v5248_v44 = vpop.f32.mrf.mxu2 }
 0x1d0   :  { %v5250_v43 = vpop.f32.mrf.mxu3  ;;  %4102 = vmatpush.xpose.msk.msrb.mxu0 %vm775_vm4, %v575_v21  ;;  %v5253_v22 = vpop.f32.mrf.mxu1 }
 0x1d1   :  { %v613_v23 = vpop.f32.mrf.mxu0 }
 0x1d4   :  { %4103 = vmatpush.xpose.msk.msrb.mxu0 %vm775_vm4, %v574_v24  ;;  %v755_v24 = vadd.f32 %v4461_v51, %v613_v23  ;;  %v5302_v23 = vld [vmem:[%s6815_s5 + $0x3] ss:$0 sm:$0xff] }
 0x1d7   :  { %v5256_v27 = vpop.f32.mrf.mxu2 }
 0x1d8   :  { %v544_v28 = vpop.f32.mrf.mxu3  ;;  %4104 = vmatpush.xpose.msk.msrb.mxu0 %vm775_vm4, %v573_v25  ;;  %v5259_v29 = vpop.f32.mrf.mxu1 }
 0x1d9   :  { %v616_v47 = vpop.f32.mrf.mxu0 }
 0x1da   :  { %v756_v19 = vadd.f32 %v4461_v51, %v616_v47 }
 0x1dc   :  { %4105 = vmatpush.xpose.msk.msrb.mxu0 %vm775_vm4, %v572_v30  ;;  %v588_v30 = vadd.f32 %v4460_v48, %v544_v28 }
 0x1df   :  { %v5265_v35 = vpop.f32.mrf.mxu2  ;;  %4106 = vmatmul.msk.f32.vlgmr.msrb.gmra.mxu0 %vm775_vm4, %v389_v34  ;;  %v393_v34 = vadd.f32 %v4455_v33, %v5212_v57  ;;  %v587_v57 = vadd.f32 %v4460_v48, %v5250_v43  ;;  %v5321_v43 = vld [vmem:[%s6815_s5 + $0x2] ss:$0 sm:$0xff] }
 0x1e0   :  { %v547_v36 = vpop.f32.mrf.mxu3  ;;  %v5268_v37 = vpop.f32.mrf.mxu1 }
 0x1e1   :  { %v619_v38 = vpop.f32.mrf.mxu0  ;;  %v589_v60 = vadd.f32 %v4460_v48, %v547_v36 }
 0x1e2   :  { %v757_v0 = vadd.f32 %v4461_v51, %v619_v38 }
 0x1e7   :  { %v510_v40 = vpop.f32.mrf.mxu2  ;;  %4107 = vmatmul.msk.f32.gmra.mxu0 %vm775_vm4, %v390_v39 }
 0x1e8   :  { %v550_v41 = vpop.f32.mrf.mxu3  ;;  %v473_v42 = vpop.f32.mrf.mxu1  ;;  %v584_v36 = vadd.f32 %v4462_v62, %v510_v40  ;;  %v578_v40 = vadd.f32 %v4463_v63, %v5268_v37 }
 0x1e9   :  { %v622_v45 = vpop.f32.mrf.mxu0  ;;  %v590_v56 = vadd.f32 %v4460_v48, %v550_v41  ;;  %v579_v33 = vadd.f32 %v4463_v63, %v473_v42  ;;  %v404_v41 = vadd.f32 %v5302_v23, %v5218_v61 }
 0x1ea   :  { %v758_v58 = vadd.f32 %v4461_v51, %v622_v45  ;;  %v583_v45 = vadd.f32 %v4462_v62, %v5265_v35  ;;  %v5330_v35 = vld [vmem:[%s6815_s5 + $0x1] ss:$0 sm:$0xff] }
 0x1ef   :  { %v513_v49 = vpop.f32.mrf.mxu2  ;;  %4108 = vmatmul.msk.f32.gmra.mxu0 %vm775_vm4, %v391_v46  ;;  %v582_v46 = vadd.f32 %v4462_v62, %v5256_v27  ;;  %v394_v27 = vadd.f32 %v5330_v35, %v5224_v31  ;;  %v4464_v31 = vld [vmem:[%s6818_s9 + $0x3] ss:$0 sm:$0xff] }
 0x1f0   :  { %v553_v50 = vpop.f32.mrf.mxu3  ;;  %v476_v53 = vpop.f32.mrf.mxu1  ;;  %v585_v25 = vadd.f32 %v4462_v62, %v513_v49  ;;  %v399_v49 = vadd.f32 %v5321_v43, %v5220_v1  ;;  %v400_v1 = vadd.f32 %v5321_v43, %v5226_v4 }
 0x1f1   :  { %v591_v52 = vadd.f32 %v4460_v48, %v553_v50  ;;  %v625_v54 = vpop.f32.mrf.mxu0  ;;  %v580_v38 = vadd.f32 %v4463_v63, %v476_v53  ;;  %v577_v48 = vadd.f32 %v4463_v63, %v5259_v29  ;;  %v405_v50 = vadd.f32 %v5302_v23, %v5222_v2 }
 0x1f2   :  { %v759_v55 = vadd.f32 %v4461_v51, %v625_v54  ;;  %v406_v2 = vadd.f32 %v5302_v23, %v5228_v6  ;;  %v395_v53 = vadd.f32 %v5330_v35, %v5230_v7  ;;  %v401_v6 = vadd.f32 %v5321_v43, %v5232_v8 }
 0x1f3   :  { %4131 = vmatpush.xpose.msk.msra.mxu3 %vm775_vm4, %v591_v52  ;;  %v407_v7 = vadd.f32 %v5302_v23, %v5234_v9  ;;  %v4466_v9 = vld [vmem:[%s6818_s9 + $0x1] ss:$0 sm:$0xff] }
 0x1f4   :  { %4141 = vmatpush.msk.msra.mxu0 %vm1301_vm5, %v759_v55 }
 0x1f6   :  { %1317 = vmatpush.msra.mxu0 %v758_v58 }
 0x1f7   :  { %4132 = vmatpush.xpose.msk.msra.mxu3 %vm775_vm4, %v590_v56  ;;  %v516_v32 = vpop.f32.mrf.mxu2  ;;  %4109 = vmatmul.msk.f32.gmra.mxu0 %vm775_vm4, %v392_v59  ;;  %v396_v59 = vadd.f32 %v5330_v35, %v5236_v10 }
 0x1f8   :  { %v586_v11 = vadd.f32 %v4462_v62, %v516_v32  ;;  %v5288_v17 = vpop.f32.mrf.mxu3  ;;  %1318 = vmatpush.msra.mxu0 %v757_v0  ;;  %v479_v20 = vpop.f32.mrf.mxu1  ;;  %v4465_v0 = vld [vmem:[%s6818_s9 + $0x2] ss:$0 sm:$0xff] }
 0x1f9   :  { %v581_v21 = vadd.f32 %v4463_v63, %v479_v20  ;;  %v770_v63 = vadd.f32 %v4464_v31, %v5288_v17  ;;  %v402_v20 = vadd.f32 %v5321_v43, %v5238_v12  ;;  %v397_v17 = vadd.f32 %v5330_v35, %v5245_v18 }
 0x1fa   :  { %4121 = vmatpush.xpose.msk.msra.mxu2 %vm775_vm4, %v586_v11  ;;  %1319 = vmatpush.msra.mxu0 %v756_v19  ;;  %v403_v18 = vadd.f32 %v5321_v43, %v5248_v44 }
 0x1fb   :  { %4133 = vmatpush.xpose.msk.msra.mxu3 %vm775_vm4, %v589_v60  ;;  %4111 = vmatpush.xpose.msk.msra.mxu1 %vm775_vm4, %v581_v21  ;;  %v408_v21 = vadd.f32 %v5302_v23, %v5240_v13  ;;  %v398_v23 = vadd.f32 %v5330_v35, %v5253_v22  ;;  %v75_v22 = vld [vmem:[%s6819_s2 + $0x8] sm:$0xff] }
 0x1fc   :  { %1320 = vmatpush.msra.mxu0 %v755_v24 }
 0x1fe   :  { %4122 = vmatpush.xpose.msk.msra.mxu2 %vm775_vm4, %v585_v25 }
 0x1ff   :  { %4134 = vmatpush.xpose.msk.msra.mxu3 %vm775_vm4, %v588_v30  ;;  %v5297_v47 = vpop.f32.mrf.mxu2  ;;  %4110 = vmatmul.msk.f32.gmra.mxu0 %vm775_vm4, %v393_v34 }
 0x200   :  { %v727_v39 = vpop.f32.mrf.mxu3  ;;  %4112 = vmatpush.xpose.msk.msra.mxu1 %vm775_vm4, %v580_v38  ;;  %v5307_v28 = vpop.f32.mrf.mxu1  ;;  %v765_v34 = vadd.f32 %v4465_v0, %v5297_v47  ;;  %v74_v47 = vld [vmem:[%s6819_s2] sm:$0xff] }
 0x201   :  { %v771_v8 = vadd.f32 %v4464_v31, %v727_v39  ;;  %v760_v38 = vadd.f32 %v4466_v9, %v5307_v28 }
 0x202   :  { %4123 = vmatpush.xpose.msk.msra.mxu2 %vm775_vm4, %v584_v36 }
 0x203   :  { %4135 = vmatpush.xpose.msk.msra.mxu3 %vm775_vm4, %v587_v57 }
 0x204   :  { %4113 = vmatpush.xpose.msk.msra.mxu1 %vm775_vm4, %v579_v33 }
 0x206   :  { %4136 = vmatmul.msk.f32.vlgmr.msra.gmra.mxu3 %vm775_vm4, %v404_v41  ;;  %4124 = vmatpush.xpose.msk.msra.mxu2 %vm775_vm4, %v583_v45 }
 0x207   :  { %v5323_v42 = vpop.f32.mrf.mxu2 }
 0x208   :  { %v730_v61 = vpop.f32.mrf.mxu3  ;;  %4114 = vmatpush.xpose.msk.msra.mxu1 %vm775_vm4, %v578_v40  ;;  %v653_v37 = vpop.f32.mrf.mxu1  ;;  %v766_v12 = vadd.f32 %v4465_v0, %v5323_v42 }
 0x209   :  { %v772_v62 = vadd.f32 %v4464_v31, %v730_v61  ;;  %v761_v13 = vadd.f32 %v4466_v9, %v653_v37 }
 0x20a   :  { %4125 = vmatpush.xpose.msk.msra.mxu2 %vm775_vm4, %v582_v46 }
 0x20c   :  { %4115 = vmatpush.xpose.msk.msra.mxu1 %vm775_vm4, %v577_v48 }
 0x20d   :  { %4126 = vmatmul.msk.f32.vlgmr.msra.gmra.mxu2 %vm775_vm4, %v399_v49 }
 0x20e   :  { %4137 = vmatmul.msk.f32.gmra.mxu3 %vm775_vm4, %v405_v50 }
 0x20f   :  { %v693_v51 = vpop.f32.mrf.mxu2  ;;  %4116 = vmatmul.msk.f32.vlgmr.msra.gmra.mxu1 %vm775_vm4, %v394_v27 }
 0x210   :  { %v733_v29 = vpop.f32.mrf.mxu3  ;;  %v656_v52 = vpop.f32.mrf.mxu1  ;;  %v767_v25 = vadd.f32 %v4465_v0, %v693_v51 }
 0x211   :  { %v773_v58 = vadd.f32 %v4464_v31, %v733_v29  ;;  %v762_v30 = vadd.f32 %v4466_v9, %v656_v52 }
 0x215   :  { %4127 = vmatmul.msk.f32.gmra.mxu2 %vm775_vm4, %v400_v1 }
 0x216   :  { %4138 = vmatmul.msk.f32.gmra.mxu3 %vm775_vm4, %v406_v2 }
 0x217   :  { %v696_v54 = vpop.f32.mrf.mxu2  ;;  %4117 = vmatmul.msk.f32.gmra.mxu1 %vm775_vm4, %v395_v53 }
 0x218   :  { %v736_v55 = vpop.f32.mrf.mxu3  ;;  %v659_v4 = vpop.f32.mrf.mxu1  ;;  %v768_v19 = vadd.f32 %v4465_v0, %v696_v54 }
 0x219   :  { %v774_v56 = vadd.f32 %v4464_v31, %v736_v55  ;;  %v763_v24 = vadd.f32 %v4466_v9, %v659_v4 }
 0x21b   :  { %4159 = vmatpush.msk.msrb.mxu3 %vm1301_vm5, %v774_v56 }
 0x21d   :  { %1467 = vmatpush.msrb.mxu3 %v773_v58  ;;  %4128 = vmatmul.msk.f32.gmra.mxu2 %vm775_vm4, %v401_v6  ;;  %v76_v58 = vld [vmem:[%s6819_s2 + $0x10] sm:$0xff] }
 0x21e   :  { %4139 = vmatmul.msk.f32.gmra.mxu3 %vm775_vm4, %v407_v7 }
 0x21f   :  { %1468 = vmatpush.msrb.mxu3 %v772_v62  ;;  %v699_v32 = vpop.f32.mrf.mxu2  ;;  %4118 = vmatmul.msk.f32.gmra.mxu1 %vm775_vm4, %v396_v59 }
 0x220   :  { %v769_v10 = vadd.f32 %v4465_v0, %v699_v32  ;;  %v662_v11 = vpop.f32.mrf.mxu1 }
 0x221   :  { %1469 = vmatpush.msrb.mxu3 %v771_v8  ;;  %v764_v60 = vadd.f32 %v4466_v9, %v662_v11 }
 0x222   :  { %4153 = vmatpush.msk.msrb.mxu2 %vm1301_vm5, %v769_v10 }
 0x223   :  { %1470 = vmatpush.msrb.mxu3 %v770_v63  ;;  %4147 = vmatpush.msk.msrb.mxu1 %vm1301_vm5, %v764_v60 }
 0x224   :  { %1417 = vmatpush.msrb.mxu2 %v768_v19 }
 0x225   :  { %4129 = vmatmul.msk.f32.gmra.mxu2 %vm775_vm4, %v402_v20  ;;  %1367 = vmatpush.msrb.mxu1 %v763_v24 }
 0x226   :  { %4140 = vmatmul.msk.f32.gmra.mxu3 %vm775_vm4, %v408_v21  ;;  %1418 = vmatpush.msrb.mxu2 %v767_v25 }
 0x227   :  { %4119 = vmatmul.msk.f32.gmra.mxu1 %vm775_vm4, %v397_v17 }
 0x228   :  { %1368 = vmatpush.msrb.mxu1 %v762_v30  ;;  %1419 = vmatpush.msrb.mxu2 %v766_v12 }
 0x22a   :  { %1369 = vmatpush.msrb.mxu1 %v761_v13  ;;  %1420 = vmatpush.msrb.mxu2 %v765_v34 }
 0x22c   :  { %1370 = vmatpush.msrb.mxu1 %v760_v38  ;;  %v77_v38 = vld [vmem:[%s6819_s2 + $0x18] sm:$0xff] }
 0x22d   :  { %4130 = vmatmul.msk.f32.gmra.mxu2 %vm775_vm4, %v403_v18 }
 0x22f   :  { %4120 = vmatmul.msk.f32.gmra.mxu1 %vm775_vm4, %v398_v23 }
 0x25c   :  { %v823_v36 = vpop.f32.mrf.mxu0 }
 0x25d   :  { %v1024_v39 = vmul.f32 0.35355338, %v823_v36 }
 0x25f   :  { %v5396_v57 = vadd.f32 %v1024_v39, %v74_v47 }
 0x261   :  { %v1065_v44 = vsel %vm1064_vm6, %v5396_v57, -inf }
 0x262   :  { %1066 = vmax.xlane.f32.xlu0 %v1065_v44 }
 0x264   :  { %v826_v28 = vpop.f32.mrf.mxu0 }
 0x265   :  { %v1025_v33 = vmul.f32 0.35355338, %v826_v28 }
 0x267   :  { %v5403_v41 = vadd.f32 %v1025_v33, %v75_v22 }
 0x269   :  { %v1068_v45 = vsel %vm1064_vm6, %v5403_v41, -inf }
 0x26a   :  { %1069 = vmax.xlane.f32.xlu1 %v1068_v45 }
 0x26c   :  { %v829_v51 = vpop.f32.mrf.mxu0 }
 0x26d   :  { %v1026_v53 = vmul.f32 0.35355338, %v829_v51 }
 0x26f   :  { %v5430_v0 = vadd.f32 %v1026_v53, %v76_v58 }
 0x271   :  { %v1071_v10 = vsel %vm1064_vm6, %v5430_v0, -inf }
 0x274   :  { %v832_v17 = vpop.f32.mrf.mxu0 }
 0x275   :  { %v1027_v23 = vmul.f32 0.35355338, %v832_v17 }
 0x289   :  { %v1009_v40 = vpop.f32.mrf.mxu3 }
 0x28a   :  { %v1039_v35 = vmul.f32 0.35355338, %v1009_v40 }
 0x28c   :  { %v885_v43 = vpop.f32.mrf.mxu1  ;;  %v5415_v1 = vadd.f32 %v1039_v35, %v74_v47 }
 0x28d   :  { %v1029_v42 = vmul.f32 0.35355338, %v885_v43  ;;  %v835_v43 = vpop.f32.mrf.mxu0 }
 0x28e   :  { %v1111_v4 = vsel %vm1064_vm6, %v5415_v1, -inf }
 0x28f   :  { %v5407_v46 = vadd.f32 %v1029_v42, %v74_v47 }
 0x290   :  { %v947_v61 = vpop.f32.mrf.mxu2 }
 0x291   :  { %v1034_v37 = vmul.f32 0.35355338, %v947_v61  ;;  %v1012_v48 = vpop.f32.mrf.mxu3  ;;  %v1081_v49 = vsel %vm1064_vm6, %v5407_v46, -inf  ;;  %v78_v61 = vld [vmem:[%s6819_s2 + $0x20] sm:$0x3] }
 0x292   :  { %1082 = vmax.xlane.f32.xlu2 %v1081_v49  ;;  %v1040_v54 = vmul.f32 0.35355338, %v1012_v48  ;;  %v1028_v48 = vmul.f32 0.35355338, %v835_v43 }
 0x293   :  { %v5411_v50 = vadd.f32 %v1034_v37, %v74_v47 }
 0x294   :  { %v888_v27 = vpop.f32.mrf.mxu1  ;;  %v5432_v8 = vadd.f32 %v1040_v54, %v75_v22 }
 0x295   :  { %v1030_v29 = vmul.f32 0.35355338, %v888_v27  ;;  %v1096_v52 = vsel %vm1064_vm6, %v5411_v50, -inf }
 0x296   :  { %1097 = vmax.xlane.f32.xlu1 %v1096_v52  ;;  %v1114_v63 = vsel %vm1064_vm6, %v5432_v8, -inf }
 0x297   :  { %v5417_v2 = vadd.f32 %v1030_v29, %v75_v22 }
 0x298   :  { %v950_v31 = vpop.f32.mrf.mxu2 }
 0x299   :  { %v1035_v55 = vmul.f32 0.35355338, %v950_v31  ;;  %v1084_v56 = vsel %vm1064_vm6, %v5417_v2, -inf  ;;  %v1015_v6 = vpop.f32.mrf.mxu3  ;;  %v5476_v31 = vadd.f32 %v1028_v48, %v78_v61 }
 0x29a   :  { %1085 = vmax.xlane.f32.xlu0 %v1084_v56  ;;  %1112 = vmax.xlane.f32.xlu2 %v1111_v4  ;;  %v1041_v59 = vmul.f32 0.35355338, %v1015_v6 }
 0x29b   :  { %v5426_v7 = vadd.f32 %v1035_v55, %v75_v22  ;;  %v5459_v22 = vadd.f32 %v1027_v23, %v77_v38  ;;  %v1078_v55 = vsel %vm1077_vm7, %v5476_v31, -inf }
 0x29c   :  { %v5438_v11 = vadd.f32 %v1041_v59, %v76_v58  ;;  %v891_v19 = vpop.f32.mrf.mxu1 }
 0x29d   :  { %v1099_v62 = vsel %vm1064_vm6, %v5426_v7, -inf  ;;  %v1031_v60 = vmul.f32 0.35355338, %v891_v19  ;;  %v1074_v37 = vsel %vm1064_vm6, %v5459_v22, -inf }
 0x29e   :  { %1100 = vmax.xlane.f32.xlu1 %v1099_v62  ;;  %v1117_v20 = vsel %vm1064_vm6, %v5438_v11, -inf }
 0x29f   :  { %v5446_v34 = vadd.f32 %v1031_v60, %v76_v58 }
 0x2a0   :  { %v953_v32 = vpop.f32.mrf.mxu2 }
 0x2a1   :  { %v1036_v9 = vmul.f32 0.35355338, %v953_v32  ;;  %v1018_v24 = vpop.f32.mrf.mxu3  ;;  %v1087_v39 = vsel %vm1064_vm6, %v5446_v34, -inf }
 0x2a2   :  { %1072 = vmax.xlane.f32.xlu2 %v1071_v10  ;;  %1115 = vmax.xlane.f32.xlu0 %v1114_v63  ;;  %v1042_v30 = vmul.f32 0.35355338, %v1018_v24 }
 0x2a3   :  { %v5442_v21 = vadd.f32 %v1036_v9, %v76_v58 }
 0x2a4   :  { %v894_v36 = vpop.f32.mrf.mxu1  ;;  %v5457_v44 = vadd.f32 %v1042_v30, %v77_v38 }
 0x2a5   :  { %v1102_v13 = vsel %vm1064_vm6, %v5442_v21, -inf  ;;  %v1032_v33 = vmul.f32 0.35355338, %v894_v36 }
 0x2a6   :  { %1118 = vmax.xlane.f32.xlu1 %v1117_v20  ;;  %v1120_v40 = vsel %vm1064_vm6, %v5457_v44, -inf }
 0x2a7   :  { %v5472_v51 = vadd.f32 %v1032_v33, %v77_v38 }
 0x2a8   :  { %v956_v25 = vpop.f32.mrf.mxu2 }
 0x2a9   :  { %v1037_v12 = vmul.f32 0.35355338, %v956_v25  ;;  %v1021_v42 = vpop.f32.mrf.mxu3  ;;  %v1090_v53 = vsel %vm1064_vm6, %v5472_v51, -inf }
 0x2aa   :  { %1103 = vmax.xlane.f32.xlu2 %v1102_v13  ;;  %v1043_v49 = vmul.f32 0.35355338, %v1021_v42 }
 0x2ab   :  { %v5451_v18 = vadd.f32 %v1037_v12, %v77_v38 }
 0x2ac   :  { %v897_v29 = vpop.f32.mrf.mxu1  ;;  %v5478_v54 = vadd.f32 %v1043_v49, %v78_v61 }
 0x2ad   :  { %v1105_v47 = vsel %vm1064_vm6, %v5451_v18, -inf  ;;  %v1033_v52 = vmul.f32 0.35355338, %v897_v29 }
 0x2ae   :  { %1106 = vmax.xlane.f32.xlu0 %v1105_v47  ;;  %1088 = vmax.xlane.f32.xlu1 %v1087_v39  ;;  %v1123_v56 = vsel %vm1077_vm7, %v5478_v54, -inf }
 0x2af   :  { %v5484_v4 = vadd.f32 %v1033_v52, %v78_v61 }
 0x2b0   :  { %v959_v28 = vpop.f32.mrf.mxu2 }
 0x2b1   :  { %v1038_v45 = vmul.f32 0.35355338, %v959_v28  ;;  %v1093_v6 = vsel %vm1077_vm7, %v5484_v4, -inf }
 0x2b2   :  { %1121 = vmax.xlane.f32.xlu2 %v1120_v40 }
 0x2b3   :  { %v5466_v35 = vadd.f32 %v1038_v45, %v78_v61 }
 0x2b5   :  { %v1108_v27 = vsel %vm1077_vm7, %v5466_v35, -inf }
 0x2b6   :  { %1075 = vmax.xlane.f32.xlu0 %v1074_v37  ;;  %1109 = vmax.xlane.f32.xlu1 %v1108_v27 }
 0x2ba   :  { %1091 = vmax.xlane.f32.xlu2 %v1090_v53 }
 0x2be   :  { %1079 = vmax.xlane.f32.xlu1 %v1078_v55  ;;  %1124 = vmax.xlane.f32.xlu0 %v1123_v56 }
 0x2c2   :  { %1094 = vmax.xlane.f32.xlu2 %v1093_v6 }
 0x2d5   :  { %v1067_v58 = vpop.xlane.xlu0 %1066 }
 0x2d6   :  { %v1126_v59 = vsub.f32 %v5396_v57, %v1067_v58 }
 0x2d8   :  { %v1146_v62 = vmul.f32 1.442695, %v1126_v59 }
 0x2da   :  { %4498 = vpow2.f32 %v1146_v62 }
 0x2dd   :  { %v1070_v32 = vpop.xlane.xlu1 %1069 }
 0x2de   :  { %v1127_v9 = vsub.f32 %v5403_v41, %v1070_v32 }
 0x2e0   :  { %v5490_v10 = vpop.eup %4498  ;;  %v1148_v63 = vmul.f32 1.442695, %v1127_v9 }
 0x2e1   :  { %v1186_v19 = vsel %vm1064_vm6, %v5490_v10, 0.0 }
 0x2e2   :  { %4500 = vpow2.f32 %v1148_v63  ;;  %1187 = vadd.xlane.f32.xlu2 %v1186_v19 }
 0x2e8   :  { %v5494_v60 = vpop.eup %4500 }
 0x2e9   :  { %v1189_v20 = vsel %vm1064_vm6, %v5494_v60, 0.0 }
 0x2ea   :  { %1190 = vadd.xlane.f32.xlu0 %v1189_v20 }
 0x305   :  { %v1083_v57 = vpop.xlane.xlu2 %1082 }
 0x306   :  { %v1131_v24 = vsub.f32 %v5407_v46, %v1083_v57 }
 0x308   :  { %v1156_v17 = vmul.f32 1.442695, %v1131_v24 }
 0x309   :  { %v1098_v25 = vpop.xlane.xlu1 %1097 }
 0x30a   :  { %4502 = vpow2.f32 %v1156_v17  ;;  %v1136_v41 = vsub.f32 %v5411_v50, %v1098_v25 }
 0x30c   :  { %v1166_v30 = vmul.f32 1.442695, %v1136_v41 }
 0x30d   :  { %v1086_v12 = vpop.xlane.xlu0 %1085  ;;  %v1113_v13 = vpop.xlane.xlu2 %1112 }
 0x30e   :  { %4504 = vpow2.f32 %v1166_v30  ;;  %v1132_v38 = vsub.f32 %v5417_v2, %v1086_v12  ;;  %v1141_v23 = vsub.f32 %v5415_v1, %v1113_v13 }
 0x310   :  { %v5502_v36 = vpop.eup %4502  ;;  %v1158_v47 = vmul.f32 1.442695, %v1132_v38  ;;  %v1176_v39 = vmul.f32 1.442695, %v1141_v23 }
 0x311   :  { %v1101_v28 = vpop.xlane.xlu1 %1100  ;;  %v1201_v46 = vsel %vm1064_vm6, %v5502_v36, 0.0 }
 0x312   :  { %4506 = vpow2.f32 %v1158_v47  ;;  %v1137_v33 = vsub.f32 %v5426_v7, %v1101_v28  ;;  %1202 = vadd.xlane.f32.xlu1 %v1201_v46 }
 0x313   :  { %4508 = vpow2.f32 %v1176_v39 }
 0x314   :  { %v5507_v50 = vpop.eup %4504  ;;  %v1168_v45 = vmul.f32 1.442695, %v1137_v33 }
 0x315   :  { %v1073_v40 = vpop.xlane.xlu2 %1072  ;;  %v1116_v2 = vpop.xlane.xlu0 %1115  ;;  %v1216_v1 = vsel %vm1064_vm6, %v5507_v50, 0.0 }
 0x316   :  { %4510 = vpow2.f32 %v1168_v45  ;;  %v1142_v43 = vsub.f32 %v5432_v8, %v1116_v2  ;;  %1217 = vadd.xlane.f32.xlu0 %v1216_v1  ;;  %v1128_v56 = vsub.f32 %v5430_v0, %v1073_v40 }
 0x318   :  { %v5512_v42 = vpop.eup %4506  ;;  %v1178_v61 = vmul.f32 1.442695, %v1142_v43 }
 0x319   :  { %v5514_v37 = vpop.eup %4508  ;;  %v1119_v7 = vpop.xlane.xlu1 %1118  ;;  %v1204_v48 = vsel %vm1064_vm6, %v5512_v42, 0.0 }
 0x31a   :  { %v1143_v49 = vsub.f32 %v5438_v11, %v1119_v7  ;;  %v1231_v27 = vsel %vm1064_vm6, %v5514_v37, 0.0  ;;  %1205 = vadd.xlane.f32.xlu2 %v1204_v48  ;;  %4512 = vpow2.f32 %v1178_v61 }
 0x31b   :  { %1232 = vadd.xlane.f32.xlu1 %v1231_v27 }
 0x31c   :  { %v5521_v29 = vpop.eup %4510  ;;  %v1180_v8 = vmul.f32 1.442695, %v1143_v49 }
 0x31d   :  { %v1104_v52 = vpop.xlane.xlu2 %1103  ;;  %v1219_v53 = vsel %vm1064_vm6, %v5521_v29, 0.0 }
 0x31e   :  { %4514 = vpow2.f32 %v1180_v8  ;;  %v1138_v55 = vsub.f32 %v5442_v21, %v1104_v52  ;;  %1220 = vadd.xlane.f32.xlu0 %v1219_v53  ;;  %v1150_v21 = vmul.f32 1.442695, %v1128_v56 }
 0x320   :  { %v1170_v11 = vmul.f32 1.442695, %v1138_v55  ;;  %v5527_v6 = vpop.eup %4512 }
 0x321   :  { %v1107_v58 = vpop.xlane.xlu0 %1106  ;;  %v1089_v59 = vpop.xlane.xlu1 %1088  ;;  %v1234_v9 = vsel %vm1064_vm6, %v5527_v6, 0.0 }
 0x322   :  { %4516 = vpow2.f32 %v1170_v11  ;;  %v1139_v62 = vsub.f32 %v5451_v18, %v1107_v58  ;;  %v1133_v32 = vsub.f32 %v5446_v34, %v1089_v59  ;;  %1235 = vadd.xlane.f32.xlu2 %v1234_v9 }
 0x324   :  { %v5533_v63 = vpop.eup %4514  ;;  %v1172_v19 = vmul.f32 1.442695, %v1139_v62  ;;  %v1160_v20 = vmul.f32 1.442695, %v1133_v32 }
 0x325   :  { %v1122_v0 = vpop.xlane.xlu2 %1121  ;;  %v1237_v57 = vsel %vm1064_vm6, %v5533_v63, 0.0 }
 0x326   :  { %4518 = vpow2.f32 %v1172_v19  ;;  %1238 = vadd.xlane.f32.xlu0 %v1237_v57  ;;  %v1144_v34 = vsub.f32 %v5457_v44, %v1122_v0 }
 0x327   :  { %4520 = vpow2.f32 %v1160_v20 }
 0x328   :  { %v5537_v24 = vpop.eup %4516  ;;  %4522 = vpow2.f32 %v1150_v21  ;;  %v1182_v13 = vmul.f32 1.442695, %v1144_v34 }
 0x329   :  { %v1076_v18 = vpop.xlane.xlu0 %1075  ;;  %v1110_v17 = vpop.xlane.xlu1 %1109  ;;  %v1222_v25 = vsel %vm1064_vm6, %v5537_v24, 0.0 }
 0x32a   :  { %v1129_v41 = vsub.f32 %v5459_v22, %v1076_v18  ;;  %v1140_v30 = vsub.f32 %v5466_v35, %v1110_v17  ;;  %1223 = vadd.xlane.f32.xlu1 %v1222_v25 }
 0x32c   :  { %v5544_v12 = vpop.eup %4518  ;;  %v1152_v38 = vmul.f32 1.442695, %v1129_v41  ;;  %v1174_v23 = vmul.f32 1.442695, %v1140_v30 }
 0x32d   :  { %v5546_v47 = vpop.eup %4520  ;;  %v1092_v39 = vpop.xlane.xlu2 %1091  ;;  %v1225_v44 = vsel %vm1064_vm6, %v5544_v12, 0.0 }
 0x32e   :  { %v5550_v28 = vpop.eup %4522  ;;  %4524 = vpow2.f32 %v1152_v38  ;;  %1226 = vadd.xlane.f32.xlu2 %v1225_v44  ;;  %v1207_v22 = vsel %vm1064_vm6, %v5546_v47, 0.0  ;;  %v1134_v35 = vsub.f32 %v5472_v51, %v1092_v39 }
 0x32f   :  { %4526 = vpow2.f32 %v1174_v23  ;;  %1208 = vadd.xlane.f32.xlu0 %v1207_v22  ;;  %v1192_v45 = vsel %vm1064_vm6, %v5550_v28, 0.0 }
 0x330   :  { %4528 = vpow2.f32 %v1182_v13  ;;  %v1162_v43 = vmul.f32 1.442695, %v1134_v35 }
 0x331   :  { %v1080_v46 = vpop.xlane.xlu1 %1079  ;;  %v1125_v33 = vpop.xlane.xlu0 %1124 }
 0x332   :  { %v1130_v40 = vsub.f32 %v5476_v31, %v1080_v46  ;;  %v1145_v2 = vsub.f32 %v5478_v54, %v1125_v33  ;;  %1193 = vadd.xlane.f32.xlu1 %v1192_v45 }
 0x334   :  { %v5559_v1 = vpop.eup %4524  ;;  %v1154_v61 = vmul.f32 1.442695, %v1130_v40  ;;  %v1184_v7 = vmul.f32 1.442695, %v1145_v2 }
 0x335   :  { %v5561_v48 = vpop.eup %4526  ;;  %v1095_v49 = vpop.xlane.xlu2 %1094  ;;  %v1195_v51 = vsel %vm1064_vm6, %v5559_v1, 0.0 }
 0x336   :  { %v5565_v27 = vpop.eup %4528  ;;  %4530 = vpow2.f32 %v1154_v61  ;;  %1196 = vadd.xlane.f32.xlu2 %v1195_v51  ;;  %v1228_v31 = vsel %vm1077_vm7, %v5561_v48, 0.0  ;;  %v1135_v54 = vsub.f32 %v5484_v4, %v1095_v49 }
 0x337   :  { %4532 = vpow2.f32 %v1184_v7  ;;  %1229 = vadd.xlane.f32.xlu0 %v1228_v31  ;;  %v1240_v8 = vsel %vm1064_vm6, %v5565_v27, 0.0 }
 0x338   :  { %4534 = vpow2.f32 %v1162_v43  ;;  %v1164_v53 = vmul.f32 1.442695, %v1135_v54 }
 0x33a   :  { %1241 = vadd.xlane.f32.xlu1 %v1240_v8  ;;  %4536 = vpow2.f32 %v1164_v53 }
 0x33c   :  { %v5572_v52 = vpop.eup %4530 }
 0x33d   :  { %v5574_v55 = vpop.eup %4532  ;;  %v1198_v56 = vsel %vm1077_vm7, %v5572_v52, 0.0 }
 0x33e   :  { %v5578_v11 = vpop.eup %4534  ;;  %v1243_v58 = vsel %vm1077_vm7, %v5574_v55, 0.0 }
 0x33f   :  { %1199 = vadd.xlane.f32.xlu0 %v1198_v56  ;;  %1244 = vadd.xlane.f32.xlu2 %v1243_v58  ;;  %v1210_v4 = vsel %vm1064_vm6, %v5578_v11, 0.0 }
 0x340   :  { %v5584_v59 = vpop.eup %4536 }
 0x341   :  { %v1213_v62 = vsel %vm1077_vm7, %v5584_v59, 0.0 }
 0x342   :  { %1211 = vadd.xlane.f32.xlu1 %v1210_v4 }
 0x34a   :  { %1214 = vadd.xlane.f32.xlu1 %v1213_v62 }
 0x355   :  { %v1188_v32 = vpop.xlane.xlu2 %1187 }
 0x356   :  { %4538 = vrcp.f32 %v1188_v32 }
 0x35c   :  { %v4539_v9 = vpop.eup %4538 }
 0x35d   :  { %v1266_v21 = vmul.f32 %v4539_v9, %v5490_v10  ;;  %v1191_v19 = vpop.xlane.xlu0 %1190 }
 0x35e   :  { %4540 = vrcp.f32 %v1191_v19 }
 0x35f   :  { %4142 = vmatmul.msk.f32.vlgmr.msra.gmra.mxu0 %vm1064_vm6, %v1266_v21 }
 0x364   :  { %v4541_v20 = vpop.eup %4540 }
 0x365   :  { %v1267_v0 = vmul.f32 %v4541_v20, %v5494_v60 }
 0x367   :  { %4143 = vmatmul.msk.f32.gmra.mxu0 %vm1064_vm6, %v1267_v0 }
 0x385   :  { %v1203_v57 = vpop.xlane.xlu1 %1202 }
 0x386   :  { %4542 = vrcp.f32 %v1203_v57 }
 0x389   :  { %v1218_v34 = vpop.xlane.xlu0 %1217 }
 0x38a   :  { %4544 = vrcp.f32 %v1218_v34  ;;  %v4176_v34 = vld [vmem:[%s6820_s10 + $0x10] sm:$0xff] }
 0x38b   :  { %1630 = vmatpush.msra.mxu2 %v4176_v34 }
 0x38c   :  { %v4543_v18 = vpop.eup %4542 }
 0x38d   :  { %v1271_v17 = vmul.f32 %v4543_v18, %v5502_v36  ;;  %v1206_v25 = vpop.xlane.xlu2 %1205 }
 0x38e   :  { %v1233_v41 = vpop.xlane.xlu1 %1232  ;;  %4546 = vrcp.f32 %v1206_v25 }
 0x38f   :  { %4548 = vrcp.f32 %v1233_v41  ;;  %4148 = vmatmul.msk.f32.vlgmr.msrb.gmra.mxu1 %vm1064_vm6, %v1271_v17 }
 0x390   :  { %v4545_v10 = vpop.eup %4544 }
 0x391   :  { %v1276_v30 = vmul.f32 %v4545_v10, %v5507_v50  ;;  %v1221_v13 = vpop.xlane.xlu0 %1220 }
 0x392   :  { %4550 = vrcp.f32 %v1221_v13 }
 0x393   :  { %4154 = vmatmul.msk.f32.vlgmr.msrb.gmra.mxu2 %vm1064_vm6, %v1276_v30 }
 0x394   :  { %v4547_v60 = vpop.eup %4546 }
 0x395   :  { %v4549_v38 = vpop.eup %4548  ;;  %v1272_v23 = vmul.f32 %v4547_v60, %v5512_v42  ;;  %v1236_v36 = vpop.xlane.xlu2 %1235 }
 0x396   :  { %v1281_v39 = vmul.f32 %v4549_v38, %v5514_v37  ;;  %4552 = vrcp.f32 %v1236_v36 }
 0x397   :  { %4149 = vmatmul.msk.f32.gmra.mxu1 %vm1064_vm6, %v1272_v23 }
 0x398   :  { %v4551_v44 = vpop.eup %4550  ;;  %4160 = vmatmul.msk.f32.vlgmr.msrb.gmra.mxu3 %vm1064_vm6, %v1281_v39 }
 0x399   :  { %v1239_v22 = vpop.xlane.xlu0 %1238  ;;  %v1277_v50 = vmul.f32 %v4551_v44, %v5521_v29 }
 0x39a   :  { %4554 = vrcp.f32 %v1239_v22 }
 0x39b   :  { %4155 = vmatmul.msk.f32.gmra.mxu2 %vm1064_vm6, %v1277_v50 }
 0x39c   :  { %v4553_v35 = vpop.eup %4552 }
 0x39d   :  { %v1224_v46 = vpop.xlane.xlu1 %1223  ;;  %v1282_v42 = vmul.f32 %v4553_v35, %v5527_v6 }
 0x39e   :  { %4556 = vrcp.f32 %v1224_v46 }
 0x3a0   :  { %4161 = vmatmul.msk.f32.gmra.mxu3 %vm1064_vm6, %v1282_v42  ;;  %v4555_v45 = vpop.eup %4554 }
 0x3a1   :  { %v1227_v37 = vpop.xlane.xlu2 %1226  ;;  %v1283_v29 = vmul.f32 %v4555_v45, %v5533_v63 }
 0x3a2   :  { %v1209_v33 = vpop.xlane.xlu0 %1208 }
 0x3a3   :  { %4558 = vrcp.f32 %v1209_v33  ;;  %v4467_v33 = vld [vmem:[%s6821_s11] ss:$0 sm:$0xff] }
 0x3a4   :  { %v4557_v40 = vpop.eup %4556  ;;  %4560 = vrcp.f32 %v1227_v37 }
 0x3a5   :  { %v1194_v2 = vpop.xlane.xlu1 %1193  ;;  %v1278_v43 = vmul.f32 %v4557_v40, %v5537_v24 }
 0x3a6   :  { %4562 = vrcp.f32 %v1194_v2 }
 0x3a7   :  { %4156 = vmatmul.msk.f32.gmra.mxu2 %vm1064_vm6, %v1278_v43 }
 0x3a8   :  { %4162 = vmatmul.msk.f32.gmra.mxu3 %vm1064_vm6, %v1283_v29 }
 0x3a9   :  { %v4559_v61 = vpop.eup %4558  ;;  %v1197_v6 = vpop.xlane.xlu2 %1196 }
 0x3aa   :  { %v4561_v7 = vpop.eup %4560  ;;  %v1230_v49 = vpop.xlane.xlu0 %1229  ;;  %v1273_v51 = vmul.f32 %v4559_v61, %v5546_v47  ;;  %4564 = vrcp.f32 %v1197_v6 }
 0x3ab   :  { %4566 = vrcp.f32 %v1230_v49  ;;  %v1279_v63 = vmul.f32 %v4561_v7, %v5544_v12 }
 0x3ac   :  { %v4563_v31 = vpop.eup %4562  ;;  %4150 = vmatmul.msk.f32.gmra.mxu1 %vm1064_vm6, %v1273_v51 }
 0x3ad   :  { %v1242_v54 = vpop.xlane.xlu1 %1241  ;;  %v1268_v24 = vmul.f32 %v4563_v31, %v5550_v28 }
 0x3ae   :  { %4568 = vrcp.f32 %v1242_v54 }
 0x3af   :  { %4144 = vmatmul.msk.f32.gmra.mxu0 %vm1064_vm6, %v1268_v24  ;;  %4157 = vmatmul.msk.f32.gmra.mxu2 %vm1064_vm6, %v1279_v63 }
 0x3b0   :  { %v4565_v8 = vpop.eup %4564 }
 0x3b1   :  { %v4567_v53 = vpop.eup %4566  ;;  %v1269_v62 = vmul.f32 %v4565_v8, %v5559_v1  ;;  %v1488_v1 = vld [vmem:[%s6820_s10] sm:$0xff] }
 0x3b2   :  { %v1245_v56 = vpop.xlane.xlu2 %1244  ;;  %v1200_v58 = vpop.xlane.xlu0 %1199  ;;  %v1280_v32 = vmul.f32 %v4567_v53, %v5561_v48  ;;  %1519 = vmatpush.msrb.mxu0 %v1488_v1 }
 0x3b3   :  { %4570 = vrcp.f32 %v1200_v58 }
 0x3b4   :  { %v4569_v47 = vpop.eup %4568  ;;  %4572 = vrcp.f32 %v1245_v56 }
 0x3b5   :  { %v1212_v4 = vpop.xlane.xlu1 %1211  ;;  %v1284_v28 = vmul.f32 %v4569_v47, %v5565_v27 }
 0x3b6   :  { %4574 = vrcp.f32 %v1212_v4 }
 0x3b7   :  { %4145 = vmatmul.msk.f32.gmra.mxu0 %vm1064_vm6, %v1269_v62  ;;  %4158 = vmatmul.msk.f32.gmra.mxu2 %vm1064_vm6, %v1280_v32 }
 0x3b8   :  { %4163 = vmatmul.msk.f32.gmra.mxu3 %vm1064_vm6, %v1284_v28 }
 0x3b9   :  { %v4571_v12 = vpop.eup %4570 }
 0x3ba   :  { %v4573_v9 = vpop.eup %4572  ;;  %v1270_v20 = vmul.f32 %v4571_v12, %v5572_v52 }
 0x3bb   :  { %v1285_v48 = vmul.f32 %v4573_v9, %v5574_v55  ;;  %v4170_v55 = vld [vmem:[%s6820_s10 + $0x8] sm:$0xff] }
 0x3bc   :  { %v4575_v21 = vpop.eup %4574  ;;  %1576 = vmatpush.msra.mxu1 %v4170_v55 }
 0x3bd   :  { %v1215_v19 = vpop.xlane.xlu1 %1214  ;;  %v1274_v0 = vmul.f32 %v4575_v21, %v5578_v11 }
 0x3be   :  { %4576 = vrcp.f32 %v1215_v19 }
 0x3bf   :  { %4146 = vmatmul.msk.f32.gmra.mxu0 %vm1064_vm6, %v1270_v20  ;;  %4151 = vmatmul.msk.f32.gmra.mxu1 %vm1064_vm6, %v1274_v0 }
 0x3c0   :  { %4164 = vmatmul.msk.f32.gmra.mxu3 %vm1064_vm6, %v1285_v48 }
 0x3c4   :  { %v4577_v27 = vpop.eup %4576 }
 0x3c5   :  { %v1275_v57 = vmul.f32 %v4577_v27, %v5584_v59  ;;  %v4182_v59 = vld [vmem:[%s6820_s10 + $0x18] sm:$0xff] }
 0x3c6   :  { %1684 = vmatpush.msra.mxu3 %v4182_v59 }
 0x3c7   :  { %4152 = vmatmul.msk.f32.gmra.mxu1 %vm1064_vm6, %v1275_v57 }
 0x3dc   :  { %v1322_v52 = vpop.f32.mrf.mxu0 }
 0x3dd   :  { %4165 = vmatmul.msk.f32.vlgmr.msrb.gmra.mxu0 %vm775_vm4, %v1322_v52 }
 0x3e4   :  { %v1325_v11 = vpop.f32.mrf.mxu0 }
 0x3e5   :  { %4166 = vmatmul.msk.f32.gmra.mxu0 %vm775_vm4, %v1325_v11 }
 0x40c   :  { %v1372_v18 = vpop.f32.mrf.mxu1 }
 0x40d   :  { %4171 = vmatmul.msk.f32.vlgmr.msra.gmra.mxu1 %vm775_vm4, %v1372_v18 }
 0x414   :  { %v1375_v17 = vpop.f32.mrf.mxu1 }
 0x415   :  { %4172 = vmatmul.msk.f32.gmra.mxu1 %vm775_vm4, %v1375_v17 }
 0x416   :  { %v1422_v25 = vpop.f32.mrf.mxu2 }
 0x417   :  { %4177 = vmatmul.msk.f32.vlgmr.msra.gmra.mxu2 %vm775_vm4, %v1422_v25 }
 0x41b   :  { %v1472_v41 = vpop.f32.mrf.mxu3 }
 0x41c   :  { %4183 = vmatmul.msk.f32.vlgmr.msra.gmra.mxu3 %vm775_vm4, %v1472_v41 }
 0x41e   :  { %v1425_v10 = vpop.f32.mrf.mxu2 }
 0x41f   :  { %4178 = vmatmul.msk.f32.gmra.mxu2 %vm775_vm4, %v1425_v10 }
 0x423   :  { %v1475_v30 = vpop.f32.mrf.mxu3 }
 0x424   :  { %4184 = vmatmul.msk.f32.gmra.mxu3 %vm775_vm4, %v1475_v30 }
 0x429   :  { %v1378_v13 = vpop.f32.mrf.mxu1 }
 0x42a   :  { %4173 = vmatmul.msk.f32.gmra.mxu1 %vm775_vm4, %v1378_v13  ;;  %v1428_v60 = vpop.f32.mrf.mxu2 }
 0x42b   :  { %v1478_v38 = vpop.f32.mrf.mxu3  ;;  %4179 = vmatmul.msk.f32.gmra.mxu2 %vm775_vm4, %v1428_v60 }
 0x42c   :  { %4185 = vmatmul.msk.f32.gmra.mxu3 %vm775_vm4, %v1478_v38  ;;  %v1328_v23 = vpop.f32.mrf.mxu0 }
 0x42d   :  { %4167 = vmatmul.msk.f32.gmra.mxu0 %vm775_vm4, %v1328_v23 }
 0x432   :  { %v1431_v39 = vpop.f32.mrf.mxu2 }
 0x433   :  { %4180 = vmatmul.msk.f32.gmra.mxu2 %vm775_vm4, %v1431_v39 }
 0x434   :  { %v1331_v36 = vpop.f32.mrf.mxu0 }
 0x435   :  { %4168 = vmatmul.msk.f32.gmra.mxu0 %vm775_vm4, %v1331_v36 }
 0x43a   :  { %v1434_v44 = vpop.f32.mrf.mxu2 }
 0x43b   :  { %v1481_v22 = vpop.f32.mrf.mxu3  ;;  %4181 = vmatmul.msk.f32.gmra.mxu2 %vm775_vm4, %v1434_v44 }
 0x43c   :  { %4186 = vmatmul.msk.f32.gmra.mxu3 %vm775_vm4, %v1481_v22  ;;  %v1334_v50 = vpop.f32.mrf.mxu0  ;;  %v1381_v35 = vpop.f32.mrf.mxu1 }
 0x43d   :  { %4169 = vmatmul.msk.f32.gmra.mxu0 %vm775_vm4, %v1334_v50  ;;  %4174 = vmatmul.msk.f32.gmra.mxu1 %vm775_vm4, %v1381_v35 }
 0x443   :  { %v1484_v46 = vpop.f32.mrf.mxu3 }
 0x444   :  { %4187 = vmatmul.msk.f32.gmra.mxu3 %vm775_vm4, %v1484_v46  ;;  %v1384_v42 = vpop.f32.mrf.mxu1 }
 0x445   :  { %4175 = vmatmul.msk.f32.gmra.mxu1 %vm775_vm4, %v1384_v42 }
 0x45a   :  { %v1521_v37 = vpop.f32.mrf.mxu0 }
 0x45b   :  { %v1539_v40 = vadd.f32 %v4467_v33, %v1521_v37 }
 0x462   :  { %v1524_v61 = vpop.f32.mrf.mxu0 }
 0x463   :  { %v1540_v51 = vadd.f32 %v4467_v33, %v1524_v61 }
 0x48a   :  { %v1578_v45 = vpop.f32.mrf.mxu1 }
 0x48b   :  { %v1593_v43 = vadd.f32 %v1578_v45, %v1539_v40 }
 0x492   :  { %v1581_v49 = vpop.f32.mrf.mxu1 }
 0x493   :  { %v1594_v24 = vadd.f32 %v1581_v49, %v1540_v51 }
 0x49a   :  { %v1632_v2 = vpop.f32.mrf.mxu2 }
 0x49b   :  { %v1647_v29 = vadd.f32 %v1632_v2, %v1593_v43 }
 0x49f   :  { %v1686_v6 = vpop.f32.mrf.mxu3 }
 0x4a0   :  { %v1701_v7 = vadd.f32 %v1686_v6, %v1647_v29 }
 0x4a2   :  { %v5664_v31 = vadd.f32 %v1701_v7, %v4851_v15  ;;  %v1635_v54 = vpop.f32.mrf.mxu2 }
 0x4a3   :  { %v1648_v8 = vadd.f32 %v1635_v54, %v1594_v24  ;;  %v1836_v24 = vld [vmem:[%s6823_s12 + $0x18] sm:$0xff] }
 0x4a4   :  { %v1711_v63 = vsel %vm80_vm1, %v5664_v31, 0.0  ;;  %1868 = vmatpush.msra.mxu0 %v1836_v24 }
 0x4a5   :  { %1712 = vadd.xlane.f32.xlu2 %v1711_v63  ;;  %v1835_v63 = vld [vmem:[%s6823_s12 + $0x10] sm:$0xff] }
 0x4a6   :  { %1869 = vmatpush.msra.mxu0 %v1835_v63  ;;  %v1896_v63 = vld [vmem:[%s6824_s14 + $0x18] sm:$0xff] }
 0x4a7   :  { %v1689_v53 = vpop.f32.mrf.mxu3  ;;  %v1584_v62 = vpop.f32.mrf.mxu1 }
 0x4a8   :  { %v1702_v56 = vadd.f32 %v1689_v53, %v1648_v8  ;;  %v1834_v8 = vld [vmem:[%s6823_s12 + $0x8] sm:$0xff]  ;;  %v1833_v53 = vld [vmem:[%s6823_s12] sm:$0xff] }
 0x4a9   :  { %1870 = vmatpush.msra.mxu0 %v1834_v8 }
 0x4aa   :  { %v5669_v58 = vadd.f32 %v1702_v56, %v4849_v14  ;;  %v1527_v47 = vpop.f32.mrf.mxu0 }
 0x4ab   :  { %v1541_v4 = vadd.f32 %v4467_v33, %v1527_v47  ;;  %1871 = vmatpush.msra.mxu0 %v1833_v53 }
 0x4ac   :  { %v1714_v32 = vsel %vm80_vm1, %v5669_v58, 0.0 }
 0x4ad   :  { %1715 = vadd.xlane.f32.xlu0 %v1714_v32  ;;  %v1595_v15 = vadd.f32 %v1584_v62, %v1541_v4 }
 0x4ae   :  { %v1638_v28 = vpop.f32.mrf.mxu2 }
 0x4af   :  { %v1649_v12 = vadd.f32 %v1638_v28, %v1595_v15  ;;  %v1692_v9 = vpop.f32.mrf.mxu3 }
 0x4b1   :  { %v1703_v21 = vadd.f32 %v1692_v9, %v1649_v12 }
 0x4b2   :  { %v1530_v20 = vpop.f32.mrf.mxu0 }
 0x4b3   :  { %v5674_v19 = vadd.f32 %v1703_v21, %v4825_v5  ;;  %v1542_v0 = vadd.f32 %v4467_v33, %v1530_v20 }
 0x4b5   :  { %v1717_v14 = vsel %vm80_vm1, %v5674_v19, 0.0 }
 0x4b6   :  { %1718 = vadd.xlane.f32.xlu1 %v1717_v14  ;;  %v1641_v1 = vpop.f32.mrf.mxu2 }
 0x4ba   :  { %v1587_v48 = vpop.f32.mrf.mxu1  ;;  %v1533_v52 = vpop.f32.mrf.mxu0 }
 0x4bb   :  { %v1596_v27 = vadd.f32 %v1587_v48, %v1542_v0  ;;  %v1543_v34 = vadd.f32 %v4467_v33, %v1533_v52  ;;  %v4708_v52 = vld [vmem:[%s6814_s3] sm:$0xf] }
 0x4bd   :  { %v1650_v57 = vadd.f32 %v1641_v1, %v1596_v27 }
 0x4be   :  { %v1644_v17 = vpop.f32.mrf.mxu2 }
 0x4bf   :  { %v1695_v11 = vpop.f32.mrf.mxu3 }
 0x4c0   :  { %v1704_v55 = vadd.f32 %v1695_v11, %v1650_v57  ;;  %v5741_v11 = vperm.slane %v4708_v52, 2 }
 0x4c2   :  { %v5679_v59 = vadd.f32 %v1704_v55, %v4853_v16  ;;  %v1590_v18 = vpop.f32.mrf.mxu1 }
 0x4c3   :  { %v1597_v5 = vadd.f32 %v1590_v18, %v1543_v34  ;;  %v5743_v18 = vperm.slane %v4708_v52, 3  ;;  %v1894_v52 = vld [vmem:[%s6824_s14 + $0x8] sm:$0xff] }
 0x4c4   :  { %v1720_v25 = vsel %vm80_vm1, %v5679_v59, 0.0 }
 0x4c5   :  { %1721 = vadd.xlane.f32.xlu2 %v1720_v25  ;;  %v1651_v41 = vadd.f32 %v1644_v17, %v1597_v5 }
 0x4c7   :  { %v1698_v10 = vpop.f32.mrf.mxu3 }
 0x4c8   :  { %v1705_v30 = vadd.f32 %v1698_v10, %v1651_v41 }
 0x4ca   :  { %v5684_v13 = vadd.f32 %v1705_v30, %v4820_v3 }
 0x4cc   :  { %v1723_v60 = vsel %vm93_vm0, %v5684_v13, 0.0 }
 0x4cd   :  { %1724 = vadd.xlane.f32.xlu0 %v1723_v60 }
 0x518   :  { %v1713_v38 = vpop.xlane.xlu2 %1712 }
 0x519   :  { %v1726_v16 = vmul.f32 %v1713_v38, %v4861_v26 }
 0x51b   :  { %v5690_v23 = vsub.f32 %v5664_v31, %v1726_v16 }
 0x51d   :  { %v1736_v39 = vmul.f32 %v5690_v23, %v5690_v23 }
 0x51f   :  { %v1741_v36 = vsel %vm80_vm1, %v1736_v39, 0.0 }
 0x520   :  { %v1716_v44 = vpop.xlane.xlu0 %1715  ;;  %1742 = vadd.xlane.f32.xlu1 %v1741_v36 }
 0x521   :  { %v1727_v3 = vmul.f32 %v1716_v44, %v4861_v26 }
 0x523   :  { %v5697_v22 = vsub.f32 %v5669_v58, %v1727_v3 }
 0x525   :  { %v1737_v50 = vmul.f32 %v5697_v22, %v5697_v22 }
 0x527   :  { %v1744_v35 = vsel %vm80_vm1, %v1737_v50, 0.0 }
 0x528   :  { %1745 = vadd.xlane.f32.xlu2 %v1744_v35 }
 0x529   :  { %v1719_v46 = vpop.xlane.xlu1 %1718 }
 0x52a   :  { %v1728_v42 = vmul.f32 %v1719_v46, %v4861_v26 }
 0x52c   :  { %v5704_v37 = vsub.f32 %v5674_v19, %v1728_v42 }
 0x52e   :  { %v1738_v33 = vmul.f32 %v5704_v37, %v5704_v37 }
 0x530   :  { %v1747_v45 = vsel %vm80_vm1, %v1738_v33, 0.0 }
 0x531   :  { %1748 = vadd.xlane.f32.xlu0 %v1747_v45  ;;  %v1899_v45 = vld [vmem:[%s6824_s14 + $0x30] sm:$0xff] }
 0x538   :  { %v1722_v40 = vpop.xlane.xlu2 %1721 }
 0x539   :  { %v1729_v2 = vmul.f32 %v1722_v40, %v4861_v26 }
 0x53b   :  { %v5711_v43 = vsub.f32 %v5679_v59, %v1729_v2  ;;  %v1898_v2 = vld [vmem:[%s6824_s14 + $0x28] sm:$0xff] }
 0x53d   :  { %v1739_v29 = vmul.f32 %v5711_v43, %v5711_v43 }
 0x53f   :  { %v1750_v61 = vsel %vm80_vm1, %v1739_v29, 0.0 }
 0x540   :  { %1751 = vadd.xlane.f32.xlu1 %v1750_v61  ;;  %v1725_v6 = vpop.xlane.xlu0 %1724 }
 0x541   :  { %v1730_v7 = vmul.f32 %v1725_v6, %v4861_v26 }
 0x543   :  { %v5718_v49 = vsub.f32 %v5684_v13, %v1730_v7  ;;  %v1897_v7 = vld [vmem:[%s6824_s14 + $0x20] sm:$0xff] }
 0x545   :  { %v1740_v51 = vmul.f32 %v5718_v49, %v5718_v49 }
 0x547   :  { %v1753_v54 = vsel %vm93_vm0, %v1740_v51, 0.0 }
 0x548   :  { %1754 = vadd.xlane.f32.xlu2 %v1753_v54 }
 0x593   :  { %v1743_v56 = vpop.xlane.xlu1 %1742 }
 0x594   :  { %v1756_v47 = vmul.f32 %v1743_v56, %v4861_v26 }
 0x596   :  { %v1761_v4 = vadd.f32 1e-05, %v1756_v47 }
 0x598   :  { %4578 = vrsqrt.f32 %v1761_v4  ;;  %vm1772_vm9 = vweird.f32 %v1761_v4 }
 0x59b   :  { %v1746_v62 = vpop.xlane.xlu2 %1745 }
 0x59c   :  { %v1757_v32 = vmul.f32 %v1746_v62, %v4861_v26 }
 0x59e   :  { %v4579_v15 = vpop.eup %4578  ;;  %v1762_v28 = vadd.f32 1e-05, %v1757_v32 }
 0x59f   :  { %v1767_v12 = vmul.f32 %v4579_v15, %v1761_v4  ;;  %vm1773_vm8 = vweird.f32 %v4579_v15 }
 0x5a0   :  { %4580 = vrsqrt.f32 %v1762_v28  ;;  %vm1774_vm10 = vmor %vm1772_vm9, %vm1773_vm8  ;;  %vm1782_vm12 = vweird.f32 %v1762_v28 }
 0x5a1   :  { %v1768_v9 = vmul.f32 %v4579_v15, %v1767_v12 }
 0x5a3   :  { %v1769_v21 = vmul.f32 0.5, %v1768_v9 }
 0x5a4   :  { %v1749_v20 = vpop.xlane.xlu0 %1748 }
 0x5a5   :  { %v1770_v14 = vsub.f32 1.5, %v1769_v21  ;;  %v1758_v0 = vmul.f32 %v1749_v20, %v4861_v26 }
 0x5a6   :  { %v4581_v1 = vpop.eup %4580 }
 0x5a7   :  { %v1771_v48 = vmul.f32 %v4579_v15, %v1770_v14  ;;  %v1777_v27 = vmul.f32 %v4581_v1, %v1762_v28  ;;  %v1763_v57 = vadd.f32 1e-05, %v1758_v0  ;;  %vm1783_vm11 = vweird.f32 %v4581_v1 }
 0x5a8   :  { %vm1784_vm13 = vmor %vm1782_vm12, %vm1783_vm11 }
 0x5a9   :  { %v1775_v55 = vsel %vm1774_vm10, %v4579_v15, %v1771_v48  ;;  %v1778_v34 = vmul.f32 %v4581_v1, %v1777_v27  ;;  %4582 = vrsqrt.f32 %v1763_v57  ;;  %vm1792_vm15 = vweird.f32 %v1763_v57 }
 0x5aa   :  { %v1816_v5 = vmul.f32 %v1775_v55, %v5690_v23 }
 0x5ab   :  { %v1779_v17 = vmul.f32 0.5, %v1778_v34 }
 0x5ac   :  { %v1822_v25 = vmul.f32 %v5741_v11, %v1816_v5 }
 0x5ad   :  { %v1780_v41 = vsub.f32 1.5, %v1779_v17 }
 0x5ae   :  { %v1828_v10 = vadd.f32 %v5743_v18, %v1822_v25 }
 0x5af   :  { %v4583_v30 = vpop.eup %4582  ;;  %v1781_v60 = vmul.f32 %v4581_v1, %v1780_v41 }
 0x5b0   :  { %v1787_v38 = vmul.f32 %v4583_v30, %v1763_v57  ;;  %4188 = vmatmul.msk.f32.vlgmr.msra.gmra.mxu0 %vm80_vm1, %v1828_v10  ;;  %vm1793_vm14 = vweird.f32 %v4583_v30 }
 0x5b1   :  { %v1785_v16 = vsel %vm1784_vm13, %v4581_v1, %v1781_v60  ;;  %vm1794_vm2 = vmor %vm1792_vm15, %vm1793_vm14  ;;  %vm1901_vm13 = vcmask 523264  }
 0x5b2   :  { %v1817_v39 = vmul.f32 %v1785_v16, %v5697_v22  ;;  %v1788_v36 = vmul.f32 %v4583_v30, %v1787_v38  ;;  %v1900_v22 = vld [vmem:[%s6824_s14 + $0x38] sm:$0xff] }
 0x5b3   :  { %v1752_v44 = vpop.xlane.xlu1 %1751  ;;  %1925 = vmatpush.msrb.mxu1 %v1900_v22 }
 0x5b4   :  { %v1789_v23 = vmul.f32 0.5, %v1788_v36  ;;  %v1759_v3 = vmul.f32 %v1752_v44, %v4861_v26  ;;  %v1823_v50 = vmul.f32 %v5741_v11, %v1817_v39 }
 0x5b5   :  { %1926 = vmatpush.msrb.mxu1 %v1899_v45 }
 0x5b6   :  { %v1790_v35 = vsub.f32 1.5, %v1789_v23  ;;  %v1764_v46 = vadd.f32 1e-05, %v1759_v3  ;;  %v1829_v42 = vadd.f32 %v5743_v18, %v1823_v50  ;;  %v4469_v23 = vld [vmem:[%s6825_s15] ss:$0 sm:$0xff] }
 0x5b7   :  { %1927 = vmatpush.msrb.mxu1 %v1898_v2 }
 0x5b8   :  { %v1791_v33 = vmul.f32 %v4583_v30, %v1790_v35  ;;  %4584 = vrsqrt.f32 %v1764_v46  ;;  %4189 = vmatmul.msk.f32.gmra.mxu0 %vm80_vm1, %v1829_v42  ;;  %vm1802_vm8 = vweird.f32 %v1764_v46 }
 0x5b9   :  { %1928 = vmatpush.msrb.mxu1 %v1897_v7 }
 0x5ba   :  { %v1795_v40 = vsel %vm1794_vm2, %v4583_v30, %v1791_v33 }
 0x5bb   :  { %v1818_v29 = vmul.f32 %v1795_v40, %v5704_v37  ;;  %v1755_v61 = vpop.xlane.xlu2 %1754  ;;  %1929 = vmatpush.msrb.mxu1 %v1896_v63 }
 0x5bc   :  { %v1760_v6 = vmul.f32 %v1755_v61, %v4861_v26 }
 0x5bd   :  { %v1824_v51 = vmul.f32 %v5741_v11, %v1818_v29 }
 0x5be   :  { %v4585_v54 = vpop.eup %4584  ;;  %v1765_v24 = vadd.f32 1e-05, %v1760_v6 }
 0x5bf   :  { %v1797_v8 = vmul.f32 %v4585_v54, %v1764_v46  ;;  %v1830_v37 = vadd.f32 %v5743_v18, %v1824_v51  ;;  %vm1803_vm3 = vweird.f32 %v4585_v54 }
 0x5c0   :  { %4586 = vrsqrt.f32 %v1765_v24  ;;  %vm1804_vm9 = vmor %vm1802_vm8, %vm1803_vm3  ;;  %vm1812_vm11 = vweird.f32 %v1765_v24 }
 0x5c1   :  { %v1798_v53 = vmul.f32 %v4585_v54, %v1797_v8  ;;  %4190 = vmatmul.msk.f32.gmra.mxu0 %vm80_vm1, %v1830_v37 }
 0x5c3   :  { %v1799_v56 = vmul.f32 0.5, %v1798_v53 }
 0x5c5   :  { %v1800_v47 = vsub.f32 1.5, %v1799_v56 }
 0x5c6   :  { %v4587_v4 = vpop.eup %4586 }
 0x5c7   :  { %v1801_v62 = vmul.f32 %v4585_v54, %v1800_v47  ;;  %v1807_v32 = vmul.f32 %v4587_v4, %v1765_v24  ;;  %vm1813_vm10 = vweird.f32 %v4587_v4 }
 0x5c8   :  { %vm1814_vm12 = vmor %vm1812_vm11, %vm1813_vm10 }
 0x5c9   :  { %v1805_v15 = vsel %vm1804_vm9, %v4585_v54, %v1801_v62  ;;  %v1808_v28 = vmul.f32 %v4587_v4, %v1807_v32 }
 0x5ca   :  { %v1819_v12 = vmul.f32 %v1805_v15, %v5711_v43  ;;  %v1895_v43 = vld [vmem:[%s6824_s14 + $0x10] sm:$0xff] }
 0x5cb   :  { %v1809_v9 = vmul.f32 0.5, %v1808_v28  ;;  %1930 = vmatpush.msrb.mxu1 %v1895_v43 }
 0x5cc   :  { %v1825_v21 = vmul.f32 %v5741_v11, %v1819_v12 }
 0x5cd   :  { %v1810_v20 = vsub.f32 1.5, %v1809_v9  ;;  %1931 = vmatpush.msrb.mxu1 %v1894_v52 }
 0x5ce   :  { %v1831_v14 = vadd.f32 %v5743_v18, %v1825_v21 }
 0x5cf   :  { %v1811_v0 = vmul.f32 %v4587_v4, %v1810_v20 }
 0x5d0   :  { %4191 = vmatmul.msk.f32.gmra.mxu0 %vm80_vm1, %v1831_v14 }
 0x5d1   :  { %v1815_v1 = vsel %vm1814_vm12, %v4587_v4, %v1811_v0 }
 0x5d2   :  { %v1820_v48 = vmul.f32 %v1815_v1, %v5718_v49  ;;  %v1893_v49 = vld [vmem:[%s6824_s14] sm:$0xff] }
 0x5d3   :  { %1932 = vmatpush.msrb.mxu1 %v1893_v49  ;;  %v4202_v49 = vld [vmem:[%s6839_s20 + $0x98] sm:$0xff] }
 0x5d4   :  { %v1826_v27 = vmul.f32 %v5741_v11, %v1820_v48  ;;  %v4468_v11 = vld [vmem:[%s6840_s23] ss:$0 sm:$0xff]  ;;  %2119 = vmatpush.msrb.mxu2 %v4202_v49 }
 0x5d6   :  { %v1832_v57 = vadd.f32 %v5743_v18, %v1826_v27 }
 0x5d8   :  { %4192 = vmatmul.msk.f32.gmra.mxu0 %vm80_vm1, %v1832_v57 }
 0x62d   :  { %v1873_v55 = vpop.f32.mrf.mxu0 }
 0x62e   :  { %v1874_v34 = vadd.f32 %v4468_v11, %v1873_v55  ;;  %v4220_v55 = vld [vmem:[%s6839_s20 + $0xd8] sm:$0xff] }
 0x62f   :  { %2193 = vmatpush.msrb.mxu0 %v4220_v55  ;;  %v4242_v55 = vld [vmem:[%s6813_s6 + $0x98] sm:$0xff] }
 0x630   :  { %v1888_v18 = vmax.f32 %v1874_v34, 0.0  ;;  %v4229_v34 = vld [vmem:[%s6839_s20 + $0xf8] sm:$0xff] }
 0x631   :  { %2230 = vmatpush.msra.mxu1 %v4229_v34  ;;  %v4241_v34 = vld [vmem:[%s6813_s6 + $0x90] sm:$0xff] }
 0x632   :  { %4193 = vmatmul.msk.f32.vlgmr.msrb.gmra.mxu1 %vm1901_vm13, %v1888_v18  ;;  %v4201_v18 = vld [vmem:[%s6839_s20 + $0x90] sm:$0xff] }
 0x633   :  { %2120 = vmatpush.msrb.mxu2 %v4201_v18 }
 0x635   :  { %v1876_v5 = vpop.f32.mrf.mxu0 }
 0x636   :  { %v1877_v17 = vadd.f32 %v4468_v11, %v1876_v5  ;;  %v4210_v5 = vld [vmem:[%s6839_s20 + $0xb0] sm:$0xff] }
 0x638   :  { %v1889_v25 = vmax.f32 %v1877_v17, 0.0  ;;  %v4219_v17 = vld [vmem:[%s6839_s20 + $0xd0] sm:$0xff] }
 0x639   :  { %2194 = vmatpush.msrb.mxu0 %v4219_v17  ;;  %v4269_v17 = vld [vmem:[%s6813_s6 + $0xf8] sm:$0xff] }
 0x63a   :  { %4194 = vmatmul.msk.f32.gmra.mxu1 %vm1901_vm13, %v1889_v25  ;;  %v4228_v25 = vld [vmem:[%s6839_s20 + $0xf0] sm:$0xff] }
 0x63b   :  { %2231 = vmatpush.msra.mxu1 %v4228_v25  ;;  %v4250_v25 = vld [vmem:[%s6813_s6 + $0xb0] sm:$0xff] }
 0x63e   :  { %v1879_v41 = vpop.f32.mrf.mxu0 }
 0x63f   :  { %v1880_v10 = vadd.f32 %v4468_v11, %v1879_v41  ;;  %v4200_v41 = vld [vmem:[%s6839_s20 + $0x88] sm:$0xff] }
 0x640   :  { %2121 = vmatpush.msrb.mxu2 %v4200_v41 }
 0x641   :  { %v1890_v30 = vmax.f32 %v1880_v10, 0.0  ;;  %v4209_v10 = vld [vmem:[%s6839_s20 + $0xa8] sm:$0xff] }
 0x643   :  { %4195 = vmatmul.msk.f32.gmra.mxu1 %vm1901_vm13, %v1890_v30  ;;  %v4218_v30 = vld [vmem:[%s6839_s20 + $0xc8] sm:$0xff] }
 0x644   :  { %2195 = vmatpush.msrb.mxu0 %v4218_v30  ;;  %v4268_v30 = vld [vmem:[%s6813_s6 + $0xf0] sm:$0xff] }
 0x64d   :  { %v1882_v60 = vpop.f32.mrf.mxu0 }
 0x64e   :  { %v1883_v38 = vadd.f32 %v4468_v11, %v1882_v60  ;;  %v4227_v60 = vld [vmem:[%s6839_s20 + $0xe8] sm:$0xff] }
 0x64f   :  { %2232 = vmatpush.msra.mxu1 %v4227_v60  ;;  %v4240_v60 = vld [vmem:[%s6813_s6 + $0x88] sm:$0xff] }
 0x650   :  { %v1891_v16 = vmax.f32 %v1883_v38, 0.0  ;;  %v4199_v38 = vld [vmem:[%s6839_s20 + $0x80] sm:$0xff] }
 0x651   :  { %2122 = vmatpush.msrb.mxu2 %v4199_v38 }
 0x652   :  { %4196 = vmatmul.msk.f32.gmra.mxu1 %vm1901_vm13, %v1891_v16  ;;  %v4208_v16 = vld [vmem:[%s6839_s20 + $0xa0] sm:$0xff] }
 0x653   :  { %2304 = vmatpush.msra.mxu2 %v4242_v55  ;;  %v4279_v55 = vld [vmem:[%s6817_s8 + $0x80] sm:$0xff] }
 0x655   :  { %v1885_v39 = vpop.f32.mrf.mxu0  ;;  %2305 = vmatpush.msra.mxu2 %v4241_v34  ;;  %v4297_v34 = vld [vmem:[%s6817_s8 + $0xc0] sm:$0xff] }
 0x656   :  { %v1886_v36 = vadd.f32 %v4468_v11, %v1885_v39  ;;  %v4211_v11 = vld [vmem:[%s6839_s20 + $0xb8] sm:$0xff]  ;;  %v4217_v39 = vld [vmem:[%s6839_s20 + $0xc0] sm:$0xff] }
 0x657   :  { %2156 = vmatpush.msrb.mxu3 %v4211_v11  ;;  %2196 = vmatpush.msrb.mxu0 %v4217_v39  ;;  %v4249_v39 = vld [vmem:[%s6813_s6 + $0xa8] sm:$0xff] }
 0x658   :  { %v1892_v44 = vmax.f32 %v1886_v36, 0.0  ;;  %v4226_v36 = vld [vmem:[%s6839_s20 + $0xe0] sm:$0xff]  ;;  %2306 = vmatpush.msra.mxu2 %v4240_v60 }
 0x659   :  { %2157 = vmatpush.msrb.mxu3 %v4210_v5  ;;  %2233 = vmatpush.msra.mxu1 %v4226_v36  ;;  %v4260_v5 = vld [vmem:[%s6813_s6 + $0xd8] sm:$0xff]  ;;  %v4258_v36 = vld [vmem:[%s6813_s6 + $0xc8] sm:$0xff] }
 0x65a   :  { %4197 = vmatmul.msk.f32.gmra.mxu1 %vm1901_vm13, %v1892_v44  ;;  %2378 = vmatpush.msra.mxu0 %v4260_v5 }
 0x65b   :  { %2158 = vmatpush.msrb.mxu3 %v4209_v10  ;;  %v4259_v10 = vld [vmem:[%s6813_s6 + $0xd0] sm:$0xff]  ;;  %2415 = vmatpush.msrb.mxu1 %v4269_v17 }
 0x65c   :  { %2379 = vmatpush.msra.mxu0 %v4259_v10 }
 0x65d   :  { %2159 = vmatpush.msrb.mxu3 %v4208_v16  ;;  %2416 = vmatpush.msrb.mxu1 %v4268_v30 }
 0x65e   :  { %2380 = vmatpush.msra.mxu0 %v4258_v36 }
 0x6af   :  { %v1934_v3 = vpop.f32.mrf.mxu1 }
 0x6b0   :  { %v1949_v50 = vadd.f32 %v1934_v3, %v5664_v31 }
 0x6b2   :  { %v5803_v35 = vadd.f32 %v4469_v23, %v1949_v50 }
 0x6b4   :  { %v1965_v46 = vsel %vm80_vm1, %v5803_v35, 0.0 }
 0x6b5   :  { %1966 = vadd.xlane.f32.xlu0 %v1965_v46 }
 0x6b7   :  { %v1937_v42 = vpop.f32.mrf.mxu1 }
 0x6b8   :  { %v1950_v33 = vadd.f32 %v1937_v42, %v5669_v58 }
 0x6ba   :  { %v5808_v22 = vadd.f32 %v4469_v23, %v1950_v33 }
 0x6bc   :  { %v1968_v45 = vsel %vm80_vm1, %v5808_v22, 0.0 }
 0x6bd   :  { %1969 = vadd.xlane.f32.xlu1 %v1968_v45 }
 0x6c0   :  { %v1940_v40 = vpop.f32.mrf.mxu1 }
 0x6c1   :  { %v1951_v2 = vadd.f32 %v1940_v40, %v5674_v19 }
 0x6c3   :  { %v5813_v29 = vadd.f32 %v4469_v23, %v1951_v2 }
 0x6c5   :  { %v1971_v31 = vsel %vm80_vm1, %v5813_v29, 0.0 }
 0x6c6   :  { %1972 = vadd.xlane.f32.xlu2 %v1971_v31 }
 0x6cf   :  { %v1943_v61 = vpop.f32.mrf.mxu1 }
 0x6d0   :  { %v1952_v6 = vadd.f32 %v1943_v61, %v5679_v59  ;;  %v4198_v61 = vld [vmem:[%s6814_s3 + $0x4] sm:$0xf] }
 0x6d2   :  { %v5818_v7 = vadd.f32 %v4469_v23, %v1952_v6 }
 0x6d4   :  { %v1974_v58 = vsel %vm80_vm1, %v5818_v7, 0.0 }
 0x6d5   :  { %1975 = vadd.xlane.f32.xlu0 %v1974_v58 }
 0x6d7   :  { %v1946_v51 = vpop.f32.mrf.mxu1 }
 0x6d8   :  { %v1953_v54 = vadd.f32 %v1946_v51, %v5684_v13 }
 0x6da   :  { %v5823_v24 = vadd.f32 %v4469_v23, %v1953_v54 }
 0x6dc   :  { %v1977_v19 = vsel %vm93_vm0, %v5823_v24, 0.0 }
 0x6dd   :  { %1978 = vadd.xlane.f32.xlu1 %v1977_v19 }
 0x728   :  { %v1967_v63 = vpop.xlane.xlu0 %1966 }
 0x729   :  { %v1980_v8 = vmul.f32 %v1967_v63, %v4861_v26 }
 0x72b   :  { %v5829_v59 = vsub.f32 %v5803_v35, %v1980_v8  ;;  %v5916_v8 = vperm.slane %v4198_v61, 0 }
 0x72d   :  { %v1990_v37 = vmul.f32 %v5829_v59, %v5829_v59 }
 0x72f   :  { %v1995_v53 = vsel %vm80_vm1, %v1990_v37, 0.0 }
 0x730   :  { %v1970_v56 = vpop.xlane.xlu1 %1969  ;;  %1996 = vadd.xlane.f32.xlu2 %v1995_v53 }
 0x731   :  { %v1981_v13 = vmul.f32 %v1970_v56, %v4861_v26  ;;  %v5918_v56 = vperm.slane %v4198_v61, 1 }
 0x733   :  { %v5836_v47 = vsub.f32 %v5808_v22, %v1981_v13 }
 0x735   :  { %v1991_v4 = vmul.f32 %v5836_v47, %v5836_v47 }
 0x737   :  { %v1998_v62 = vsel %vm80_vm1, %v1991_v4, 0.0 }
 0x738   :  { %1999 = vadd.xlane.f32.xlu0 %v1998_v62 }
 0x739   :  { %v1973_v32 = vpop.xlane.xlu2 %1972 }
 0x73a   :  { %v1982_v15 = vmul.f32 %v1973_v32, %v4861_v26 }
 0x73c   :  { %v5843_v28 = vsub.f32 %v5813_v29, %v1982_v15 }
 0x73e   :  { %v1992_v12 = vmul.f32 %v5843_v28, %v5843_v28 }
 0x740   :  { %v2001_v9 = vsel %vm80_vm1, %v1992_v12, 0.0 }
 0x741   :  { %2002 = vadd.xlane.f32.xlu1 %v2001_v9 }
 0x748   :  { %v1976_v21 = vpop.xlane.xlu0 %1975 }
 0x749   :  { %v1983_v20 = vmul.f32 %v1976_v21, %v4861_v26 }
 0x74b   :  { %v5850_v14 = vsub.f32 %v5818_v7, %v1983_v20 }
 0x74d   :  { %v1993_v0 = vmul.f32 %v5850_v14, %v5850_v14 }
 0x74f   :  { %v2004_v1 = vsel %vm80_vm1, %v1993_v0, 0.0 }
 0x750   :  { %v1979_v48 = vpop.xlane.xlu1 %1978  ;;  %2005 = vadd.xlane.f32.xlu2 %v2004_v1 }
 0x751   :  { %v1984_v27 = vmul.f32 %v1979_v48, %v4861_v26 }
 0x753   :  { %v5857_v57 = vsub.f32 %v5823_v24, %v1984_v27 }
 0x755   :  { %v1994_v43 = vmul.f32 %v5857_v57, %v5857_v57 }
 0x757   :  { %v2007_v52 = vsel %vm93_vm0, %v1994_v43, 0.0 }
 0x758   :  { %2008 = vadd.xlane.f32.xlu0 %v2007_v52 }
 0x7a3   :  { %v1997_v44 = vpop.xlane.xlu2 %1996 }
 0x7a4   :  { %v2010_v23 = vmul.f32 %v1997_v44, %v4861_v26 }
 0x7a6   :  { %v2015_v3 = vadd.f32 1e-05, %v2010_v23  ;;  %v4267_v23 = vld [vmem:[%s6813_s6 + $0xe8] sm:$0xff] }
 0x7a7   :  { %2417 = vmatpush.msrb.mxu1 %v4267_v23 }
 0x7a8   :  { %4588 = vrsqrt.f32 %v2015_v3  ;;  %vm2026_vm15 = vweird.f32 %v2015_v3 }
 0x7ab   :  { %v2000_v50 = vpop.xlane.xlu0 %1999 }
 0x7ac   :  { %v2011_v46 = vmul.f32 %v2000_v50, %v4861_v26 }
 0x7ae   :  { %v4589_v42 = vpop.eup %4588  ;;  %v2016_v33 = vadd.f32 1e-05, %v2011_v46  ;;  %v4257_v46 = vld [vmem:[%s6813_s6 + $0xc0] sm:$0xff] }
 0x7af   :  { %v2021_v45 = vmul.f32 %v4589_v42, %v2015_v3  ;;  %vm2027_vm14 = vweird.f32 %v4589_v42  ;;  %v4248_v3 = vld [vmem:[%s6813_s6 + $0xa0] sm:$0xff]  ;;  %2381 = vmatpush.msra.mxu0 %v4257_v46 }
 0x7b0   :  { %4590 = vrsqrt.f32 %v2016_v33  ;;  %vm2028_vm2 = vmor %vm2026_vm15, %vm2027_vm14  ;;  %vm2036_vm8 = vweird.f32 %v2016_v33 }
 0x7b1   :  { %v2022_v40 = vmul.f32 %v4589_v42, %v2021_v45 }
 0x7b3   :  { %v2023_v2 = vmul.f32 0.5, %v2022_v40 }
 0x7b4   :  { %v2003_v31 = vpop.xlane.xlu1 %2002 }
 0x7b5   :  { %v2024_v6 = vsub.f32 1.5, %v2023_v2  ;;  %v2012_v58 = vmul.f32 %v2003_v31, %v4861_v26  ;;  %v4266_v2 = vld [vmem:[%s6813_s6 + $0xe0] sm:$0xff] }
 0x7b6   :  { %v4591_v51 = vpop.eup %4590  ;;  %2418 = vmatpush.msrb.mxu1 %v4266_v2 }
 0x7b7   :  { %v2025_v54 = vmul.f32 %v4589_v42, %v2024_v6  ;;  %v2031_v19 = vmul.f32 %v4591_v51, %v2016_v33  ;;  %v2017_v63 = vadd.f32 1e-05, %v2012_v58  ;;  %vm2037_vm3 = vweird.f32 %v4591_v51 }
 0x7b8   :  { %vm2038_vm9 = vmor %vm2036_vm8, %vm2037_vm3 }
 0x7b9   :  { %v2029_v37 = vsel %vm2028_vm2, %v4589_v42, %v2025_v54  ;;  %v2032_v53 = vmul.f32 %v4591_v51, %v2031_v19  ;;  %4592 = vrsqrt.f32 %v2017_v63  ;;  %vm2046_vm11 = vweird.f32 %v2017_v63 }
 0x7ba   :  { %v2070_v13 = vmul.f32 %v2029_v37, %v5829_v59 }
 0x7bb   :  { %v2033_v4 = vmul.f32 0.5, %v2032_v53 }
 0x7bc   :  { %v2076_v62 = vmul.f32 %v5916_v8, %v2070_v13 }
 0x7bd   :  { %v2034_v32 = vsub.f32 1.5, %v2033_v4 }
 0x7be   :  { %v5923_v15 = vadd.f32 %v5918_v56, %v2076_v62 }
 0x7bf   :  { %v4593_v12 = vpop.eup %4592  ;;  %v2035_v9 = vmul.f32 %v4591_v51, %v2034_v32 }
 0x7c0   :  { %v2041_v21 = vmul.f32 %v4593_v12, %v2017_v63  ;;  %4203 = vmatmul.msk.f32.vlgmr.msrb.gmra.mxu2 %vm80_vm1, %v5923_v15  ;;  %4212 = vmatmul.msk.f32.vlgmr.msrb.gmra.mxu3 %vm80_vm1, %v5923_v15  ;;  %vm2047_vm10 = vweird.f32 %v4593_v12 }
 0x7c1   :  { %v2039_v59 = vsel %vm2038_vm9, %v4591_v51, %v2035_v9  ;;  %4221 = vmatmul.msk.f32.vlgmr.msrb.gmra.mxu0 %vm80_vm1, %v5923_v15  ;;  %4230 = vmatmul.msk.f32.vlgmr.msra.gmra.mxu1 %vm80_vm1, %v5923_v15  ;;  %vm2048_vm12 = vmor %vm2046_vm11, %vm2047_vm10 }
 0x7c2   :  { %v2071_v20 = vmul.f32 %v2039_v59, %v5836_v47  ;;  %v2042_v0 = vmul.f32 %v4593_v12, %v2041_v21  ;;  %v4251_v47 = vld [vmem:[%s6813_s6 + $0xb8] sm:$0xff] }
 0x7c3   :  { %v2006_v1 = vpop.xlane.xlu2 %2005  ;;  %2341 = vmatpush.msra.mxu3 %v4251_v47  ;;  %v4309_v59 = vld [vmem:[%s6817_s8 + $0xf8] sm:$0xff]  ;;  %v4288_v47 = vld [vmem:[%s6817_s8 + $0xa0] sm:$0xff] }
 0x7c4   :  { %v2077_v48 = vmul.f32 %v5916_v8, %v2071_v20  ;;  %v2043_v27 = vmul.f32 0.5, %v2042_v0  ;;  %v2013_v43 = vmul.f32 %v2006_v1, %v4861_v26  ;;  %v4281_v20 = vld [vmem:[%s6817_s8 + $0x90] sm:$0xff]  ;;  %2600 = vmatpush.msra.mxu1 %v4309_v59 }
 0x7c5   :  { %2342 = vmatpush.msra.mxu3 %v4250_v25  ;;  %v4290_v0 = vld [vmem:[%s6817_s8 + $0xb0] sm:$0xff] }
 0x7c6   :  { %v5937_v52 = vadd.f32 %v5918_v56, %v2077_v48  ;;  %v2044_v49 = vsub.f32 1.5, %v2043_v27  ;;  %v5939_v11 = vadd.f32 1e-05, %v2013_v43  ;;  %v4299_v1 = vld [vmem:[%s6817_s8 + $0xd0] sm:$0xff]  ;;  %v4280_v27 = vld [vmem:[%s6817_s8 + $0x88] sm:$0xff] }
 0x7c7   :  { %2343 = vmatpush.msra.mxu3 %v4249_v39  ;;  %v4308_v48 = vld [vmem:[%s6817_s8 + $0xf0] sm:$0xff]  ;;  %v4289_v43 = vld [vmem:[%s6817_s8 + $0xa8] sm:$0xff] }
 0x7c8   :  { %v2045_v18 = vmul.f32 %v4593_v12, %v2044_v49  ;;  %4594 = vrsqrt.f32 %v5939_v11  ;;  %4204 = vmatmul.msk.f32.gmra.mxu2 %vm80_vm1, %v5937_v52  ;;  %4213 = vmatmul.msk.f32.gmra.mxu3 %vm80_vm1, %v5937_v52  ;;  %vm2056_vm15 = vweird.f32 %v5939_v11  ;;  %v4298_v49 = vld [vmem:[%s6817_s8 + $0xc8] sm:$0xff] }
 0x7c9   :  { %4222 = vmatmul.msk.f32.gmra.mxu0 %vm80_vm1, %v5937_v52  ;;  %4231 = vmatmul.msk.f32.gmra.mxu1 %vm80_vm1, %v5937_v52 }
 0x7ca   :  { %v2049_v41 = vsel %vm2048_vm12, %v4593_v12, %v2045_v18  ;;  %2344 = vmatpush.msra.mxu3 %v4248_v3  ;;  %2601 = vmatpush.msra.mxu1 %v4308_v48  ;;  %v4306_v18 = vld [vmem:[%s6817_s8 + $0xe0] sm:$0xff] }
 0x7cb   :  { %v2072_v38 = vmul.f32 %v2049_v41, %v5843_v28  ;;  %v2009_v16 = vpop.xlane.xlu0 %2008  ;;  %v4239_v28 = vld [vmem:[%s6813_s6 + $0x80] sm:$0xff] }
 0x7cc   :  { %v2014_v44 = vmul.f32 %v2009_v16, %v4861_v26  ;;  %2307 = vmatpush.msra.mxu2 %v4239_v28 }
 0x7cd   :  { %v2078_v50 = vmul.f32 %v5916_v8, %v2072_v38 }
 0x7ce   :  { %v4595_v42 = vpop.eup %4594  ;;  %v2019_v33 = vadd.f32 1e-05, %v2014_v44 }
 0x7cf   :  { %v5999_v45 = vadd.f32 %v5918_v56, %v2078_v50  ;;  %v2051_v40 = vmul.f32 %v4595_v42, %v5939_v11  ;;  %vm2057_vm14 = vweird.f32 %v4595_v42  ;;  %v4307_v11 = vld [vmem:[%s6817_s8 + $0xe8] sm:$0xff] }
 0x7d0   :  { %4596 = vrsqrt.f32 %v2019_v33  ;;  %vm2058_vm2 = vmor %vm2056_vm15, %vm2057_vm14  ;;  %vm2066_vm8 = vweird.f32 %v2019_v33  ;;  %2602 = vmatpush.msra.mxu1 %v4307_v11 }
 0x7d1   :  { %v2052_v31 = vmul.f32 %v4595_v42, %v2051_v40  ;;  %4205 = vmatmul.msk.f32.gmra.mxu2 %vm80_vm1, %v5999_v45  ;;  %4214 = vmatmul.msk.f32.gmra.mxu3 %vm80_vm1, %v5999_v45 }
 0x7d2   :  { %4223 = vmatmul.msk.f32.gmra.mxu0 %vm80_vm1, %v5999_v45  ;;  %4232 = vmatmul.msk.f32.gmra.mxu1 %vm80_vm1, %v5999_v45 }
 0x7d3   :  { %v2053_v61 = vmul.f32 0.5, %v2052_v31  ;;  %2603 = vmatpush.msra.mxu1 %v4306_v18 }
 0x7d5   :  { %v2054_v6 = vsub.f32 1.5, %v2053_v61 }
 0x7d6   :  { %v4597_v58 = vpop.eup %4596 }
 0x7d7   :  { %v2055_v51 = vmul.f32 %v4595_v42, %v2054_v6  ;;  %v2061_v54 = vmul.f32 %v4597_v58, %v2019_v33  ;;  %vm2067_vm3 = vweird.f32 %v4597_v58 }
 0x7d8   :  { %vm2068_vm9 = vmor %vm2066_vm8, %vm2067_vm3 }
 0x7d9   :  { %v2059_v19 = vsel %vm2058_vm2, %v4595_v42, %v2055_v51  ;;  %v2062_v63 = vmul.f32 %v4597_v58, %v2061_v54 }
 0x7da   :  { %v2073_v37 = vmul.f32 %v2059_v19, %v5850_v14 }
 0x7db   :  { %v2063_v53 = vmul.f32 0.5, %v2062_v63 }
 0x7dc   :  { %v2079_v13 = vmul.f32 %v5916_v8, %v2073_v37 }
 0x7dd   :  { %v2064_v4 = vsub.f32 1.5, %v2063_v53 }
 0x7de   :  { %v6017_v62 = vadd.f32 %v5918_v56, %v2079_v13 }
 0x7df   :  { %v2065_v32 = vmul.f32 %v4597_v58, %v2064_v4 }
 0x7e0   :  { %4206 = vmatmul.msk.f32.gmra.mxu2 %vm80_vm1, %v6017_v62  ;;  %4215 = vmatmul.msk.f32.gmra.mxu3 %vm80_vm1, %v6017_v62 }
 0x7e1   :  { %v2069_v12 = vsel %vm2068_vm9, %v4597_v58, %v2065_v32  ;;  %4224 = vmatmul.msk.f32.gmra.mxu0 %vm80_vm1, %v6017_v62  ;;  %4233 = vmatmul.msk.f32.gmra.mxu1 %vm80_vm1, %v6017_v62  ;;  %v4475_v32 = vld [vmem:[%s6816_s7 + $0x7] ss:$0 sm:$0xff] }
 0x7e2   :  { %v2074_v14 = vmul.f32 %v2069_v12, %v5857_v57  ;;  %v4282_v57 = vld [vmem:[%s6817_s8 + $0x98] sm:$0xff] }
 0x7e3   :  { %2489 = vmatpush.msrb.mxu2 %v4282_v57  ;;  %v4476_v57 = vld [vmem:[%s6816_s7 + $0x4] ss:$0 sm:$0xff] }
 0x7e4   :  { %v2080_v9 = vmul.f32 %v5916_v8, %v2074_v14  ;;  %v4291_v8 = vld [vmem:[%s6817_s8 + $0xb8] sm:$0xff] }
 0x7e5   :  { %2526 = vmatpush.msrb.mxu3 %v4291_v8  ;;  %2490 = vmatpush.msrb.mxu2 %v4281_v20  ;;  %v4477_v8 = vld [vmem:[%s6816_s7 + $0x5] ss:$0 sm:$0xff] }
 0x7e6   :  { %v6030_v21 = vadd.f32 %v5918_v56, %v2080_v9  ;;  %v4300_v56 = vld [vmem:[%s6817_s8 + $0xd8] sm:$0xff] }
 0x7e7   :  { %2563 = vmatpush.msrb.mxu0 %v4300_v56  ;;  %2527 = vmatpush.msrb.mxu3 %v4290_v0 }
 0x7e8   :  { %4207 = vmatmul.msk.f32.gmra.mxu2 %vm80_vm1, %v6030_v21  ;;  %4216 = vmatmul.msk.f32.gmra.mxu3 %vm80_vm1, %v6030_v21 }
 0x7e9   :  { %4225 = vmatmul.msk.f32.gmra.mxu0 %vm80_vm1, %v6030_v21  ;;  %4234 = vmatmul.msk.f32.gmra.mxu1 %vm80_vm1, %v6030_v21 }
 0x7ea   :  { %2564 = vmatpush.msrb.mxu0 %v4299_v1  ;;  %2491 = vmatpush.msrb.mxu2 %v4280_v27 }
 0x7eb   :  { %2528 = vmatpush.msrb.mxu3 %v4289_v43 }
 0x7ec   :  { %2565 = vmatpush.msrb.mxu0 %v4298_v49  ;;  %2492 = vmatpush.msrb.mxu2 %v4279_v55 }
 0x7ed   :  { %2529 = vmatpush.msrb.mxu3 %v4288_v47 }
 0x7ee   :  { %2566 = vmatpush.msrb.mxu0 %v4297_v34 }
 0x7f0   :  { %4243 = vmatmul.msk.f32.vlgmr.msra.gmra.mxu2 %vm80_vm1, %v5923_v15  ;;  %4252 = vmatmul.msk.f32.vlgmr.msra.gmra.mxu3 %vm80_vm1, %v5923_v15 }
 0x7f1   :  { %4261 = vmatmul.msk.f32.vlgmr.msra.gmra.mxu0 %vm80_vm1, %v5923_v15  ;;  %4270 = vmatmul.msk.f32.vlgmr.msrb.gmra.mxu1 %vm80_vm1, %v5923_v15 }
 0x7f8   :  { %4244 = vmatmul.msk.f32.gmra.mxu2 %vm80_vm1, %v5937_v52  ;;  %4253 = vmatmul.msk.f32.gmra.mxu3 %vm80_vm1, %v5937_v52 }
 0x7f9   :  { %4262 = vmatmul.msk.f32.gmra.mxu0 %vm80_vm1, %v5937_v52  ;;  %4271 = vmatmul.msk.f32.gmra.mxu1 %vm80_vm1, %v5937_v52 }
 0x800   :  { %4245 = vmatmul.msk.f32.gmra.mxu2 %vm80_vm1, %v5999_v45  ;;  %4254 = vmatmul.msk.f32.gmra.mxu3 %vm80_vm1, %v5999_v45 }
 0x801   :  { %4263 = vmatmul.msk.f32.gmra.mxu0 %vm80_vm1, %v5999_v45  ;;  %4272 = vmatmul.msk.f32.gmra.mxu1 %vm80_vm1, %v5999_v45 }
 0x808   :  { %4246 = vmatmul.msk.f32.gmra.mxu2 %vm80_vm1, %v6017_v62  ;;  %4255 = vmatmul.msk.f32.gmra.mxu3 %vm80_vm1, %v6017_v62 }
 0x809   :  { %4264 = vmatmul.msk.f32.gmra.mxu0 %vm80_vm1, %v6017_v62  ;;  %4273 = vmatmul.msk.f32.gmra.mxu1 %vm80_vm1, %v6017_v62 }
 0x810   :  { %4247 = vmatmul.msk.f32.gmra.mxu2 %vm80_vm1, %v6030_v21  ;;  %4256 = vmatmul.msk.f32.gmra.mxu3 %vm80_vm1, %v6030_v21 }
 0x811   :  { %4265 = vmatmul.msk.f32.gmra.mxu0 %vm80_vm1, %v6030_v21  ;;  %4274 = vmatmul.msk.f32.gmra.mxu1 %vm80_vm1, %v6030_v21 }
 0x818   :  { %4283 = vmatmul.msk.f32.vlgmr.msrb.gmra.mxu2 %vm80_vm1, %v5923_v15  ;;  %4292 = vmatmul.msk.f32.vlgmr.msrb.gmra.mxu3 %vm80_vm1, %v5923_v15 }
 0x819   :  { %4301 = vmatmul.msk.f32.vlgmr.msrb.gmra.mxu0 %vm80_vm1, %v5923_v15  ;;  %4310 = vmatmul.msk.f32.vlgmr.msra.gmra.mxu1 %vm80_vm1, %v5923_v15 }
 0x820   :  { %4284 = vmatmul.msk.f32.gmra.mxu2 %vm80_vm1, %v5937_v52  ;;  %4293 = vmatmul.msk.f32.gmra.mxu3 %vm80_vm1, %v5937_v52 }
 0x821   :  { %4302 = vmatmul.msk.f32.gmra.mxu0 %vm80_vm1, %v5937_v52  ;;  %4311 = vmatmul.msk.f32.gmra.mxu1 %vm80_vm1, %v5937_v52 }
 0x828   :  { %4285 = vmatmul.msk.f32.gmra.mxu2 %vm80_vm1, %v5999_v45  ;;  %4294 = vmatmul.msk.f32.gmra.mxu3 %vm80_vm1, %v5999_v45 }
 0x829   :  { %4303 = vmatmul.msk.f32.gmra.mxu0 %vm80_vm1, %v5999_v45  ;;  %4312 = vmatmul.msk.f32.gmra.mxu1 %vm80_vm1, %v5999_v45 }
 0x830   :  { %4286 = vmatmul.msk.f32.gmra.mxu2 %vm80_vm1, %v6017_v62  ;;  %4295 = vmatmul.msk.f32.gmra.mxu3 %vm80_vm1, %v6017_v62 }
 0x831   :  { %4304 = vmatmul.msk.f32.gmra.mxu0 %vm80_vm1, %v6017_v62  ;;  %4313 = vmatmul.msk.f32.gmra.mxu1 %vm80_vm1, %v6017_v62  ;;  %v4474_v62 = vld [vmem:[%s6816_s7 + $0x6] ss:$0 sm:$0xff] }
 0x838   :  { %4287 = vmatmul.msk.f32.gmra.mxu2 %vm80_vm1, %v6030_v21  ;;  %4296 = vmatmul.msk.f32.gmra.mxu3 %vm80_vm1, %v6030_v21 }
 0x839   :  { %4305 = vmatmul.msk.f32.gmra.mxu0 %vm80_vm1, %v6030_v21  ;;  %4314 = vmatmul.msk.f32.gmra.mxu1 %vm80_vm1, %v6030_v21 }
 0x83e   :  { %v6168_v15 = vpop.f32.mrf.mxu0  ;;  %v6170_v52 = vpop.f32.mrf.mxu1 }
 0x843   :  { %v6172_v5 = vpop.f32.mrf.mxu2  ;;  %v6174_v17 = vpop.f32.mrf.mxu3 }
 0x846   :  { %v6176_v25 = vpop.f32.mrf.mxu0  ;;  %v6178_v41 = vpop.f32.mrf.mxu1 }
 0x84b   :  { %v6180_v10 = vpop.f32.mrf.mxu2  ;;  %v6182_v30 = vpop.f32.mrf.mxu3 }
 0x84f   :  { %v6184_v60 = vpop.f32.mrf.mxu0  ;;  %v6186_v38 = vpop.f32.mrf.mxu1 }
 0x854   :  { %v6188_v16 = vpop.f32.mrf.mxu2  ;;  %v6190_v39 = vpop.f32.mrf.mxu3 }
 0x85e   :  { %v6192_v36 = vpop.f32.mrf.mxu0  ;;  %v6194_v44 = vpop.f32.mrf.mxu1 }
 0x863   :  { %v6196_v23 = vpop.f32.mrf.mxu2  ;;  %v6198_v28 = vpop.f32.mrf.mxu3 }
 0x866   :  { %v6200_v3 = vpop.f32.mrf.mxu0  ;;  %v6202_v50 = vpop.f32.mrf.mxu1 }
 0x86b   :  { %v6204_v46 = vpop.f32.mrf.mxu2  ;;  %v6206_v42 = vpop.f32.mrf.mxu3 }
 0x86e   :  { %v2383_v33 = vpop.f32.mrf.mxu0  ;;  %v2420_v45 = vpop.f32.mrf.mxu1 }
 0x873   :  { %v6208_v40 = vpop.f32.mrf.mxu2  ;;  %v6210_v2 = vpop.f32.mrf.mxu3 }
 0x876   :  { %v2386_v31 = vpop.f32.mrf.mxu0  ;;  %v2423_v61 = vpop.f32.mrf.mxu1 }
 0x877   :  { %v2463_v34 = vadd.f32 %v4474_v62, %v2386_v31  ;;  %v2468_v18 = vadd.f32 %v4475_v32, %v2423_v61  ;;  %v6252_v31 = vld [vmem:[%s6815_s5 + $0x7] ss:$0 sm:$0xff] }
 0x87b   :  { %v2312_v6 = vpop.f32.mrf.mxu2  ;;  %v2349_v58 = vpop.f32.mrf.mxu3 }
 0x87e   :  { %v2389_v51 = vpop.f32.mrf.mxu0  ;;  %v2426_v54 = vpop.f32.mrf.mxu1 }
 0x87f   :  { %v2464_v49 = vadd.f32 %v4474_v62, %v2389_v51  ;;  %v2469_v11 = vadd.f32 %v4475_v32, %v2426_v54  ;;  %v6247_v51 = vld [vmem:[%s6815_s5 + $0x6] ss:$0 sm:$0xff] }
 0x883   :  { %v2315_v19 = vpop.f32.mrf.mxu2  ;;  %v2352_v63 = vpop.f32.mrf.mxu3 }
 0x886   :  { %v2392_v37 = vpop.f32.mrf.mxu0  ;;  %v2429_v53 = vpop.f32.mrf.mxu1 }
 0x887   :  { %v2465_v56 = vadd.f32 %v4474_v62, %v2392_v37  ;;  %v2470_v59 = vadd.f32 %v4475_v32, %v2429_v53 }
 0x88b   :  { %v2318_v13 = vpop.f32.mrf.mxu2  ;;  %v2355_v4 = vpop.f32.mrf.mxu3 }
 0x88c   :  { %v2455_v55 = vadd.f32 %v4476_v57, %v2318_v13  ;;  %v2460_v47 = vadd.f32 %v4477_v8, %v2355_v4  ;;  %v2453_v13 = vadd.f32 %v4476_v57, %v2312_v6  ;;  %v2458_v4 = vadd.f32 %v4477_v8, %v2349_v58 }
 0x88d   :  { %v2457_v58 = vadd.f32 %v4477_v8, %v6210_v2  ;;  %v2283_v2 = vadd.f32 %v6252_v31, %v6178_v41  ;;  %v2284_v41 = vadd.f32 %v6252_v31, %v6186_v38 }
 0x88e   :  { %v2395_v12 = vpop.f32.mrf.mxu0  ;;  %v2432_v14 = vpop.f32.mrf.mxu1 }
 0x88f   :  { %v2466_v9 = vadd.f32 %v4474_v62, %v2395_v12  ;;  %v2471_v21 = vadd.f32 %v4475_v32, %v2432_v14  ;;  %v2454_v12 = vadd.f32 %v4476_v57, %v2315_v19  ;;  %v2459_v14 = vadd.f32 %v4477_v8, %v2352_v63 }
 0x890   :  { %v2462_v19 = vadd.f32 %v4474_v62, %v2383_v33  ;;  %v2467_v63 = vadd.f32 %v4475_v32, %v2420_v45  ;;  %v6271_v33 = vld [vmem:[%s6815_s5 + $0x4] ss:$0 sm:$0xff]  ;;  %v6276_v45 = vld [vmem:[%s6815_s5 + $0x5] ss:$0 sm:$0xff] }
 0x891   :  { %4339 = vmatpush.xpose.msk.msra.mxu0 %vm775_vm4, %v2466_v9  ;;  %4349 = vmatpush.xpose.msk.msrb.mxu1 %vm775_vm4, %v2471_v21  ;;  %v2277_v9 = vadd.f32 %v6247_v51, %v6168_v15  ;;  %v2282_v21 = vadd.f32 %v6252_v31, %v6170_v52  ;;  %v2452_v52 = vadd.f32 %v4476_v57, %v6208_v40 }
 0x892   :  { %v2278_v40 = vadd.f32 %v6247_v51, %v6176_v25  ;;  %v2279_v25 = vadd.f32 %v6247_v51, %v6184_v60  ;;  %v2269_v38 = vadd.f32 %v6271_v33, %v6188_v16  ;;  %v4481_v16 = vld [vmem:[%s6818_s9 + $0x5] ss:$0 sm:$0xff] }
 0x893   :  { %v2321_v20 = vpop.f32.mrf.mxu2  ;;  %v2358_v0 = vpop.f32.mrf.mxu3 }
 0x894   :  { %v2456_v1 = vadd.f32 %v4476_v57, %v2321_v20  ;;  %v2461_v48 = vadd.f32 %v4477_v8, %v2358_v0  ;;  %v2273_v0 = vadd.f32 %v6276_v45, %v6182_v30  ;;  %v4479_v30 = vld [vmem:[%s6818_s9 + $0x7] ss:$0 sm:$0xff] }
 0x895   :  { %4340 = vmatpush.xpose.msk.msra.mxu0 %vm775_vm4, %v2465_v56  ;;  %4350 = vmatpush.xpose.msk.msrb.mxu1 %vm775_vm4, %v2470_v59  ;;  %v2267_v56 = vadd.f32 %v6271_v33, %v6172_v5  ;;  %v2272_v59 = vadd.f32 %v6276_v45, %v6174_v17  ;;  %v2268_v17 = vadd.f32 %v6271_v33, %v6180_v10  ;;  %v4478_v10 = vld [vmem:[%s6818_s9 + $0x6] ss:$0 sm:$0xff] }
 0x896   :  { %v6228_v27 = vpop.f32.mrf.mxu0  ;;  %v6230_v43 = vpop.f32.mrf.mxu1  ;;  %4319 = vmatpush.xpose.msk.msra.mxu2 %vm775_vm4, %v2456_v1  ;;  %4329 = vmatpush.xpose.msk.msra.mxu3 %vm775_vm4, %v2461_v48 }
 0x899   :  { %4341 = vmatpush.xpose.msk.msra.mxu0 %vm775_vm4, %v2464_v49  ;;  %4351 = vmatpush.xpose.msk.msrb.mxu1 %vm775_vm4, %v2469_v11 }
 0x89a   :  { %4320 = vmatpush.xpose.msk.msra.mxu2 %vm775_vm4, %v2455_v55  ;;  %4330 = vmatpush.xpose.msk.msra.mxu3 %vm775_vm4, %v2460_v47  ;;  %v2274_v47 = vadd.f32 %v6276_v45, %v6190_v39 }
 0x89b   :  { %v6238_v37 = vpop.f32.mrf.mxu2  ;;  %v6240_v53 = vpop.f32.mrf.mxu3 }
 0x89d   :  { %4342 = vmatpush.xpose.msk.msra.mxu0 %vm775_vm4, %v2463_v34  ;;  %4352 = vmatpush.xpose.msk.msrb.mxu1 %vm775_vm4, %v2468_v18 }
 0x89e   :  { %v6254_v61 = vpop.f32.mrf.mxu0  ;;  %v6256_v54 = vpop.f32.mrf.mxu1  ;;  %4321 = vmatpush.xpose.msk.msra.mxu2 %vm775_vm4, %v2454_v12  ;;  %4331 = vmatpush.xpose.msk.msra.mxu3 %vm775_vm4, %v2459_v14  ;;  %v2280_v12 = vadd.f32 %v6247_v51, %v6192_v36  ;;  %v2285_v14 = vadd.f32 %v6252_v31, %v6194_v44 }
 0x8a1   :  { %4343 = vmatpush.xpose.msk.msra.mxu0 %vm775_vm4, %v2462_v19  ;;  %4353 = vmatpush.xpose.msk.msrb.mxu1 %vm775_vm4, %v2467_v63  ;;  %v4480_v19 = vld [vmem:[%s6818_s9 + $0x4] ss:$0 sm:$0xff] }
 0x8a2   :  { %4322 = vmatpush.xpose.msk.msra.mxu2 %vm775_vm4, %v2453_v13  ;;  %4332 = vmatpush.xpose.msk.msra.mxu3 %vm775_vm4, %v2458_v4 }
 0x8a3   :  { %v6278_v6 = vpop.f32.mrf.mxu2  ;;  %v6280_v15 = vpop.f32.mrf.mxu3 }
 0x8a4   :  { %4344 = vmatmul.msk.f32.vlgmr.msra.gmra.mxu0 %vm775_vm4, %v2277_v9  ;;  %4354 = vmatmul.msk.f32.vlgmr.msrb.gmra.mxu1 %vm775_vm4, %v2282_v21  ;;  %v2648_v9 = vadd.f32 %v4478_v10, %v6254_v61  ;;  %v2653_v21 = vadd.f32 %v4479_v30, %v6256_v54  ;;  %v2275_v61 = vadd.f32 %v6276_v45, %v6198_v28 }
 0x8a5   :  { %v2643_v28 = vadd.f32 %v4481_v16, %v6280_v15 }
 0x8a6   :  { %v2574_v62 = vpop.f32.mrf.mxu0  ;;  %v2611_v32 = vpop.f32.mrf.mxu1  ;;  %4323 = vmatpush.xpose.msk.msra.mxu2 %vm775_vm4, %v2452_v52  ;;  %4333 = vmatpush.xpose.msk.msra.mxu3 %vm775_vm4, %v2457_v58 }
 0x8a7   :  { %v2649_v39 = vadd.f32 %v4478_v10, %v2574_v62  ;;  %v2654_v63 = vadd.f32 %v4479_v30, %v2611_v32  ;;  %v2647_v62 = vadd.f32 %v4478_v10, %v6228_v27  ;;  %v2652_v32 = vadd.f32 %v4479_v30, %v6230_v43 }
 0x8a8   :  { %v2286_v27 = vadd.f32 %v6252_v31, %v6202_v50  ;;  %v2637_v43 = vadd.f32 %v4480_v19, %v6238_v37  ;;  %v2271_v50 = vadd.f32 %v6271_v33, %v6204_v46  ;;  %v4709_v37 = vld [vmem:[%s6819_s2] sm:$0xff] }
 0x8a9   :  { %4324 = vmatmul.msk.f32.vlgmr.msra.gmra.mxu2 %vm775_vm4, %v2267_v56  ;;  %4334 = vmatmul.msk.f32.vlgmr.msra.gmra.mxu3 %vm775_vm4, %v2272_v59  ;;  %v2270_v56 = vadd.f32 %v6271_v33, %v6196_v23  ;;  %v2638_v23 = vadd.f32 %v4480_v19, %v6278_v6 }
 0x8ab   :  { %v2500_v57 = vpop.f32.mrf.mxu2  ;;  %v2537_v8 = vpop.f32.mrf.mxu3 }
 0x8ac   :  { %4345 = vmatmul.msk.f32.gmra.mxu0 %vm775_vm4, %v2278_v40  ;;  %4355 = vmatmul.msk.f32.gmra.mxu1 %vm775_vm4, %v2283_v2  ;;  %v2639_v54 = vadd.f32 %v4480_v19, %v2500_v57  ;;  %v2644_v59 = vadd.f32 %v4481_v16, %v2537_v8  ;;  %v2281_v40 = vadd.f32 %v6247_v51, %v6200_v3 }
 0x8ad   :  { %v2642_v3 = vadd.f32 %v4481_v16, %v6240_v53  ;;  %v2276_v51 = vadd.f32 %v6276_v45, %v6206_v42 }
 0x8ae   :  { %v2577_v5 = vpop.f32.mrf.mxu0  ;;  %v2614_v20 = vpop.f32.mrf.mxu1 }
 0x8af   :  { %v2650_v34 = vadd.f32 %v4478_v10, %v2577_v5  ;;  %v2655_v18 = vadd.f32 %v4479_v30, %v2614_v20 }
 0x8b1   :  { %4325 = vmatmul.msk.f32.gmra.mxu2 %vm775_vm4, %v2268_v17  ;;  %4335 = vmatmul.msk.f32.gmra.mxu3 %vm775_vm4, %v2273_v0 }
 0x8b3   :  { %v2503_v1 = vpop.f32.mrf.mxu2  ;;  %v2540_v48 = vpop.f32.mrf.mxu3 }
 0x8b4   :  { %4346 = vmatmul.msk.f32.gmra.mxu0 %vm775_vm4, %v2279_v25  ;;  %4356 = vmatmul.msk.f32.gmra.mxu1 %vm775_vm4, %v2284_v41  ;;  %v2640_v52 = vadd.f32 %v4480_v19, %v2503_v1  ;;  %v2645_v58 = vadd.f32 %v4481_v16, %v2540_v48 }
 0x8b6   :  { %v2580_v49 = vpop.f32.mrf.mxu0  ;;  %v2617_v11 = vpop.f32.mrf.mxu1 }
 0x8b7   :  { %v2651_v60 = vadd.f32 %v4478_v10, %v2580_v49  ;;  %v2656_v55 = vadd.f32 %v4479_v30, %v2617_v11  ;;  %v4710_v30 = vld [vmem:[%s6819_s2 + $0x8] sm:$0xff] }
 0x8b9   :  { %4371 = vmatpush.msk.msrb.mxu0 %vm1301_vm5, %v2651_v60  ;;  %4377 = vmatpush.msk.msra.mxu1 %vm1301_vm5, %v2656_v55 }
 0x8ba   :  { %4326 = vmatmul.msk.f32.gmra.mxu2 %vm775_vm4, %v2269_v38  ;;  %4336 = vmatmul.msk.f32.gmra.mxu3 %vm775_vm4, %v2274_v47 }
 0x8bb   :  { %3295 = vmatpush.msrb.mxu0 %v2650_v34  ;;  %3345 = vmatpush.msra.mxu1 %v2655_v18  ;;  %v2506_v36 = vpop.f32.mrf.mxu2  ;;  %v2543_v13 = vpop.f32.mrf.mxu3 }
 0x8bc   :  { %v2641_v4 = vadd.f32 %v4480_v19, %v2506_v36  ;;  %v2646_v44 = vadd.f32 %v4481_v16, %v2543_v13  ;;  %4347 = vmatmul.msk.f32.gmra.mxu0 %vm775_vm4, %v2280_v12  ;;  %4357 = vmatmul.msk.f32.gmra.mxu1 %vm775_vm4, %v2285_v14 }
 0x8bd   :  { %3296 = vmatpush.msrb.mxu0 %v2649_v39  ;;  %3346 = vmatpush.msra.mxu1 %v2654_v63  ;;  %v4711_v63 = vld [vmem:[%s6819_s2 + $0x10] sm:$0xff] }
 0x8be   :  { %4359 = vmatpush.msk.msrb.mxu2 %vm1301_vm5, %v2641_v4  ;;  %4365 = vmatpush.msk.msrb.mxu3 %vm1301_vm5, %v2646_v44 }
 0x8bf   :  { %3297 = vmatpush.msrb.mxu0 %v2648_v9  ;;  %3347 = vmatpush.msra.mxu1 %v2653_v21 }
 0x8c0   :  { %3195 = vmatpush.msrb.mxu2 %v2640_v52  ;;  %3245 = vmatpush.msrb.mxu3 %v2645_v58 }
 0x8c1   :  { %3298 = vmatpush.msrb.mxu0 %v2647_v62  ;;  %3348 = vmatpush.msra.mxu1 %v2652_v32 }
 0x8c2   :  { %4327 = vmatmul.msk.f32.gmra.mxu2 %vm775_vm4, %v2270_v56  ;;  %4337 = vmatmul.msk.f32.gmra.mxu3 %vm775_vm4, %v2275_v61 }
 0x8c3   :  { %3196 = vmatpush.msrb.mxu2 %v2639_v54  ;;  %3246 = vmatpush.msrb.mxu3 %v2644_v59  ;;  %v4712_v54 = vld [vmem:[%s6819_s2 + $0x18] sm:$0xff] }
 0x8c4   :  { %4348 = vmatmul.msk.f32.gmra.mxu0 %vm775_vm4, %v2281_v40  ;;  %4358 = vmatmul.msk.f32.gmra.mxu1 %vm775_vm4, %v2286_v27 }
 0x8c5   :  { %3197 = vmatpush.msrb.mxu2 %v2638_v23  ;;  %3247 = vmatpush.msrb.mxu3 %v2643_v28 }
 0x8c7   :  { %3198 = vmatpush.msrb.mxu2 %v2637_v43  ;;  %3248 = vmatpush.msrb.mxu3 %v2642_v3 }
 0x8ca   :  { %4328 = vmatmul.msk.f32.gmra.mxu2 %vm775_vm4, %v2271_v50  ;;  %4338 = vmatmul.msk.f32.gmra.mxu3 %vm775_vm4, %v2276_v51 }
 0x921   :  { %v2828_v31 = vpop.f32.mrf.mxu0  ;;  %v2890_v2 = vpop.f32.mrf.mxu1 }
 0x922   :  { %v2915_v6 = vmul.f32 0.35355338, %v2828_v31  ;;  %v2920_v20 = vmul.f32 0.35355338, %v2890_v2 }
 0x924   :  { %v6369_v53 = vadd.f32 %v4709_v37, %v2915_v6  ;;  %v6381_v10 = vadd.f32 %v4709_v37, %v2920_v20 }
 0x926   :  { %v2975_v15 = vsel %vm1064_vm6, %v6369_v53, -inf  ;;  %v2990_v38 = vsel %vm1064_vm6, %v6381_v10, -inf }
 0x927   :  { %2976 = vmax.xlane.f32.xlu0 %v2975_v15 }
 0x929   :  { %v2831_v57 = vpop.f32.mrf.mxu0  ;;  %v2893_v11 = vpop.f32.mrf.mxu1 }
 0x92a   :  { %v2916_v17 = vmul.f32 0.35355338, %v2831_v57  ;;  %v2921_v18 = vmul.f32 0.35355338, %v2893_v11 }
 0x92c   :  { %v2704_v46 = vpop.f32.mrf.mxu2  ;;  %v2766_v33 = vpop.f32.mrf.mxu3  ;;  %v6386_v49 = vadd.f32 %v4710_v30, %v2916_v17  ;;  %v6398_v39 = vadd.f32 %v4710_v30, %v2921_v18 }
 0x92d   :  { %v2905_v42 = vmul.f32 0.35355338, %v2704_v46  ;;  %v2910_v45 = vmul.f32 0.35355338, %v2766_v33  ;;  %v4713_v46 = vld [vmem:[%s6819_s2 + $0x20] sm:$0x3] }
 0x92e   :  { %v2978_v47 = vsel %vm1064_vm6, %v6386_v49, -inf  ;;  %v2993_v9 = vsel %vm1064_vm6, %v6398_v39, -inf }
 0x92f   :  { %v6373_v8 = vadd.f32 %v4709_v37, %v2910_v45  ;;  %v6375_v5 = vadd.f32 %v4709_v37, %v2905_v42 }
 0x931   :  { %v2960_v0 = vsel %vm1064_vm6, %v6373_v8, -inf  ;;  %v2945_v25 = vsel %vm1064_vm6, %v6375_v5, -inf  ;;  %v2896_v44 = vpop.f32.mrf.mxu1  ;;  %v2834_v52 = vpop.f32.mrf.mxu0 }
 0x932   :  { %2961 = vmax.xlane.f32.xlu2 %v2960_v0  ;;  %2946 = vmax.xlane.f32.xlu1 %v2945_v25  ;;  %v2917_v27 = vmul.f32 0.35355338, %v2834_v52  ;;  %v2922_v0 = vmul.f32 0.35355338, %v2896_v44 }
 0x934   :  { %v2707_v41 = vpop.f32.mrf.mxu2  ;;  %v2769_v1 = vpop.f32.mrf.mxu3  ;;  %v6426_v31 = vadd.f32 %v4711_v63, %v2917_v27 }
 0x935   :  { %v2906_v48 = vmul.f32 0.35355338, %v2707_v41  ;;  %v2911_v55 = vmul.f32 0.35355338, %v2769_v1 }
 0x936   :  { %v2981_v42 = vsel %vm1064_vm6, %v6426_v31, -inf }
 0x937   :  { %v6388_v60 = vadd.f32 %v4710_v30, %v2906_v48  ;;  %v6396_v19 = vadd.f32 %v4710_v30, %v2911_v55  ;;  %v6445_v48 = vadd.f32 %v4711_v63, %v2922_v0 }
 0x939   :  { %v2948_v34 = vsel %vm1064_vm6, %v6388_v60, -inf  ;;  %v2963_v4 = vsel %vm1064_vm6, %v6396_v19, -inf  ;;  %v2899_v3 = vpop.f32.mrf.mxu1  ;;  %v2837_v6 = vpop.f32.mrf.mxu0 }
 0x93a   :  { %2991 = vmax.xlane.f32.xlu2 %v2990_v38  ;;  %2979 = vmax.xlane.f32.xlu1 %v2978_v47  ;;  %v2918_v45 = vmul.f32 0.35355338, %v2837_v6  ;;  %v2923_v57 = vmul.f32 0.35355338, %v2899_v3 }
 0x93b   :  { %2949 = vmax.xlane.f32.xlu0 %v2948_v34  ;;  %v2996_v34 = vsel %vm1064_vm6, %v6445_v48, -inf }
 0x93c   :  { %v6441_v25 = vadd.f32 %v4712_v54, %v2918_v45  ;;  %v6443_v41 = vadd.f32 %v4712_v54, %v2923_v57 }
 0x93d   :  { %v2710_v12 = vpop.f32.mrf.mxu2  ;;  %v2772_v14 = vpop.f32.mrf.mxu3 }
 0x93e   :  { %v2907_v16 = vmul.f32 0.35355338, %v2710_v12  ;;  %v2912_v13 = vmul.f32 0.35355338, %v2772_v14  ;;  %v2984_v55 = vsel %vm1064_vm6, %v6441_v25, -inf  ;;  %v2999_v38 = vsel %vm1064_vm6, %v6443_v41, -inf }
 0x940   :  { %v6403_v36 = vadd.f32 %v4711_v63, %v2907_v16  ;;  %v6411_v32 = vadd.f32 %v4711_v63, %v2912_v13 }
 0x941   :  { %v2902_v1 = vpop.f32.mrf.mxu1  ;;  %v2840_v30 = vpop.f32.mrf.mxu0 }
 0x942   :  { %2964 = vmax.xlane.f32.xlu1 %v2963_v4  ;;  %v2951_v21 = vsel %vm1064_vm6, %v6403_v36, -inf  ;;  %v2966_v23 = vsel %vm1064_vm6, %v6411_v32, -inf  ;;  %v2924_v11 = vmul.f32 0.35355338, %v2902_v1  ;;  %v2919_v47 = vmul.f32 0.35355338, %v2840_v30 }
 0x943   :  { %2994 = vmax.xlane.f32.xlu0 %v2993_v9  ;;  %2952 = vmax.xlane.f32.xlu2 %v2951_v21 }
 0x944   :  { %v6453_v18 = vadd.f32 %v4713_v46, %v2924_v11  ;;  %v6455_v12 = vadd.f32 %v4713_v46, %v2919_v47 }
 0x945   :  { %v2713_v58 = vpop.f32.mrf.mxu2  ;;  %v2775_v62 = vpop.f32.mrf.mxu3 }
 0x946   :  { %v2908_v56 = vmul.f32 0.35355338, %v2713_v58  ;;  %v2913_v61 = vmul.f32 0.35355338, %v2775_v62  ;;  %v3002_v14 = vsel %vm1077_vm7, %v6453_v18, -inf  ;;  %v2987_v16 = vsel %vm1077_vm7, %v6455_v12, -inf }
 0x948   :  { %v6416_v59 = vadd.f32 %v4712_v54, %v2913_v61  ;;  %v6418_v40 = vadd.f32 %v4712_v54, %v2908_v56 }
 0x94a   :  { %2967 = vmax.xlane.f32.xlu1 %v2966_v23  ;;  %v2969_v28 = vsel %vm1064_vm6, %v6416_v59, -inf  ;;  %v2954_v43 = vsel %vm1064_vm6, %v6418_v40, -inf }
 0x94b   :  { %2970 = vmax.xlane.f32.xlu2 %v2969_v28  ;;  %2955 = vmax.xlane.f32.xlu0 %v2954_v43 }
 0x94d   :  { %v2716_v50 = vpop.f32.mrf.mxu2  ;;  %v2778_v51 = vpop.f32.mrf.mxu3 }
 0x94e   :  { %v2909_v37 = vmul.f32 0.35355338, %v2716_v50  ;;  %v2914_v15 = vmul.f32 0.35355338, %v2778_v51 }
 0x950   :  { %v6431_v33 = vadd.f32 %v4713_v46, %v2914_v15  ;;  %v6433_v2 = vadd.f32 %v4713_v46, %v2909_v37 }
 0x952   :  { %v2972_v20 = vsel %vm1077_vm7, %v6431_v33, -inf  ;;  %v2957_v17 = vsel %vm1077_vm7, %v6433_v2, -inf }
 0x953   :  { %2982 = vmax.xlane.f32.xlu2 %v2981_v42  ;;  %2973 = vmax.xlane.f32.xlu0 %v2972_v20 }
 0x954   :  { %2958 = vmax.xlane.f32.xlu1 %v2957_v17 }
 0x95b   :  { %2985 = vmax.xlane.f32.xlu2 %v2984_v55  ;;  %3000 = vmax.xlane.f32.xlu0 %v2999_v38 }
 0x95c   :  { %2997 = vmax.xlane.f32.xlu1 %v2996_v34 }
 0x963   :  { %3003 = vmax.xlane.f32.xlu2 %v3002_v14 }
 0x964   :  { %2988 = vmax.xlane.f32.xlu1 %v2987_v16 }
 0x99a   :  { %v2977_v4 = vpop.xlane.xlu0 %2976 }
 0x9a5   :  { %v2962_v63 = vpop.xlane.xlu2 %2961  ;;  %v2947_v13 = vpop.xlane.xlu1 %2946 }
 0x9a6   :  { %v3010_v44 = vsub.f32 %v6373_v8, %v2962_v63  ;;  %v3005_v9 = vsub.f32 %v6375_v5, %v2947_v13  ;;  %v3015_v5 = vsub.f32 %v6369_v53, %v2977_v4 }
 0x9a8   :  { %v3035_v21 = vmul.f32 1.442695, %v3010_v44  ;;  %v3025_v52 = vmul.f32 1.442695, %v3005_v9 }
 0x9aa   :  { %4598 = vpow2.f32 %v3035_v21 }
 0x9ab   :  { %4600 = vpow2.f32 %v3025_v52 }
 0x9ad   :  { %v2992_v58 = vpop.xlane.xlu2 %2991  ;;  %v2980_v62 = vpop.xlane.xlu1 %2979 }
 0x9ae   :  { %v3020_v56 = vsub.f32 %v6381_v10, %v2992_v58  ;;  %v3016_v61 = vsub.f32 %v6386_v49, %v2980_v62  ;;  %v2950_v54 = vpop.xlane.xlu0 %2949  ;;  %v3045_v49 = vmul.f32 1.442695, %v3015_v5 }
 0x9af   :  { %v3006_v27 = vsub.f32 %v6388_v60, %v2950_v54 }
 0x9b0   :  { %v6466_v23 = vpop.eup %4598  ;;  %v3055_v28 = vmul.f32 1.442695, %v3020_v56  ;;  %v3047_v43 = vmul.f32 1.442695, %v3016_v61 }
 0x9b1   :  { %v6468_v8 = vpop.eup %4600  ;;  %v3027_v3 = vmul.f32 1.442695, %v3006_v27  ;;  %v3080_v50 = vsel %vm1064_vm6, %v6466_v23, 0.0 }
 0x9b2   :  { %4602 = vpow2.f32 %v3055_v28  ;;  %v3065_v10 = vsel %vm1064_vm6, %v6468_v8, 0.0  ;;  %3081 = vadd.xlane.f32.xlu1 %v3080_v50 }
 0x9b3   :  { %4604 = vpow2.f32 %v3047_v43  ;;  %3066 = vadd.xlane.f32.xlu0 %v3065_v10 }
 0x9b4   :  { %4606 = vpow2.f32 %v3027_v3 }
 0x9b5   :  { %v2965_v60 = vpop.xlane.xlu1 %2964  ;;  %4608 = vpow2.f32 %v3045_v49 }
 0x9b6   :  { %v3011_v51 = vsub.f32 %v6396_v19, %v2965_v60  ;;  %v2995_v6 = vpop.xlane.xlu0 %2994  ;;  %v2953_v37 = vpop.xlane.xlu2 %2952 }
 0x9b7   :  { %v3007_v53 = vsub.f32 %v6403_v36, %v2953_v37 }
 0x9b8   :  { %v6477_v15 = vpop.eup %4602  ;;  %v3037_v46 = vmul.f32 1.442695, %v3011_v51 }
 0x9b9   :  { %v6479_v42 = vpop.eup %4604  ;;  %v3029_v45 = vmul.f32 1.442695, %v3007_v53  ;;  %v3110_v57 = vsel %vm1064_vm6, %v6477_v15, 0.0 }
 0x9ba   :  { %v6483_v20 = vpop.eup %4606  ;;  %4610 = vpow2.f32 %v3037_v46  ;;  %v3098_v19 = vsel %vm1064_vm6, %v6479_v42, 0.0  ;;  %3111 = vadd.xlane.f32.xlu1 %v3110_v57 }
 0x9bb   :  { %v3068_v36 = vsel %vm1064_vm6, %v6483_v20, 0.0  ;;  %3099 = vadd.xlane.f32.xlu0 %v3098_v19  ;;  %4612 = vpow2.f32 %v3029_v45  ;;  %v6490_v11 = vpop.eup %4608 }
 0x9bc   :  { %3069 = vadd.xlane.f32.xlu2 %v3068_v36  ;;  %v3095_v4 = vsel %vm1064_vm6, %v6490_v11, 0.0 }
 0x9bd   :  { %v2968_v17 = vpop.xlane.xlu1 %2967 }
 0x9be   :  { %v3012_v0 = vsub.f32 %v6411_v32, %v2968_v17  ;;  %v2971_v1 = vpop.xlane.xlu2 %2970  ;;  %v2956_v30 = vpop.xlane.xlu0 %2955  ;;  %v3021_v32 = vsub.f32 %v6398_v39, %v2995_v6 }
 0x9bf   :  { %v3013_v55 = vsub.f32 %v6416_v59, %v2971_v1  ;;  %v3008_v38 = vsub.f32 %v6418_v40, %v2956_v30 }
 0x9c0   :  { %v6494_v47 = vpop.eup %4610  ;;  %v3039_v34 = vmul.f32 1.442695, %v3012_v0  ;;  %v3057_v40 = vmul.f32 1.442695, %v3021_v32 }
 0x9c1   :  { %v3041_v14 = vmul.f32 1.442695, %v3013_v55  ;;  %v3031_v16 = vmul.f32 1.442695, %v3008_v38  ;;  %v3083_v63 = vsel %vm1064_vm6, %v6494_v47, 0.0  ;;  %v6498_v13 = vpop.eup %4612 }
 0x9c2   :  { %4614 = vpow2.f32 %v3039_v34  ;;  %v3071_v59 = vsel %vm1064_vm6, %v6498_v13, 0.0 }
 0x9c3   :  { %4616 = vpow2.f32 %v3041_v14  ;;  %3084 = vadd.xlane.f32.xlu0 %v3083_v63  ;;  %3072 = vadd.xlane.f32.xlu1 %v3071_v59 }
 0x9c4   :  { %4618 = vpow2.f32 %v3031_v16  ;;  %3096 = vadd.xlane.f32.xlu2 %v3095_v4 }
 0x9c5   :  { %4620 = vpow2.f32 %v3057_v40 }
 0x9c6   :  { %v2983_v44 = vpop.xlane.xlu2 %2982  ;;  %v2974_v9 = vpop.xlane.xlu0 %2973 }
 0x9c7   :  { %v3017_v21 = vsub.f32 %v6426_v31, %v2983_v44  ;;  %v2959_v52 = vpop.xlane.xlu1 %2958  ;;  %v3014_v27 = vsub.f32 %v6431_v33, %v2974_v9 }
 0x9c8   :  { %v6506_v58 = vpop.eup %4614  ;;  %v3009_v39 = vsub.f32 %v6433_v2, %v2959_v52 }
 0x9c9   :  { %v6509_v62 = vpop.eup %4616  ;;  %v3049_v56 = vmul.f32 1.442695, %v3017_v21  ;;  %v3086_v61 = vsel %vm1064_vm6, %v6506_v58, 0.0  ;;  %v3043_v43 = vmul.f32 1.442695, %v3014_v27 }
 0x9ca   :  { %v6513_v54 = vpop.eup %4618  ;;  %v3033_v28 = vmul.f32 1.442695, %v3009_v39  ;;  %v3089_v31 = vsel %vm1064_vm6, %v6509_v62, 0.0 }
 0x9cb   :  { %4622 = vpow2.f32 %v3049_v56  ;;  %3087 = vadd.xlane.f32.xlu0 %v3086_v61  ;;  %v3074_v2 = vsel %vm1064_vm6, %v6513_v54, 0.0  ;;  %3090 = vadd.xlane.f32.xlu1 %v3089_v31  ;;  %v6521_v49 = vpop.eup %4620 }
 0x9cc   :  { %3075 = vadd.xlane.f32.xlu2 %v3074_v2  ;;  %4624 = vpow2.f32 %v3033_v28 }
 0x9cd   :  { %4626 = vpow2.f32 %v3043_v43 }
 0x9ce   :  { %v2986_v5 = vpop.xlane.xlu2 %2985  ;;  %v3001_v50 = vpop.xlane.xlu0 %3000 }
 0x9cf   :  { %v3018_v3 = vsub.f32 %v6441_v25, %v2986_v5  ;;  %v2998_v10 = vpop.xlane.xlu1 %2997  ;;  %v3023_v6 = vsub.f32 %v6443_v41, %v3001_v50  ;;  %v3113_v25 = vsel %vm1064_vm6, %v6521_v49, 0.0 }
 0x9d0   :  { %v3022_v33 = vsub.f32 %v6445_v48, %v2998_v10 }
 0x9d1   :  { %v6524_v60 = vpop.eup %4622  ;;  %v3051_v51 = vmul.f32 1.442695, %v3018_v3  ;;  %v3061_v45 = vmul.f32 1.442695, %v3023_v6 }
 0x9d2   :  { %v3059_v37 = vmul.f32 1.442695, %v3022_v33  ;;  %v3101_v53 = vsel %vm1064_vm6, %v6524_v60, 0.0  ;;  %v6529_v46 = vpop.eup %4624 }
 0x9d3   :  { %4628 = vpow2.f32 %v3051_v51  ;;  %3102 = vadd.xlane.f32.xlu1 %v3101_v53  ;;  %v3077_v48 = vsel %vm1077_vm7, %v6529_v46, 0.0  ;;  %v6536_v36 = vpop.eup %4626 }
 0x9d4   :  { %3114 = vadd.xlane.f32.xlu2 %v3113_v25  ;;  %4630 = vpow2.f32 %v3059_v37  ;;  %3078 = vadd.xlane.f32.xlu0 %v3077_v48  ;;  %v3092_v34 = vsel %vm1077_vm7, %v6536_v36, 0.0 }
 0x9d5   :  { %4632 = vpow2.f32 %v3061_v45 }
 0x9d6   :  { %v3004_v57 = vpop.xlane.xlu2 %3003 }
 0x9d7   :  { %v3024_v41 = vsub.f32 %v6453_v18, %v3004_v57  ;;  %v2989_v19 = vpop.xlane.xlu1 %2988 }
 0x9d8   :  { %v3019_v17 = vsub.f32 %v6455_v12, %v2989_v19 }
 0x9d9   :  { %v6539_v0 = vpop.eup %4628  ;;  %v3063_v1 = vmul.f32 1.442695, %v3024_v41 }
 0x9da   :  { %v3053_v30 = vmul.f32 1.442695, %v3019_v17  ;;  %v3104_v55 = vsel %vm1064_vm6, %v6539_v0, 0.0  ;;  %v6543_v38 = vpop.eup %4630 }
 0x9db   :  { %4634 = vpow2.f32 %v3063_v1  ;;  %3105 = vadd.xlane.f32.xlu1 %v3104_v55  ;;  %v3116_v18 = vsel %vm1064_vm6, %v6543_v38, 0.0  ;;  %v6549_v12 = vpop.eup %4632 }
 0x9dc   :  { %4636 = vpow2.f32 %v3053_v30  ;;  %3093 = vadd.xlane.f32.xlu2 %v3092_v34  ;;  %3117 = vadd.xlane.f32.xlu0 %v3116_v18  ;;  %v3119_v32 = vsel %vm1064_vm6, %v6549_v12, 0.0 }
 0x9e1   :  { %v6551_v14 = vpop.eup %4634 }
 0x9e2   :  { %v6553_v16 = vpop.eup %4636  ;;  %v3122_v63 = vsel %vm1077_vm7, %v6551_v14, 0.0 }
 0x9e3   :  { %v3107_v4 = vsel %vm1077_vm7, %v6553_v16, 0.0  ;;  %3123 = vadd.xlane.f32.xlu1 %v3122_v63 }
 0x9e4   :  { %3120 = vadd.xlane.f32.xlu2 %v3119_v32  ;;  %3108 = vadd.xlane.f32.xlu0 %v3107_v4 }
 0xa25   :  { %v3082_v59 = vpop.xlane.xlu1 %3081 }
 0xa26   :  { %v3067_v40 = vpop.xlane.xlu0 %3066  ;;  %4638 = vrcp.f32 %v3082_v59 }
 0xa27   :  { %4640 = vrcp.f32 %v3067_v40 }
 0xa2c   :  { %v4639_v44 = vpop.eup %4638 }
 0xa2d   :  { %v4641_v9 = vpop.eup %4640  ;;  %v3150_v21 = vmul.f32 %v4639_v44, %v6466_v23  ;;  %v3112_v52 = vpop.xlane.xlu1 %3111 }
 0xa2e   :  { %v3145_v39 = vmul.f32 %v4641_v9, %v6468_v8  ;;  %v3100_v56 = vpop.xlane.xlu0 %3099  ;;  %4642 = vrcp.f32 %v3112_v52 }
 0xa2f   :  { %v3070_v61 = vpop.xlane.xlu2 %3069  ;;  %4366 = vmatmul.msk.f32.vlgmr.msrb.gmra.mxu3 %vm1064_vm6, %v3150_v21 }
 0xa30   :  { %4644 = vrcp.f32 %v3070_v61  ;;  %4360 = vmatmul.msk.f32.vlgmr.msrb.gmra.mxu2 %vm1064_vm6, %v3145_v39 }
 0xa34   :  { %v4643_v27 = vpop.eup %4642 }
 0xa35   :  { %v3160_v28 = vmul.f32 %v4643_v27, %v6477_v15 }
 0xa36   :  { %v4645_v31 = vpop.eup %4644  ;;  %v3085_v2 = vpop.xlane.xlu0 %3084 }
 0xa37   :  { %v3097_v43 = vpop.xlane.xlu2 %3096  ;;  %4646 = vrcp.f32 %v3085_v2  ;;  %v3073_v5 = vpop.xlane.xlu1 %3072  ;;  %v3146_v23 = vmul.f32 %v4645_v31, %v6483_v20  ;;  %4378 = vmatmul.msk.f32.vlgmr.msra.gmra.mxu1 %vm1064_vm6, %v3160_v28 }
 0xa38   :  { %4648 = vrcp.f32 %v3097_v43 }
 0xa39   :  { %4650 = vrcp.f32 %v3073_v5  ;;  %4361 = vmatmul.msk.f32.gmra.mxu2 %vm1064_vm6, %v3146_v23 }
 0xa3a   :  { %4652 = vrcp.f32 %v3100_v56 }
 0xa3d   :  { %v4647_v8 = vpop.eup %4646 }
 0xa3e   :  { %v4649_v3 = vpop.eup %4648  ;;  %v3088_v50 = vpop.xlane.xlu0 %3087  ;;  %v3151_v10 = vmul.f32 %v4647_v8, %v6494_v47 }
 0xa3f   :  { %v4651_v15 = vpop.eup %4650  ;;  %v3155_v33 = vmul.f32 %v4649_v3, %v6490_v11  ;;  %v3076_v51 = vpop.xlane.xlu2 %3075  ;;  %4654 = vrcp.f32 %v3088_v50 }
 0xa40   :  { %v3091_v6 = vpop.xlane.xlu1 %3090  ;;  %4656 = vrcp.f32 %v3076_v51  ;;  %v3147_v20 = vmul.f32 %v4651_v15, %v6498_v13  ;;  %4367 = vmatmul.msk.f32.gmra.mxu3 %vm1064_vm6, %v3151_v10  ;;  %v4653_v37 = vpop.eup %4652 }
 0xa41   :  { %4372 = vmatmul.msk.f32.vlgmr.msrb.gmra.mxu0 %vm1064_vm6, %v3155_v33  ;;  %4658 = vrcp.f32 %v3091_v6  ;;  %v3156_v57 = vmul.f32 %v4653_v37, %v6479_v42  ;;  %v4396_v42 = vld [vmem:[%s6820_s10 + $0x30] sm:$0xff] }
 0xa42   :  { %4362 = vmatmul.msk.f32.gmra.mxu2 %vm1064_vm6, %v3147_v20  ;;  %3510 = vmatpush.msra.mxu0 %v4396_v42 }
 0xa45   :  { %v4655_v53 = vpop.eup %4654 }
 0xa46   :  { %v4657_v25 = vpop.eup %4656  ;;  %v3152_v47 = vmul.f32 %v4655_v53, %v6506_v58  ;;  %v4384_v58 = vld [vmem:[%s6820_s10 + $0x20] sm:$0xff] }
 0xa47   :  { %v3115_v48 = vpop.xlane.xlu2 %3114  ;;  %v3148_v45 = vmul.f32 %v4657_v25, %v6513_v54  ;;  %v3079_v13 = vpop.xlane.xlu0 %3078  ;;  %v4390_v54 = vld [vmem:[%s6820_s10 + $0x28] sm:$0xff]  ;;  %3399 = vmatpush.msra.mxu2 %v4384_v58  ;;  %v4482_v53 = vld [vmem:[%s6821_s11 + $0x1] ss:$0 sm:$0xff] }
 0xa48   :  { %v3103_v11 = vpop.xlane.xlu1 %3102  ;;  %4660 = vrcp.f32 %v3115_v48  ;;  %4368 = vmatmul.msk.f32.gmra.mxu3 %vm1064_vm6, %v3152_v47  ;;  %v4659_v41 = vpop.eup %4658 }
 0xa49   :  { %4662 = vrcp.f32 %v3079_v13  ;;  %4373 = vmatmul.msk.f32.gmra.mxu0 %vm1064_vm6, %v3156_v57  ;;  %3456 = vmatpush.msra.mxu3 %v4390_v54  ;;  %v3153_v17 = vmul.f32 %v4659_v41, %v6509_v62 }
 0xa4a   :  { %4664 = vrcp.f32 %v3103_v11  ;;  %4363 = vmatmul.msk.f32.gmra.mxu2 %vm1064_vm6, %v3148_v45 }
 0xa4e   :  { %v4661_v19 = vpop.eup %4660 }
 0xa4f   :  { %v4663_v1 = vpop.eup %4662  ;;  %v3094_v30 = vpop.xlane.xlu2 %3093  ;;  %v3161_v34 = vmul.f32 %v4661_v19, %v6521_v49 }
 0xa50   :  { %v3106_v55 = vpop.xlane.xlu1 %3105  ;;  %v4665_v18 = vpop.eup %4664  ;;  %4666 = vrcp.f32 %v3094_v30  ;;  %v3149_v32 = vmul.f32 %v4663_v1, %v6529_v46  ;;  %4369 = vmatmul.msk.f32.gmra.mxu3 %vm1064_vm6, %v3153_v17 }
 0xa51   :  { %v3118_v63 = vpop.xlane.xlu0 %3117  ;;  %v3157_v4 = vmul.f32 %v4665_v18, %v6524_v60  ;;  %4379 = vmatmul.msk.f32.gmra.mxu1 %vm1064_vm6, %v3161_v34 }
 0xa52   :  { %4668 = vrcp.f32 %v3118_v63  ;;  %4364 = vmatmul.msk.f32.gmra.mxu2 %vm1064_vm6, %v3149_v32 }
 0xa53   :  { %4670 = vrcp.f32 %v3106_v55  ;;  %4374 = vmatmul.msk.f32.gmra.mxu0 %vm1064_vm6, %v3157_v4 }
 0xa56   :  { %v4667_v62 = vpop.eup %4666 }
 0xa57   :  { %v3121_v49 = vpop.xlane.xlu2 %3120  ;;  %v3154_v40 = vmul.f32 %v4667_v62, %v6536_v36 }
 0xa58   :  { %v4669_v59 = vpop.eup %4668  ;;  %4672 = vrcp.f32 %v3121_v49  ;;  %v3124_v21 = vpop.xlane.xlu1 %3123 }
 0xa59   :  { %v4671_v44 = vpop.eup %4670  ;;  %v3109_v46 = vpop.xlane.xlu0 %3108  ;;  %v3162_v9 = vmul.f32 %v4669_v59, %v6543_v38  ;;  %4370 = vmatmul.msk.f32.gmra.mxu3 %vm1064_vm6, %v3154_v40 }
 0xa5a   :  { %4674 = vrcp.f32 %v3109_v46  ;;  %v3158_v60 = vmul.f32 %v4671_v44, %v6539_v0  ;;  %v4402_v0 = vld [vmem:[%s6820_s10 + $0x38] sm:$0xff] }
 0xa5b   :  { %4380 = vmatmul.msk.f32.gmra.mxu1 %vm1064_vm6, %v3162_v9  ;;  %4676 = vrcp.f32 %v3124_v21 }
 0xa5c   :  { %4375 = vmatmul.msk.f32.gmra.mxu0 %vm1064_vm6, %v3158_v60  ;;  %3564 = vmatpush.msrb.mxu1 %v4402_v0 }
 0xa5e   :  { %v4673_v52 = vpop.eup %4672 }
 0xa5f   :  { %v3163_v36 = vmul.f32 %v4673_v52, %v6549_v12 }
 0xa60   :  { %v4675_v39 = vpop.eup %4674 }
 0xa61   :  { %v3159_v56 = vmul.f32 %v4675_v39, %v6553_v16  ;;  %v4677_v38 = vpop.eup %4676 }
 0xa62   :  { %v3164_v61 = vmul.f32 %v4677_v38, %v6551_v14 }
 0xa63   :  { %4381 = vmatmul.msk.f32.gmra.mxu1 %vm1064_vm6, %v3163_v36 }
 0xa64   :  { %4376 = vmatmul.msk.f32.gmra.mxu0 %vm1064_vm6, %v3159_v56 }
 0xa6b   :  { %4382 = vmatmul.msk.f32.gmra.mxu1 %vm1064_vm6, %v3164_v61 }
 0xab2   :  { %v3250_v27 = vpop.f32.mrf.mxu3 }
 0xab3   :  { %v3200_v28 = vpop.f32.mrf.mxu2  ;;  %4391 = vmatmul.msk.f32.vlgmr.msra.gmra.mxu3 %vm775_vm4, %v3250_v27 }
 0xab4   :  { %4385 = vmatmul.msk.f32.vlgmr.msra.gmra.mxu2 %vm775_vm4, %v3200_v28  ;;  %v3350_v12 = vpop.f32.mrf.mxu1 }
 0xab5   :  { %4403 = vmatmul.msk.f32.vlgmr.msrb.gmra.mxu1 %vm775_vm4, %v3350_v12 }
 0xabc   :  { %v3203_v16 = vpop.f32.mrf.mxu2 }
 0xabd   :  { %4386 = vmatmul.msk.f32.gmra.mxu2 %vm775_vm4, %v3203_v16 }
 0xabe   :  { %v3300_v14 = vpop.f32.mrf.mxu0 }
 0xabf   :  { %4397 = vmatmul.msk.f32.vlgmr.msra.gmra.mxu0 %vm775_vm4, %v3300_v14 }
 0xac3   :  { %v3253_v31 = vpop.f32.mrf.mxu3 }
 0xac4   :  { %4392 = vmatmul.msk.f32.gmra.mxu3 %vm775_vm4, %v3253_v31 }
 0xac5   :  { %v3206_v2 = vpop.f32.mrf.mxu2 }
 0xac6   :  { %4387 = vmatmul.msk.f32.gmra.mxu2 %vm775_vm4, %v3206_v2  ;;  %v3303_v43 = vpop.f32.mrf.mxu0 }
 0xac7   :  { %4398 = vmatmul.msk.f32.gmra.mxu0 %vm775_vm4, %v3303_v43 }
 0xacb   :  { %v3256_v5 = vpop.f32.mrf.mxu3 }
 0xacc   :  { %4393 = vmatmul.msk.f32.gmra.mxu3 %vm775_vm4, %v3256_v5 }
 0xacd   :  { %v3209_v23 = vpop.f32.mrf.mxu2 }
 0xace   :  { %4388 = vmatmul.msk.f32.gmra.mxu2 %vm775_vm4, %v3209_v23  ;;  %v3353_v8 = vpop.f32.mrf.mxu1 }
 0xacf   :  { %4404 = vmatmul.msk.f32.gmra.mxu1 %vm775_vm4, %v3353_v8 }
 0xad0   :  { %v3306_v3 = vpop.f32.mrf.mxu0 }
 0xad1   :  { %4399 = vmatmul.msk.f32.gmra.mxu0 %vm775_vm4, %v3306_v3 }
 0xad3   :  { %v3259_v50 = vpop.f32.mrf.mxu3 }
 0xad4   :  { %4394 = vmatmul.msk.f32.gmra.mxu3 %vm775_vm4, %v3259_v50 }
 0xad5   :  { %v3212_v10 = vpop.f32.mrf.mxu2 }
 0xad6   :  { %4389 = vmatmul.msk.f32.gmra.mxu2 %vm775_vm4, %v3212_v10 }
 0xad8   :  { %v3356_v15 = vpop.f32.mrf.mxu1 }
 0xad9   :  { %v3309_v33 = vpop.f32.mrf.mxu0  ;;  %4405 = vmatmul.msk.f32.gmra.mxu1 %vm775_vm4, %v3356_v15 }
 0xada   :  { %4400 = vmatmul.msk.f32.gmra.mxu0 %vm775_vm4, %v3309_v33 }
 0xadc   :  { %v3262_v51 = vpop.f32.mrf.mxu3 }
 0xadd   :  { %4395 = vmatmul.msk.f32.gmra.mxu3 %vm775_vm4, %v3262_v51 }
 0xae0   :  { %v3359_v6 = vpop.f32.mrf.mxu1 }
 0xae1   :  { %v3312_v20 = vpop.f32.mrf.mxu0  ;;  %4406 = vmatmul.msk.f32.gmra.mxu1 %vm775_vm4, %v3359_v6 }
 0xae2   :  { %4401 = vmatmul.msk.f32.gmra.mxu0 %vm775_vm4, %v3312_v20 }
 0xae8   :  { %v3362_v37 = vpop.f32.mrf.mxu1 }
 0xae9   :  { %4407 = vmatmul.msk.f32.gmra.mxu1 %vm775_vm4, %v3362_v37 }
 0xb32   :  { %v3566_v13 = vpop.f32.mrf.mxu1 }
 0xb36   :  { %v3458_v48 = vpop.f32.mrf.mxu3 }
 0xb37   :  { %v3401_v25 = vpop.f32.mrf.mxu2 }
 0xb38   :  { %v3419_v47 = vadd.f32 %v4482_v53, %v3401_v25 }
 0xb3a   :  { %v3473_v11 = vadd.f32 %v3458_v48, %v3419_v47 }
 0xb3c   :  { %v3512_v45 = vpop.f32.mrf.mxu0 }
 0xb3d   :  { %v3527_v57 = vadd.f32 %v3512_v45, %v3473_v11 }
 0xb3f   :  { %v3581_v58 = vadd.f32 %v3566_v13, %v3527_v57 }
 0xb40   :  { %v3404_v54 = vpop.f32.mrf.mxu2 }
 0xb41   :  { %v6637_v42 = vadd.f32 %v3581_v58, %v5803_v35  ;;  %v3420_v17 = vadd.f32 %v4482_v53, %v3404_v54 }
 0xb43   :  { %v3591_v41 = vsel %vm80_vm1, %v6637_v42, 0.0 }
 0xb44   :  { %v3515_v19 = vpop.f32.mrf.mxu0  ;;  %3592 = vadd.xlane.f32.xlu2 %v3591_v41 }
 0xb47   :  { %v3461_v1 = vpop.f32.mrf.mxu3 }
 0xb48   :  { %v3474_v30 = vadd.f32 %v3461_v1, %v3420_v17  ;;  %v4411_v1 = vld [vmem:[%s6823_s12 + $0x38] sm:$0xff] }
 0xb49   :  { %v3407_v55 = vpop.f32.mrf.mxu2  ;;  %3750 = vmatpush.msrb.mxu2 %v4411_v1 }
 0xb4a   :  { %v3528_v34 = vadd.f32 %v3515_v19, %v3474_v30  ;;  %v3421_v32 = vadd.f32 %v4482_v53, %v3407_v55  ;;  %v4410_v30 = vld [vmem:[%s6823_s12 + $0x30] sm:$0xff]  ;;  %v4409_v55 = vld [vmem:[%s6823_s12 + $0x28] sm:$0xff] }
 0xb4b   :  { %3751 = vmatpush.msrb.mxu2 %v4410_v30 }
 0xb4c   :  { %v3569_v18 = vpop.f32.mrf.mxu1 }
 0xb4d   :  { %v3582_v63 = vadd.f32 %v3569_v18, %v3528_v34  ;;  %3752 = vmatpush.msrb.mxu2 %v4409_v55  ;;  %v4408_v34 = vld [vmem:[%s6823_s12 + $0x20] sm:$0xff] }
 0xb4e   :  { %v3518_v4 = vpop.f32.mrf.mxu0 }
 0xb4f   :  { %v6642_v62 = vadd.f32 %v3582_v63, %v5808_v22  ;;  %v3464_v59 = vpop.f32.mrf.mxu3  ;;  %3753 = vmatpush.msrb.mxu2 %v4408_v34 }
 0xb50   :  { %v3475_v35 = vadd.f32 %v3464_v59, %v3421_v32 }
 0xb51   :  { %v3594_v49 = vsel %vm80_vm1, %v6642_v62, 0.0  ;;  %v3410_v40 = vpop.f32.mrf.mxu2 }
 0xb52   :  { %3595 = vadd.xlane.f32.xlu0 %v3594_v49  ;;  %v3529_v44 = vadd.f32 %v3518_v4, %v3475_v35  ;;  %v3422_v9 = vadd.f32 %v4482_v53, %v3410_v40 }
 0xb56   :  { %v3572_v46 = vpop.f32.mrf.mxu1 }
 0xb57   :  { %v3583_v60 = vadd.f32 %v3572_v46, %v3529_v44  ;;  %v3467_v21 = vpop.f32.mrf.mxu3  ;;  %v3521_v52 = vpop.f32.mrf.mxu0 }
 0xb58   :  { %v3476_v36 = vadd.f32 %v3467_v21, %v3422_v9  ;;  %v4714_v21 = vld [vmem:[%s6814_s3 + $0x4] sm:$0xf] }
 0xb59   :  { %v6647_v39 = vadd.f32 %v3583_v60, %v5813_v29  ;;  %v3413_v38 = vpop.f32.mrf.mxu2 }
 0xb5a   :  { %v3530_v56 = vadd.f32 %v3521_v52, %v3476_v36  ;;  %v3423_v27 = vadd.f32 %v4482_v53, %v3413_v38  ;;  %v6709_v52 = vperm.slane %v4714_v21, 2 }
 0xb5b   :  { %v3597_v22 = vsel %vm80_vm1, %v6647_v39, 0.0 }
 0xb5c   :  { %3598 = vadd.xlane.f32.xlu1 %v3597_v22  ;;  %v6711_v22 = vperm.slane %v4714_v21, 3 }
 0xb5e   :  { %v3575_v61 = vpop.f32.mrf.mxu1 }
 0xb5f   :  { %v3584_v0 = vadd.f32 %v3575_v61, %v3530_v56  ;;  %v3524_v14 = vpop.f32.mrf.mxu0 }
 0xb60   :  { %v3470_v12 = vpop.f32.mrf.mxu3 }
 0xb61   :  { %v6652_v28 = vadd.f32 %v3584_v0, %v5818_v7  ;;  %v3477_v16 = vadd.f32 %v3470_v12, %v3423_v27 }
 0xb63   :  { %v3600_v29 = vsel %vm80_vm1, %v6652_v28, 0.0  ;;  %v3531_v31 = vadd.f32 %v3524_v14, %v3477_v16 }
 0xb64   :  { %3601 = vadd.xlane.f32.xlu2 %v3600_v29 }
 0xb66   :  { %v3578_v2 = vpop.f32.mrf.mxu1 }
 0xb67   :  { %v3585_v43 = vadd.f32 %v3578_v2, %v3531_v31 }
 0xb69   :  { %v6657_v5 = vadd.f32 %v3585_v43, %v5823_v24 }
 0xb6b   :  { %v3603_v23 = vsel %vm93_vm0, %v6657_v5, 0.0 }
 0xb6c   :  { %3604 = vadd.xlane.f32.xlu0 %v3603_v23 }
 0xbb7   :  { %v3593_v8 = vpop.xlane.xlu2 %3592 }
 0xbb8   :  { %v3606_v7 = vmul.f32 %v3593_v8, %v4861_v26 }
 0xbba   :  { %v3611_v3 = vsub.f32 %v6637_v42, %v3606_v7 }
 0xbbc   :  { %v3616_v50 = vmul.f32 %v3611_v3, %v3611_v3 }
 0xbbe   :  { %v3621_v10 = vsel %vm80_vm1, %v3616_v50, 0.0 }
 0xbbf   :  { %3622 = vadd.xlane.f32.xlu1 %v3621_v10 }
 0xbc5   :  { %v3596_v15 = vpop.xlane.xlu0 %3595 }
 0xbc6   :  { %v3607_v33 = vmul.f32 %v3596_v15, %v4861_v26  ;;  %v4425_v15 = vld [vmem:[%s6824_s14 + $0x78] sm:$0xff] }
 0xbc7   :  { %3807 = vmatpush.msrb.mxu3 %v4425_v15  ;;  %v3848_v15 = vld [vmem:[%s6826_s16 + $0x10] sm:$0xff] }
 0xbc8   :  { %v6666_v51 = vsub.f32 %v6642_v62, %v3607_v33  ;;  %v4424_v33 = vld [vmem:[%s6824_s14 + $0x70] sm:$0xff] }
 0xbc9   :  { %3808 = vmatpush.msrb.mxu3 %v4424_v33  ;;  %v3847_v33 = vld [vmem:[%s6826_s16 + $0x8] sm:$0xff] }
 0xbca   :  { %v3617_v24 = vmul.f32 %v6666_v51, %v6666_v51 }
 0xbcc   :  { %v3624_v6 = vsel %vm80_vm1, %v3617_v24, 0.0 }
 0xbcd   :  { %3625 = vadd.xlane.f32.xlu2 %v3624_v6 }
 0xbcf   :  { %v3599_v20 = vpop.xlane.xlu1 %3598 }
 0xbd0   :  { %v3608_v37 = vmul.f32 %v3599_v20, %v4861_v26  ;;  %v4423_v20 = vld [vmem:[%s6824_s14 + $0x68] sm:$0xff] }
 0xbd1   :  { %3809 = vmatpush.msrb.mxu3 %v4423_v20 }
 0xbd2   :  { %v6673_v53 = vsub.f32 %v6647_v39, %v3608_v37 }
 0xbd4   :  { %v3618_v25 = vmul.f32 %v6673_v53, %v6673_v53 }
 0xbd6   :  { %v3627_v47 = vsel %vm80_vm1, %v3618_v25, 0.0 }
 0xbd7   :  { %v3602_v48 = vpop.xlane.xlu2 %3601  ;;  %3628 = vadd.xlane.f32.xlu0 %v3627_v47 }
 0xbd8   :  { %v3609_v11 = vmul.f32 %v3602_v48, %v4861_v26 }
 0xbda   :  { %v6680_v45 = vsub.f32 %v6652_v28, %v3609_v11  ;;  %v4422_v11 = vld [vmem:[%s6824_s14 + $0x60] sm:$0xff] }
 0xbdb   :  { %3810 = vmatpush.msrb.mxu3 %v4422_v11 }
 0xbdc   :  { %v3619_v57 = vmul.f32 %v6680_v45, %v6680_v45 }
 0xbde   :  { %v3630_v13 = vsel %vm80_vm1, %v3619_v57, 0.0 }
 0xbdf   :  { %3631 = vadd.xlane.f32.xlu1 %v3630_v13  ;;  %v3605_v58 = vpop.xlane.xlu0 %3604 }
 0xbe0   :  { %v3610_v54 = vmul.f32 %v3605_v58, %v4861_v26 }
 0xbe2   :  { %v6687_v41 = vsub.f32 %v6657_v5, %v3610_v54  ;;  %v4421_v54 = vld [vmem:[%s6824_s14 + $0x58] sm:$0xff] }
 0xbe3   :  { %3811 = vmatpush.msrb.mxu3 %v4421_v54 }
 0xbe4   :  { %v3620_v19 = vmul.f32 %v6687_v41, %v6687_v41 }
 0xbe6   :  { %v3633_v17 = vsel %vm93_vm0, %v3620_v19, 0.0 }
 0xbe7   :  { %3634 = vadd.xlane.f32.xlu2 %v3633_v17 }
 0xc32   :  { %v3623_v18 = vpop.xlane.xlu1 %3622 }
 0xc33   :  { %v3636_v63 = vmul.f32 %v3623_v18, %v4861_v26 }
 0xc35   :  { %v3641_v32 = vadd.f32 1e-05, %v3636_v63 }
 0xc37   :  { %4678 = vrsqrt.f32 %v3641_v32  ;;  %vm3652_vm4 = vweird.f32 %v3641_v32 }
 0xc3d   :  { %v4679_v4 = vpop.eup %4678 }
 0xc3e   :  { %v3647_v59 = vmul.f32 %v4679_v4, %v3641_v32  ;;  %vm3653_vm0 = vweird.f32 %v4679_v4 }
 0xc3f   :  { %vm3654_vm5 = vmor %vm3652_vm4, %vm3653_vm0 }
 0xc40   :  { %v3648_v35 = vmul.f32 %v4679_v4, %v3647_v59  ;;  %v3626_v49 = vpop.xlane.xlu2 %3625 }
 0xc41   :  { %v3637_v40 = vmul.f32 %v3626_v49, %v4861_v26 }
 0xc42   :  { %v3649_v44 = vmul.f32 0.5, %v3648_v35 }
 0xc43   :  { %v3642_v46 = vadd.f32 1e-05, %v3637_v40 }
 0xc44   :  { %v3650_v9 = vsub.f32 1.5, %v3649_v44 }
 0xc45   :  { %4680 = vrsqrt.f32 %v3642_v46  ;;  %vm3662_vm7 = vweird.f32 %v3642_v46 }
 0xc46   :  { %v3651_v60 = vmul.f32 %v4679_v4, %v3650_v9 }
 0xc48   :  { %v3655_v36 = vsel %vm3654_vm5, %v4679_v4, %v3651_v60 }
 0xc49   :  { %v3696_v56 = vmul.f32 %v3655_v36, %v3611_v3 }
 0xc4a   :  { %v3629_v38 = vpop.xlane.xlu0 %3628 }
 0xc4b   :  { %v3638_v61 = vmul.f32 %v3629_v38, %v4861_v26  ;;  %v4681_v0 = vpop.eup %4680  ;;  %v3702_v27 = vmul.f32 %v6709_v52, %v3696_v56 }
 0xc4c   :  { %v3657_v12 = vmul.f32 %v4681_v0, %v3642_v46  ;;  %vm3663_vm6 = vweird.f32 %v4681_v0 }
 0xc4d   :  { %v3643_v16 = vadd.f32 1e-05, %v3638_v61  ;;  %v3708_v14 = vadd.f32 %v6711_v22, %v3702_v27  ;;  %vm3664_vm10 = vmor %vm3662_vm7, %vm3663_vm6  ;;  %v4419_v61 = vld [vmem:[%s6824_s14 + $0x48] sm:$0xff] }
 0xc4e   :  { %v3658_v29 = vmul.f32 %v4681_v0, %v3657_v12  ;;  %v3849_v12 = vld [vmem:[%s6826_s16 + $0x18] sm:$0xff] }
 0xc4f   :  { %4682 = vrsqrt.f32 %v3643_v16  ;;  %4413 = vmatmul.msk.f32.vlgmr.msrb.gmra.mxu2 %vm80_vm1, %v3708_v14  ;;  %vm3672_vm12 = vweird.f32 %v3643_v16  ;;  %3881 = vmatpush.msrb.mxu0 %v3849_v12 }
 0xc50   :  { %v3659_v31 = vmul.f32 0.5, %v3658_v29 }
 0xc51   :  { %3882 = vmatpush.msrb.mxu0 %v3848_v15 }
 0xc52   :  { %v3632_v2 = vpop.xlane.xlu1 %3631  ;;  %v3660_v43 = vsub.f32 1.5, %v3659_v31 }
 0xc53   :  { %v3639_v23 = vmul.f32 %v3632_v2, %v4861_v26  ;;  %3883 = vmatpush.msrb.mxu0 %v3847_v33 }
 0xc54   :  { %v3661_v7 = vmul.f32 %v4681_v0, %v3660_v43 }
 0xc55   :  { %v4683_v8 = vpop.eup %4682  ;;  %v3644_v3 = vadd.f32 1e-05, %v3639_v23 }
 0xc56   :  { %v3667_v50 = vmul.f32 %v4683_v8, %v3643_v16  ;;  %v3665_v10 = vsel %vm3664_vm10, %v4681_v0, %v3661_v7  ;;  %vm3673_vm11 = vweird.f32 %v4683_v8  ;;  %v4418_v0 = vld [vmem:[%s6824_s14 + $0x40] sm:$0xff] }
 0xc57   :  { %4684 = vrsqrt.f32 %v3644_v3  ;;  %v3697_v24 = vmul.f32 %v3665_v10, %v6666_v51  ;;  %vm3674_vm14 = vmor %vm3672_vm12, %vm3673_vm11  ;;  %vm3682_vm2 = vweird.f32 %v3644_v3 }
 0xc58   :  { %v3668_v6 = vmul.f32 %v4683_v8, %v3667_v50 }
 0xc59   :  { %v3703_v47 = vmul.f32 %v6709_v52, %v3697_v24  ;;  %v3846_v24 = vld [vmem:[%s6826_s16] sm:$0xff] }
 0xc5a   :  { %v3669_v37 = vmul.f32 0.5, %v3668_v6  ;;  %v3635_v25 = vpop.xlane.xlu2 %3634  ;;  %3884 = vmatpush.msrb.mxu0 %v3846_v24  ;;  %v4484_v6 = vld [vmem:[%s6825_s15 + $0x1] ss:$0 sm:$0xff] }
 0xc5b   :  { %v3640_v48 = vmul.f32 %v3635_v25, %v4861_v26  ;;  %v3709_v51 = vadd.f32 %v6711_v22, %v3703_v47 }
 0xc5c   :  { %v3670_v57 = vsub.f32 1.5, %v3669_v37 }
 0xc5d   :  { %v4685_v13 = vpop.eup %4684  ;;  %v3645_v58 = vadd.f32 1e-05, %v3640_v48  ;;  %4414 = vmatmul.msk.f32.gmra.mxu2 %vm80_vm1, %v3709_v51 }
 0xc5e   :  { %v3671_v19 = vmul.f32 %v4683_v8, %v3670_v57  ;;  %v3677_v17 = vmul.f32 %v4685_v13, %v3644_v3  ;;  %vm3683_vm15 = vweird.f32 %v4685_v13 }
 0xc5f   :  { %4686 = vrsqrt.f32 %v3645_v58  ;;  %vm3684_vm3 = vmor %vm3682_vm2, %vm3683_vm15  ;;  %vm3692_vm9 = vweird.f32 %v3645_v58 }
 0xc60   :  { %v3675_v26 = vsel %vm3674_vm14, %v4683_v8, %v3671_v19  ;;  %v3678_v1 = vmul.f32 %v4685_v13, %v3677_v17 }
 0xc61   :  { %v3698_v30 = vmul.f32 %v3675_v26, %v6673_v53 }
 0xc62   :  { %v3679_v55 = vmul.f32 0.5, %v3678_v1 }
 0xc63   :  { %v3704_v34 = vmul.f32 %v6709_v52, %v3698_v30 }
 0xc64   :  { %v3680_v18 = vsub.f32 1.5, %v3679_v55 }
 0xc65   :  { %v4687_v63 = vpop.eup %4686  ;;  %v3710_v32 = vadd.f32 %v6711_v22, %v3704_v34 }
 0xc66   :  { %v3681_v4 = vmul.f32 %v4685_v13, %v3680_v18  ;;  %v3687_v59 = vmul.f32 %v4687_v63, %v3645_v58  ;;  %vm3693_vm8 = vweird.f32 %v4687_v63 }
 0xc67   :  { %4415 = vmatmul.msk.f32.gmra.mxu2 %vm80_vm1, %v3710_v32  ;;  %vm3694_vm0 = vmor %vm3692_vm9, %vm3693_vm8 }
 0xc68   :  { %v3685_v35 = vsel %vm3684_vm3, %v4685_v13, %v3681_v4  ;;  %v3688_v49 = vmul.f32 %v4687_v63, %v3687_v59 }
 0xc69   :  { %v3699_v40 = vmul.f32 %v3685_v35, %v6680_v45  ;;  %v4420_v45 = vld [vmem:[%s6824_s14 + $0x50] sm:$0xff] }
 0xc6a   :  { %v3689_v44 = vmul.f32 0.5, %v3688_v49  ;;  %3812 = vmatpush.msrb.mxu3 %v4420_v45 }
 0xc6b   :  { %v3705_v53 = vmul.f32 %v6709_v52, %v3699_v40 }
 0xc6c   :  { %v3690_v46 = vsub.f32 1.5, %v3689_v44  ;;  %3813 = vmatpush.msrb.mxu3 %v4419_v61 }
 0xc6d   :  { %v3711_v9 = vadd.f32 %v6711_v22, %v3705_v53 }
 0xc6e   :  { %v3691_v60 = vmul.f32 %v4687_v63, %v3690_v46  ;;  %3814 = vmatpush.msrb.mxu3 %v4418_v0 }
 0xc6f   :  { %4416 = vmatmul.msk.f32.gmra.mxu2 %vm80_vm1, %v3711_v9 }
 0xc70   :  { %v3695_v21 = vsel %vm3694_vm0, %v4687_v63, %v3691_v60 }
 0xc71   :  { %v3700_v36 = vmul.f32 %v3695_v21, %v6687_v41  ;;  %v4483_v41 = vld [vmem:[%s6840_s23 + $0x1] ss:$0 sm:$0xff] }
 0xc73   :  { %v3706_v56 = vmul.f32 %v6709_v52, %v3700_v36 }
 0xc75   :  { %v3712_v38 = vadd.f32 %v6711_v22, %v3706_v56 }
 0xc77   :  { %4417 = vmatmul.msk.f32.gmra.mxu2 %vm80_vm1, %v3712_v38 }
 0xcd2   :  { %v3755_v52 = vpop.f32.mrf.mxu2 }
 0xcd3   :  { %v3756_v22 = vadd.f32 %v4483_v41, %v3755_v52 }
 0xcd5   :  { %v3770_v27 = vmax.f32 %v3756_v22, 0.0 }
 0xcd7   :  { %4426 = vmatmul.msk.f32.vlgmr.msrb.gmra.mxu3 %vm1901_vm13, %v3770_v27 }
 0xce0   :  { %v3758_v16 = vpop.f32.mrf.mxu2 }
 0xce1   :  { %v3759_v14 = vadd.f32 %v4483_v41, %v3758_v16 }
 0xce3   :  { %v3771_v29 = vmax.f32 %v3759_v14, 0.0 }
 0xce5   :  { %4427 = vmatmul.msk.f32.gmra.mxu3 %vm1901_vm13, %v3771_v29 }
 0xcea   :  { %v3761_v31 = vpop.f32.mrf.mxu2 }
 0xceb   :  { %v3762_v2 = vadd.f32 %v4483_v41, %v3761_v31 }
 0xced   :  { %v3772_v43 = vmax.f32 %v3762_v2, 0.0 }
 0xcef   :  { %4428 = vmatmul.msk.f32.gmra.mxu3 %vm1901_vm13, %v3772_v43 }
 0xcf2   :  { %v3764_v23 = vpop.f32.mrf.mxu2 }
 0xcf3   :  { %v3765_v8 = vadd.f32 %v4483_v41, %v3764_v23 }
 0xcf5   :  { %v3773_v7 = vmax.f32 %v3765_v8, 0.0 }
 0xcf7   :  { %4429 = vmatmul.msk.f32.gmra.mxu3 %vm1901_vm13, %v3773_v7 }
 0xcfa   :  { %v3767_v3 = vpop.f32.mrf.mxu2 }
 0xcfb   :  { %v3768_v50 = vadd.f32 %v4483_v41, %v3767_v3 }
 0xcfd   :  { %v3774_v10 = vmax.f32 %v3768_v50, 0.0 }
 0xcff   :  { %4430 = vmatmul.msk.f32.gmra.mxu3 %vm1901_vm13, %v3774_v10 }
 0xd5a   :  { %v3816_v20 = vpop.f32.mrf.mxu3 }
 0xd5b   :  { %v3831_v37 = vadd.f32 %v3816_v20, %v6637_v42 }
 0xd5d   :  { %v3841_v25 = vadd.f32 %v4484_v6, %v3831_v37 }
 0xd5f   :  { %4432 = vmatmul.msk.f32.vlgmr.msrb.gmra.mxu0 %vm80_vm1, %v3841_v25 }
 0xd68   :  { %v3819_v47 = vpop.f32.mrf.mxu3 }
 0xd69   :  { %v3832_v48 = vadd.f32 %v3819_v47, %v6642_v62  ;;  %v4485_v62 = vld [vmem:[%s6827_s17] ss:$0 sm:$0xff] }
 0xd6b   :  { %v3842_v11 = vadd.f32 %v4484_v6, %v3832_v48 }
 0xd6d   :  { %4433 = vmatmul.msk.f32.gmra.mxu0 %vm80_vm1, %v3842_v11 }
 0xd72   :  { %v3822_v57 = vpop.f32.mrf.mxu3 }
 0xd73   :  { %v3833_v51 = vadd.f32 %v3822_v57, %v6647_v39 }
 0xd75   :  { %v3843_v13 = vadd.f32 %v4484_v6, %v3833_v51 }
 0xd77   :  { %4434 = vmatmul.msk.f32.gmra.mxu0 %vm80_vm1, %v3843_v13 }
 0xd7a   :  { %v3825_v58 = vpop.f32.mrf.mxu3 }
 0xd7b   :  { %v3834_v54 = vadd.f32 %v3825_v58, %v6652_v28 }
 0xd7d   :  { %v3844_v19 = vadd.f32 %v4484_v6, %v3834_v54 }
 0xd7f   :  { %4435 = vmatmul.msk.f32.gmra.mxu0 %vm80_vm1, %v3844_v19 }
 0xd82   :  { %v3828_v42 = vpop.f32.mrf.mxu3 }
 0xd83   :  { %v3835_v17 = vadd.f32 %v3828_v42, %v6657_v5 }
 0xd85   :  { %v3845_v26 = vadd.f32 %v4484_v6, %v3835_v17 }
 0xd87   :  { %4436 = vmatmul.msk.f32.gmra.mxu0 %vm80_vm1, %v3845_v26 }
 0xddc   :  { %v3886_v39 = vpop.f32.mrf.mxu0 }
 0xddd   :  { %v3887_v1 = vadd.f32 %v4485_v62, %v3886_v39 }
 0xddf   :  { %v4437_v30 = vmul.f32 -1.442695, %v3887_v1 }
 0xde1   :  { %4688 = vpow2.f32 %v4437_v30 }
 0xde7   :  { %v4689_v55 = vpop.eup %4688 }
 0xde8   :  { %v3916_v34 = vadd.f32 1.0, %v4689_v55 }
 0xdea   :  { %4690 = vrcp.f32 %v3916_v34  ;;  %v3889_v28 = vpop.f32.mrf.mxu0  ;;  %v3932_v35 = vand.u32 2147483648, %v3916_v34  ;;  %v3930_v53 = vand.u32 2147483647, %v3916_v34  ;;  %vm3926_vm13 = vweird.f32 %v3916_v34 }
 0xdeb   :  { %v3890_v18 = vadd.f32 %v4485_v62, %v3889_v28 }
 0xdec   :  { %v3933_v21 = vor.u32 1.1754944e-38, %v3932_v35  ;;  %vm3931_vm5 = vcmp.eq.f32.partialorder %v3930_v53, 8.507059e+37 }
 0xded   :  { %v4438_v63 = vmul.f32 -1.442695, %v3890_v18 }
 0xdef   :  { %4692 = vpow2.f32 %v4438_v63 }
 0xdf0   :  { %v4691_v32 = vpop.eup %4690 }
 0xdf1   :  { %v3922_v5 = vmul.f32 %v4691_v32, %v3916_v34  ;;  %vm3927_vm1 = vweird.f32 %v4691_v32 }
 0xdf2   :  { %vm3928_vm4 = vmor %vm3926_vm13, %vm3927_vm1 }
 0xdf3   :  { %v3923_v4 = vsub.f32 1.0, %v3922_v5 }
 0xdf4   :  { %v3892_v59 = vpop.f32.mrf.mxu0 }
 0xdf5   :  { %v3893_v49 = vadd.f32 %v4485_v62, %v3892_v59  ;;  %v4693_v40 = vpop.eup %4692  ;;  %v3924_v44 = vmul.f32 %v4691_v32, %v3923_v4 }
 0xdf6   :  { %v3917_v46 = vadd.f32 1.0, %v4693_v40 }
 0xdf7   :  { %v4439_v9 = vmul.f32 -1.442695, %v3893_v49  ;;  %v3925_v60 = vadd.f32 %v4691_v32, %v3924_v44 }
 0xdf8   :  { %4694 = vrcp.f32 %v3917_v46  ;;  %v3947_v12 = vand.u32 2147483648, %v3917_v46  ;;  %v3945_v14 = vand.u32 2147483647, %v3917_v46  ;;  %vm3941_vm7 = vweird.f32 %v3917_v46 }
 0xdf9   :  { %v3929_v36 = vsel %vm3928_vm4, %v4691_v32, %v3925_v60  ;;  %4696 = vpow2.f32 %v4439_v9 }
 0xdfa   :  { %v3934_v56 = vsel %vm3931_vm5, %v3933_v21, %v3929_v36  ;;  %v3948_v23 = vor.u32 1.1754944e-38, %v3947_v12  ;;  %vm3946_vm11 = vcmp.eq.f32.partialorder %v3945_v14, 8.507059e+37 }
 0xdfb   :  { %3996 = vst [vmem:[%s6828_s18] sm:$0xff] %v3934_v56 }
 0xdfc   :  { %v3895_v38 = vpop.f32.mrf.mxu0 }
 0xdfd   :  { %v3896_v45 = vadd.f32 %v4485_v62, %v3895_v38 }
 0xdfe   :  { %v4695_v61 = vpop.eup %4694 }
 0xdff   :  { %v4440_v0 = vmul.f32 -1.442695, %v3896_v45  ;;  %v4697_v41 = vpop.eup %4696  ;;  %v3937_v52 = vmul.f32 %v4695_v61, %v3917_v46  ;;  %vm3942_vm6 = vweird.f32 %v4695_v61 }
 0xe00   :  { %v3918_v22 = vadd.f32 1.0, %v4697_v41  ;;  %vm3943_vm10 = vmor %vm3941_vm7, %vm3942_vm6 }
 0xe01   :  { %4698 = vpow2.f32 %v4440_v0  ;;  %v3938_v27 = vsub.f32 1.0, %v3937_v52 }
 0xe02   :  { %4700 = vrcp.f32 %v3918_v22  ;;  %v3962_v24 = vand.u32 2147483648, %v3918_v22  ;;  %v3960_v20 = vand.u32 2147483647, %v3918_v22  ;;  %vm3956_vm14 = vweird.f32 %v3918_v22 }
 0xe03   :  { %v3939_v16 = vmul.f32 %v4695_v61, %v3938_v27 }
 0xe04   :  { %v3898_v29 = vpop.f32.mrf.mxu0  ;;  %v3963_v11 = vor.u32 1.1754944e-38, %v3962_v24  ;;  %vm3961_vm2 = vcmp.eq.f32.partialorder %v3960_v20, 8.507059e+37 }
 0xe05   :  { %v3899_v31 = vadd.f32 %v4485_v62, %v3898_v29  ;;  %v3940_v2 = vadd.f32 %v4695_v61, %v3939_v16 }
 0xe07   :  { %v4699_v43 = vpop.eup %4698  ;;  %v4441_v8 = vmul.f32 -1.442695, %v3899_v31  ;;  %v3944_v7 = vsel %vm3943_vm10, %v4695_v61, %v3940_v2 }
 0xe08   :  { %v3919_v3 = vadd.f32 1.0, %v4699_v43  ;;  %v4701_v50 = vpop.eup %4700  ;;  %v3949_v10 = vsel %vm3946_vm11, %v3948_v23, %v3944_v7 }
 0xe09   :  { %4702 = vpow2.f32 %v4441_v8  ;;  %3997 = vst [vmem:[%s6828_s18 + $0x8] sm:$0xff] %v3949_v10  ;;  %v3952_v15 = vmul.f32 %v4701_v50, %v3918_v22  ;;  %vm3957_vm12 = vweird.f32 %v4701_v50 }
 0xe0a   :  { %4704 = vrcp.f32 %v3919_v3  ;;  %vm3958_vm15 = vmor %vm3956_vm14, %vm3957_vm12  ;;  %v3977_v54 = vand.u32 2147483648, %v3919_v3  ;;  %v3975_v42 = vand.u32 2147483647, %v3919_v3  ;;  %vm3971_vm8 = vweird.f32 %v3919_v3 }
 0xe0b   :  { %v3953_v33 = vsub.f32 1.0, %v3952_v15 }
 0xe0c   :  { %v3978_v62 = vor.u32 1.1754944e-38, %v3977_v54  ;;  %vm3976_vm0 = vcmp.eq.f32.partialorder %v3975_v42, 8.507059e+37 }
 0xe0d   :  { %v3954_v6 = vmul.f32 %v4701_v50, %v3953_v33 }
 0xe0f   :  { %v4703_v37 = vpop.eup %4702  ;;  %v3955_v47 = vadd.f32 %v4701_v50, %v3954_v6 }
 0xe10   :  { %v4705_v25 = vpop.eup %4704  ;;  %v3920_v48 = vadd.f32 1.0, %v4703_v37 }
 0xe11   :  { %v3967_v57 = vmul.f32 %v4705_v25, %v3919_v3  ;;  %v3959_v51 = vsel %vm3958_vm15, %v4701_v50, %v3955_v47  ;;  %vm3972_vm3 = vweird.f32 %v4705_v25 }
 0xe12   :  { %4706 = vrcp.f32 %v3920_v48  ;;  %v3964_v13 = vsel %vm3961_vm2, %v3963_v11, %v3959_v51  ;;  %vm3973_vm9 = vmor %vm3971_vm8, %vm3972_vm3  ;;  %v3992_v34 = vand.u32 2147483648, %v3920_v48  ;;  %v3990_v18 = vand.u32 2147483647, %v3920_v48 }
 0xe13   :  { %v3968_v58 = vsub.f32 1.0, %v3967_v57  ;;  %3998 = vst [vmem:[%s6828_s18 + $0x10] sm:$0xff] %v3964_v13  ;;  %vm3986_vm13 = vweird.f32 %v3920_v48 }
 0xe14   :  { %v3993_v32 = vor.u32 1.1754944e-38, %v3992_v34  ;;  %vm3991_vm5 = vcmp.eq.f32.partialorder %v3990_v18, 8.507059e+37 }
 0xe15   :  { %v3969_v19 = vmul.f32 %v4705_v25, %v3968_v58 }
 0xe17   :  { %v3970_v17 = vadd.f32 %v4705_v25, %v3969_v19 }
 0xe18   :  { %v4707_v26 = vpop.eup %4706 }
 0xe19   :  { %v3974_v39 = vsel %vm3973_vm9, %v4705_v25, %v3970_v17  ;;  %v3982_v1 = vmul.f32 %v4707_v26, %v3920_v48  ;;  %vm3987_vm1 = vweird.f32 %v4707_v26 }
 0xe1a   :  { %v3979_v30 = vsel %vm3976_vm0, %v3978_v62, %v3974_v39  ;;  %vm3988_vm4 = vmor %vm3986_vm13, %vm3987_vm1 }
 0xe1b   :  { %3999 = vst [vmem:[%s6828_s18 + $0x18] sm:$0xff] %v3979_v30  ;;  %v3983_v55 = vsub.f32 1.0, %v3982_v1 }
 0xe1d   :  { %v3984_v28 = vmul.f32 %v4707_v26, %v3983_v55 }
 0xe1f   :  { %v3985_v63 = vadd.f32 %v4707_v26, %v3984_v28 }
 0xe21   :  { %v3989_v5 = vsel %vm3988_vm4, %v4707_v26, %v3985_v63 }
 0xe22   :  { %v3994_v4 = vsel %vm3991_vm5, %v3993_v32, %v3989_v5 }
 0xe23   :  { %4000 = vst [vmem:[%s6828_s18 + $0x20] sm:$0x3] %v3994_v4 }

</bundles_post_ra>
